<compile_context>
chip_gen: v7x
topology: tpu7x:2x2x1
jax: 0.10.0
libtpu: 0.0.40
codegen_flags: <defaults>
</compile_context>

<pallas_src>
import functools
import math

import numpy as np
import jax
import jax.numpy as jnp
from jax import lax
from jax.experimental import pallas as pl
from jax.experimental.pallas import tpu as pltpu

BN_EPS = 1e-5


def _fold_bn(gamma, beta, mean, var):
    scale = gamma / jnp.sqrt(var + BN_EPS)
    bias = beta - mean * scale
    return scale, bias


# ---------------------------------------------------------------------------
# Fused SEBlock kernel: body convs + pool + SE gate + scale + residual + ReLU
# ---------------------------------------------------------------------------
def _se_block_kernel(x_ref, w1_ref, b1_ref, w2_ref, b2_ref, w3_ref, b3_ref,
                     sw1_ref, sb1_ref, sw2_ref, sb2_ref, wmask_ref, omask_ref,
                     o_ref, y1_scr, xres_scr, *, q, wp, c2, inv_hw):
    # Whole padded-image window (flat pixels x channels), bf16, one aligned load.
    xw = x_ref[...]                                                   # (P_WIN, Cin)

    # Stage the residual in f32 so the odd-offset row slice below is an unpacked read.
    xres_scr[...] = xw.astype(jnp.float32)

    # ---- 1x1 conv + BN + ReLU ----
    y1 = jnp.dot(xw, w1_ref[...], preferred_element_type=jnp.float32)
    y1 = jnp.maximum(y1 + b1_ref[...], 0.0)
    # Zero every position that is the 3x3 conv's spatial zero-padding (conv1+BN would
    # otherwise leave relu(bias) there).
    y1_scr[...] = y1 * wmask_ref[...]

    # ---- grouped 3x3 conv + BN + ReLU: 9 accumulating per-tap matmuls ----
    y2 = jnp.zeros((q, c2), jnp.float32)
    for ky in range(3):
        for kx in range(3):
            off = ky * wp + kx
            lhs = y1_scr[off:off + q, :].astype(jnp.bfloat16)         # (Q, C1)
            y2 = y2 + jnp.dot(lhs, w2_ref[ky * 3 + kx],
                              preferred_element_type=jnp.float32)
    y2 = jnp.maximum(y2 + b2_ref[...], 0.0)                           # (Q, C2)

    # ---- final 1x1 conv + BN (no ReLU) ----
    y3 = jnp.dot(y2.astype(jnp.bfloat16), w3_ref[...],
                 preferred_element_type=jnp.float32) + b3_ref[...]    # (Q, C4)
    y3 = y3 * omask_ref[...]              # zero the 2 wrap-around columns per row

    # ---- SE gate from the in-VMEM global average pool ----
    pooled = jnp.sum(y3, axis=0, keepdims=True) * inv_hw              # (1, C4)
    h = jnp.dot(pooled, sw1_ref[...], preferred_element_type=jnp.float32) + sb1_ref[...]
    h = jnp.maximum(h, 0.0)
    z = jnp.dot(h, sw2_ref[...], preferred_element_type=jnp.float32) + sb2_ref[...]
    s = 1.0 / (1.0 + jnp.exp(-z))                                     # exact sigmoid

    # ---- channel scale + residual (from the same window) + final ReLU ----
    resid = xres_scr[wp + 1:wp + 1 + q, :]                            # (Q, C4) f32
    o_ref[...] = jnp.maximum(y3 * s + resid, 0.0).astype(o_ref.dtype)


# ---------------------------------------------------------------------------
# Full SEBlock forward (downsample=False path, stride=1, eval-mode BatchNorm)
# ---------------------------------------------------------------------------
def se_block_forward(x_nchw, p, *, cardinality, stride=1):
    assert stride == 1, "downsample=False requires stride=1 for the residual add"
    N, Cin, H, W = x_nchw.shape
    G = cardinality
    C1 = p['w1'].shape[1]
    C2 = p['bn2'][0].shape[0]
    C4 = p['w3'].shape[1]
    cig, cog = p['w2'].shape[3], p['w2'].shape[4]
    assert Cin == C4, "residual add requires in_channels == channels*4 (downsample=False)"

    WP = W + 2                                    # padded row width
    Q = H * WP                                    # flat output rows per image
    P_WIN = -(-((H + 2) * WP + 2) // 8) * 8       # padded-image window rows, 8-aligned

    # Whole-image-resident fusion; re-derive / tile if this ever grows (v7x: 64 MiB VMEM).
    est_vmem = (2 * P_WIN * Cin * 2 + 2 * Q * C4 * 2
                + P_WIN * (C1 + C4) * 4 + Q * (C2 + 2 * C4) * 4)
    assert est_vmem < 24 * 1024 * 1024, (
        "image too large for whole-image fusion")   # TODO(synk): row-tiled fallback

    # ---- input: single pad to the flat padded layout, bf16 (also the residual) ----
    x = jnp.transpose(x_nchw, (0, 2, 3, 1)).astype(jnp.bfloat16)      # NHWC
    xp = jnp.pad(x, ((0, 0), (1, 1), (1, 1), (0, 0)))                 # (N, H+2, W+2, Cin)
    x_flat = xp.reshape(N, (H + 2) * WP, Cin)
    x_flat = jnp.pad(x_flat, ((0, 0), (0, P_WIN - (H + 2) * WP), (0, 0)))

    # ---- fold BatchNorm (inference) into conv weights / bias ----
    s1, b1 = _fold_bn(*p['bn1'])
    w1f = (p['w1'] * s1[None, :]).astype(jnp.bfloat16)
    b1f = b1.reshape(1, C1)

    s2, b2 = _fold_bn(*p['bn2'])
    w2s = p['w2'] * s2.reshape(G, 1, 1, 1, cog)
    # per-tap block-diagonal fold (dense across groups; fine at small G)
    w2_taps = jnp.zeros((9, C1, C2), jnp.float32)
    for ky in range(3):
        for kx in range(3):
            for g in range(G):
                w2_taps = w2_taps.at[ky * 3 + kx,
                                     g * cig:(g + 1) * cig,
                                     g * cog:(g + 1) * cog].set(w2s[g, ky, kx])
    w2f = w2_taps.astype(jnp.bfloat16)
    b2f = b2.reshape(1, C2)

    s3, b3 = _fold_bn(*p['bn3'])
    w3f = (p['w3'] * s3[None, :]).astype(jnp.bfloat16)
    b3f = b3.reshape(1, C4)

    # SE weights (tiny, kept f32), reduction dim zero-padded to a multiple of 8
    Cr = p['se_w1'].shape[1]
    Crp = ((Cr + 7) // 8) * 8
    se_w1 = jnp.pad(p['se_w1'], ((0, 0), (0, Crp - Cr)))
    se_b1 = jnp.pad(p['se_b1'], ((0, Crp - Cr),)).reshape(1, Crp)
    se_w2 = jnp.pad(p['se_w2'], ((0, Crp - Cr), (0, 0)))
    se_b2 = p['se_b2'].reshape(1, C4)

    # ---- masks (trace-time constants) ----
    prow = np.arange(P_WIN) // WP
    pcol = np.arange(P_WIN) % WP
    wmask = jnp.asarray(((prow >= 1) & (prow <= H) & (pcol >= 1) & (pcol <= W))
                        .astype(np.float32)[:, None])                 # (P_WIN, 1)
    omask = jnp.asarray(((np.arange(Q) % WP) < W)
                        .astype(np.float32)[:, None])                 # (Q, 1)

    def full(*shape):
        return pl.BlockSpec(shape, lambda n, _nd=len(shape): (0,) * _nd)

    out_flat = pl.pallas_call(
        functools.partial(_se_block_kernel, q=Q, wp=WP, c2=C2,
                          inv_hw=1.0 / float(H * W)),
        grid=(N,),
        in_specs=[
            pl.BlockSpec((None, P_WIN, Cin), lambda n: (n, 0, 0)),
            full(Cin, C1), full(1, C1),
            full(9, C1, C2), full(1, C2),
            full(C2, C4), full(1, C4),
            full(C4, Crp), full(1, Crp),
            full(Crp, C4), full(1, C4),
            full(P_WIN, 1), full(Q, 1),
        ],
        out_specs=pl.BlockSpec((None, Q, C4), lambda n: (n, 0, 0)),
        out_shape=jax.ShapeDtypeStruct((N, Q, C4), jnp.bfloat16),
        scratch_shapes=[pltpu.VMEM((P_WIN, C1), jnp.float32),
                        pltpu.VMEM((P_WIN, C4), jnp.float32)],
        compiler_params=pltpu.CompilerParams(
            dimension_semantics=("parallel",)),
    )(x_flat, w1f, b1f, w2f, b2f, w3f, b3f,
      se_w1, se_b1, se_w2, se_b2, wmask, omask)

    # strip the 2 wrap-around columns per row, back to NCHW f32
    out = out_flat.reshape(N, H, WP, C4)[:, :, :W, :]
    return jnp.transpose(out, (0, 3, 1, 2)).astype(jnp.float32)


# ---------------------------------------------------------------------------
# Deterministic parameter construction + pure-JAX reference for verification
# ---------------------------------------------------------------------------
def make_params(key, in_channels, channels, cardinality, bottleneck_width):
    D = int(math.floor(channels * (bottleneck_width / 64)))
    gw = cardinality * D
    c4 = channels * 4
    cr = channels // 4
    cig = (gw // 2) // cardinality
    cog = gw // cardinality
    ks = jax.random.split(key, 10)

    def rnd(k, shape, scale=0.1):
        return jax.random.normal(k, shape, jnp.float32) * scale

    def bn(k, c):
        k1, k2, k3, k4 = jax.random.split(k, 4)
        gamma = 1.0 + 0.1 * jax.random.normal(k1, (c,), jnp.float32)
        beta = 0.1 * jax.random.normal(k2, (c,), jnp.float32)
        mean = 0.1 * jax.random.normal(k3, (c,), jnp.float32)
        var = jnp.abs(jax.random.normal(k4, (c,), jnp.float32)) * 0.5 + 0.5
        return (gamma, beta, mean, var)

    return {
        'w1': rnd(ks[0], (in_channels, gw // 2)),
        'bn1': bn(ks[1], gw // 2),
        'w2': rnd(ks[2], (cardinality, 3, 3, cig, cog)),
        'bn2': bn(ks[3], gw),
        'w3': rnd(ks[4], (gw, c4)),
        'bn3': bn(ks[5], c4),
        'se_w1': rnd(ks[6], (c4, cr)),
        'se_b1': rnd(ks[7], (cr,)),
        'se_w2': rnd(ks[8], (cr, c4)),
        'se_b2': rnd(ks[9], (c4,)),
    }


def reference(x_nchw, p, *, cardinality):
    x = jnp.transpose(x_nchw, (0, 2, 3, 1)).astype(jnp.float32)

    def bn(y, stats):
        g, b, m, v = stats
        return (y - m) / jnp.sqrt(v + BN_EPS) * g + b

    y = jnp.einsum('nhwc,cd->nhwd', x, p['w1'])
    y = jax.nn.relu(bn(y, p['bn1']))
    G = cardinality
    _, _, _, cig, cog = p['w2'].shape
    w_hwio = jnp.transpose(p['w2'], (1, 2, 3, 0, 4)).reshape(3, 3, cig, G * cog)
    y = lax.conv_general_dilated(y, w_hwio, window_strides=(1, 1),
                                 padding=((1, 1), (1, 1)),
                                 dimension_numbers=('NHWC', 'HWIO', 'NHWC'),
                                 feature_group_count=G)
    y = jax.nn.relu(bn(y, p['bn2']))
    y = jnp.einsum('nhwc,cd->nhwd', y, p['w3'])
    y = bn(y, p['bn3'])
    pooled = jnp.mean(y, axis=(1, 2))
    h = jax.nn.relu(pooled @ p['se_w1'] + p['se_b1'])
    s = jax.nn.sigmoid(h @ p['se_w2'] + p['se_b2'])
    out = jax.nn.relu(y * s[:, None, None, :] + x)
    return jnp.transpose(out, (0, 3, 1, 2))


if __name__ == "__main__":
    # Config: channels=16, cardinality=2, bottleneck_width=64 -> D=16, group_width=32,
    # body: 64 -> 16 -> 32 (grouped, groups=2) -> 64; SE: 64 -> 4 -> 64.
    in_channels, channels, cardinality, bottleneck_width, stride = 64, 16, 2, 64, 1
    N, H, W = 2, 16, 16

    key = jax.random.PRNGKey(0)
    kx, kp = jax.random.split(key)
    x = jax.random.normal(kx, (N, in_channels, H, W), jnp.float32)
    params = make_params(kp, in_channels, channels, cardinality, bottleneck_width)

    fwd = jax.jit(functools.partial(se_block_forward,
                                    cardinality=cardinality, stride=stride))
    out = jax.block_until_ready(fwd(x, params))

    ref = reference(x, params, cardinality=cardinality)
    assert out.shape == (N, channels * 4, H, W), out.shape
    # bf16 MXU operands, bf16 input/residual and bf16 output store (inference bf16
    # contract) -> tolerance loosened accordingly; wrong kernels give O(1) errors.
    assert bool(jnp.allclose(out, ref, atol=7e-2, rtol=7e-2)), \
        float(jnp.max(jnp.abs(out - ref)))
    print("KERNEL_OK")
</pallas_src>

<mosaic_0001>
module attributes {stable_mosaic.version = 11 : i64} {
  func.func @_se_block_kernel(%arg0: i32, %arg1: memref<1x328x64xbf16, #tpu.memory_space<vmem>>, %arg2: memref<64x16xbf16, #tpu.memory_space<vmem>>, %arg3: memref<1x16xf32, #tpu.memory_space<vmem>>, %arg4: memref<9x16x32xbf16, #tpu.memory_space<vmem>>, %arg5: memref<1x32xf32, #tpu.memory_space<vmem>>, %arg6: memref<32x64xbf16, #tpu.memory_space<vmem>>, %arg7: memref<1x64xf32, #tpu.memory_space<vmem>>, %arg8: memref<64x8xf32, #tpu.memory_space<vmem>>, %arg9: memref<1x8xf32, #tpu.memory_space<vmem>>, %arg10: memref<8x64xf32, #tpu.memory_space<vmem>>, %arg11: memref<1x64xf32, #tpu.memory_space<vmem>>, %arg12: memref<328x1xf32, #tpu.memory_space<vmem>>, %arg13: memref<288x1xf32, #tpu.memory_space<vmem>>, %arg14: memref<1x288x64xbf16, #tpu.memory_space<vmem>>, %arg15: memref<328x16xf32, #tpu.memory_space<vmem>>, %arg16: memref<328x64xf32, #tpu.memory_space<vmem>>) attributes {dimension_semantics = [#tpu.dimension_semantics<parallel>], iteration_bounds = array<i64: 2>, scalar_prefetch = 0 : i64, scratch_operands = 2 : i64, tpu.core_type = #tpu.core_type<tc>, window_params = [{transform_indices = @transform_0, window_bounds = array<i64: 1, 328, 64>}, {pipeline_mode = #tpu.pipeline_mode<synchronous>, transform_indices = @transform_1, window_bounds = array<i64: 64, 16>}, {pipeline_mode = #tpu.pipeline_mode<synchronous>, transform_indices = @transform_2, window_bounds = array<i64: 1, 16>}, {pipeline_mode = #tpu.pipeline_mode<synchronous>, transform_indices = @transform_3, window_bounds = array<i64: 9, 16, 32>}, {pipeline_mode = #tpu.pipeline_mode<synchronous>, transform_indices = @transform_4, window_bounds = array<i64: 1, 32>}, {pipeline_mode = #tpu.pipeline_mode<synchronous>, transform_indices = @transform_5, window_bounds = array<i64: 32, 64>}, {pipeline_mode = #tpu.pipeline_mode<synchronous>, transform_indices = @transform_6, window_bounds = array<i64: 1, 64>}, {pipeline_mode = #tpu.pipeline_mode<synchronous>, transform_indices = @transform_7, window_bounds = array<i64: 64, 8>}, {pipeline_mode = #tpu.pipeline_mode<synchronous>, transform_indices = @transform_8, window_bounds = array<i64: 1, 8>}, {pipeline_mode = #tpu.pipeline_mode<synchronous>, transform_indices = @transform_9, window_bounds = array<i64: 8, 64>}, {pipeline_mode = #tpu.pipeline_mode<synchronous>, transform_indices = @transform_10, window_bounds = array<i64: 1, 64>}, {pipeline_mode = #tpu.pipeline_mode<synchronous>, transform_indices = @transform_11, window_bounds = array<i64: 328, 1>}, {pipeline_mode = #tpu.pipeline_mode<synchronous>, transform_indices = @transform_12, window_bounds = array<i64: 288, 1>}, {transform_indices = @transform_13, window_bounds = array<i64: 1, 288, 64>}]} {
    %c0 = arith.constant 0 : index
    %c0_0 = arith.constant 0 : index
    %c0_1 = arith.constant 0 : index
    %0 = vector.load %arg1[%c0, %c0_0, %c0_1] : memref<1x328x64xbf16, #tpu.memory_space<vmem>>, vector<1x328x64xbf16>
    %1 = vector.shape_cast %0 : vector<1x328x64xbf16> to vector<328x64xbf16>
    %2 = arith.extf %1 : vector<328x64xbf16> to vector<328x64xf32>
    %c0_2 = arith.constant 0 : index
    %c0_3 = arith.constant 0 : index
    %3 = vector.load %arg16[%c0_2, %c0_3] : memref<328x64xf32, #tpu.memory_space<vmem>>, vector<328x64xf32>
    tpu.vector_store %arg16[%c0_2, %c0_3], %2 {strides = array<i32>} : memref<328x64xf32, #tpu.memory_space<vmem>>, vector<328x64xf32>,
    %c0_4 = arith.constant 0 : index
    %c0_5 = arith.constant 0 : index
    %4 = vector.load %arg2[%c0_4, %c0_5] : memref<64x16xbf16, #tpu.memory_space<vmem>>, vector<64x16xbf16>
    %cst = arith.constant dense<0.000000e+00> : vector<328x16xf32>
    %5 = tpu.matmul %1, %4, %cst {dimension_numbers = #tpu.dot_dimension_numbers<[1], [0], [0], [1], [0, 0, 1, 1], [], []>} : vector<328x64xbf16>, vector<64x16xbf16>, vector<328x16xf32> -> vector<328x16xf32>
    %c0_6 = arith.constant 0 : index
    %c0_7 = arith.constant 0 : index
    %6 = vector.load %arg3[%c0_6, %c0_7] : memref<1x16xf32, #tpu.memory_space<vmem>>, vector<1x16xf32>
    %7 = vector.broadcast %6 : vector<1x16xf32> to vector<328x16xf32>
    %8 = arith.addf %5, %7 : vector<328x16xf32>
    %cst_8 = arith.constant 0.000000e+00 : f32
    %9 = vector.broadcast %cst_8 : f32 to vector<328x16xf32>
    %10 = arith.maximumf %8, %9 : vector<328x16xf32>
    %c0_9 = arith.constant 0 : index
    %c0_10 = arith.constant 0 : index
    %11 = vector.load %arg12[%c0_9, %c0_10] : memref<328x1xf32, #tpu.memory_space<vmem>>, vector<328x1xf32>
    %12 = vector.broadcast %11 : vector<328x1xf32> to vector<328x16xf32>
    %13 = arith.mulf %10, %12 : vector<328x16xf32>
    %c0_11 = arith.constant 0 : index
    %c0_12 = arith.constant 0 : index
    %14 = vector.load %arg15[%c0_11, %c0_12] : memref<328x16xf32, #tpu.memory_space<vmem>>, vector<328x16xf32>
    tpu.vector_store %arg15[%c0_11, %c0_12], %13 {strides = array<i32>} : memref<328x16xf32, #tpu.memory_space<vmem>>, vector<328x16xf32>,
    %cst_13 = arith.constant 0.000000e+00 : f32
    %15 = vector.broadcast %cst_13 : f32 to vector<288x32xf32>
    %c0_14 = arith.constant 0 : index
    %c0_15 = arith.constant 0 : index
    %16 = vector.load %arg15[%c0_14, %c0_15] : memref<328x16xf32, #tpu.memory_space<vmem>>, vector<288x16xf32>
    %17 = arith.truncf %16 : vector<288x16xf32> to vector<288x16xbf16>
    %c0_16 = arith.constant 0 : index
    %c0_17 = arith.constant 0 : index
    %c0_18 = arith.constant 0 : index
    %18 = vector.load %arg4[%c0_16, %c0_17, %c0_18] : memref<9x16x32xbf16, #tpu.memory_space<vmem>>, vector<1x16x32xbf16>
    %19 = vector.shape_cast %18 : vector<1x16x32xbf16> to vector<16x32xbf16>
    %cst_19 = arith.constant dense<0.000000e+00> : vector<288x32xf32>
    %20 = tpu.matmul %17, %19, %cst_19 {dimension_numbers = #tpu.dot_dimension_numbers<[1], [0], [0], [1], [0, 0, 1, 1], [], []>} : vector<288x16xbf16>, vector<16x32xbf16>, vector<288x32xf32> -> vector<288x32xf32>
    %21 = arith.addf %15, %20 : vector<288x32xf32>
    %c1 = arith.constant 1 : index
    %c0_20 = arith.constant 0 : index
    %22 = vector.load %arg15[%c1, %c0_20] : memref<328x16xf32, #tpu.memory_space<vmem>>, vector<288x16xf32>
    %23 = arith.truncf %22 : vector<288x16xf32> to vector<288x16xbf16>
    %c1_21 = arith.constant 1 : index
    %c0_22 = arith.constant 0 : index
    %c0_23 = arith.constant 0 : index
    %24 = vector.load %arg4[%c1_21, %c0_22, %c0_23] : memref<9x16x32xbf16, #tpu.memory_space<vmem>>, vector<1x16x32xbf16>
    %25 = vector.shape_cast %24 : vector<1x16x32xbf16> to vector<16x32xbf16>
    %cst_24 = arith.constant dense<0.000000e+00> : vector<288x32xf32>
    %26 = tpu.matmul %23, %25, %cst_24 {dimension_numbers = #tpu.dot_dimension_numbers<[1], [0], [0], [1], [0, 0, 1, 1], [], []>} : vector<288x16xbf16>, vector<16x32xbf16>, vector<288x32xf32> -> vector<288x32xf32>
    %27 = arith.addf %21, %26 : vector<288x32xf32>
    %c2 = arith.constant 2 : index
    %c0_25 = arith.constant 0 : index
    %28 = vector.load %arg15[%c2, %c0_25] : memref<328x16xf32, #tpu.memory_space<vmem>>, vector<288x16xf32>
    %29 = arith.truncf %28 : vector<288x16xf32> to vector<288x16xbf16>
    %c2_26 = arith.constant 2 : index
    %c0_27 = arith.constant 0 : index
    %c0_28 = arith.constant 0 : index
    %30 = vector.load %arg4[%c2_26, %c0_27, %c0_28] : memref<9x16x32xbf16, #tpu.memory_space<vmem>>, vector<1x16x32xbf16>
    %31 = vector.shape_cast %30 : vector<1x16x32xbf16> to vector<16x32xbf16>
    %cst_29 = arith.constant dense<0.000000e+00> : vector<288x32xf32>
    %32 = tpu.matmul %29, %31, %cst_29 {dimension_numbers = #tpu.dot_dimension_numbers<[1], [0], [0], [1], [0, 0, 1, 1], [], []>} : vector<288x16xbf16>, vector<16x32xbf16>, vector<288x32xf32> -> vector<288x32xf32>
    %33 = arith.addf %27, %32 : vector<288x32xf32>
    %c18 = arith.constant 18 : index
    %c0_30 = arith.constant 0 : index
    %34 = vector.load %arg15[%c18, %c0_30] : memref<328x16xf32, #tpu.memory_space<vmem>>, vector<288x16xf32>
    %35 = arith.truncf %34 : vector<288x16xf32> to vector<288x16xbf16>
    %c3 = arith.constant 3 : index
    %c0_31 = arith.constant 0 : index
    %c0_32 = arith.constant 0 : index
    %36 = vector.load %arg4[%c3, %c0_31, %c0_32] : memref<9x16x32xbf16, #tpu.memory_space<vmem>>, vector<1x16x32xbf16>
    %37 = vector.shape_cast %36 : vector<1x16x32xbf16> to vector<16x32xbf16>
    %cst_33 = arith.constant dense<0.000000e+00> : vector<288x32xf32>
    %38 = tpu.matmul %35, %37, %cst_33 {dimension_numbers = #tpu.dot_dimension_numbers<[1], [0], [0], [1], [0, 0, 1, 1], [], []>} : vector<288x16xbf16>, vector<16x32xbf16>, vector<288x32xf32> -> vector<288x32xf32>
    %39 = arith.addf %33, %38 : vector<288x32xf32>
    %c19 = arith.constant 19 : index
    %c0_34 = arith.constant 0 : index
    %40 = vector.load %arg15[%c19, %c0_34] : memref<328x16xf32, #tpu.memory_space<vmem>>, vector<288x16xf32>
    %41 = arith.truncf %40 : vector<288x16xf32> to vector<288x16xbf16>
    %c4 = arith.constant 4 : index
    %c0_35 = arith.constant 0 : index
    %c0_36 = arith.constant 0 : index
    %42 = vector.load %arg4[%c4, %c0_35, %c0_36] : memref<9x16x32xbf16, #tpu.memory_space<vmem>>, vector<1x16x32xbf16>
    %43 = vector.shape_cast %42 : vector<1x16x32xbf16> to vector<16x32xbf16>
    %cst_37 = arith.constant dense<0.000000e+00> : vector<288x32xf32>
    %44 = tpu.matmul %41, %43, %cst_37 {dimension_numbers = #tpu.dot_dimension_numbers<[1], [0], [0], [1], [0, 0, 1, 1], [], []>} : vector<288x16xbf16>, vector<16x32xbf16>, vector<288x32xf32> -> vector<288x32xf32>
    %45 = arith.addf %39, %44 : vector<288x32xf32>
    %c20 = arith.constant 20 : index
    %c0_38 = arith.constant 0 : index
    %46 = vector.load %arg15[%c20, %c0_38] : memref<328x16xf32, #tpu.memory_space<vmem>>, vector<288x16xf32>
    %47 = arith.truncf %46 : vector<288x16xf32> to vector<288x16xbf16>
    %c5 = arith.constant 5 : index
    %c0_39 = arith.constant 0 : index
    %c0_40 = arith.constant 0 : index
    %48 = vector.load %arg4[%c5, %c0_39, %c0_40] : memref<9x16x32xbf16, #tpu.memory_space<vmem>>, vector<1x16x32xbf16>
    %49 = vector.shape_cast %48 : vector<1x16x32xbf16> to vector<16x32xbf16>
    %cst_41 = arith.constant dense<0.000000e+00> : vector<288x32xf32>
    %50 = tpu.matmul %47, %49, %cst_41 {dimension_numbers = #tpu.dot_dimension_numbers<[1], [0], [0], [1], [0, 0, 1, 1], [], []>} : vector<288x16xbf16>, vector<16x32xbf16>, vector<288x32xf32> -> vector<288x32xf32>
    %51 = arith.addf %45, %50 : vector<288x32xf32>
    %c36 = arith.constant 36 : index
    %c0_42 = arith.constant 0 : index
    %52 = vector.load %arg15[%c36, %c0_42] : memref<328x16xf32, #tpu.memory_space<vmem>>, vector<288x16xf32>
    %53 = arith.truncf %52 : vector<288x16xf32> to vector<288x16xbf16>
    %c6 = arith.constant 6 : index
    %c0_43 = arith.constant 0 : index
    %c0_44 = arith.constant 0 : index
    %54 = vector.load %arg4[%c6, %c0_43, %c0_44] : memref<9x16x32xbf16, #tpu.memory_space<vmem>>, vector<1x16x32xbf16>
    %55 = vector.shape_cast %54 : vector<1x16x32xbf16> to vector<16x32xbf16>
    %cst_45 = arith.constant dense<0.000000e+00> : vector<288x32xf32>
    %56 = tpu.matmul %53, %55, %cst_45 {dimension_numbers = #tpu.dot_dimension_numbers<[1], [0], [0], [1], [0, 0, 1, 1], [], []>} : vector<288x16xbf16>, vector<16x32xbf16>, vector<288x32xf32> -> vector<288x32xf32>
    %57 = arith.addf %51, %56 : vector<288x32xf32>
    %c37 = arith.constant 37 : index
    %c0_46 = arith.constant 0 : index
    %58 = vector.load %arg15[%c37, %c0_46] : memref<328x16xf32, #tpu.memory_space<vmem>>, vector<288x16xf32>
    %59 = arith.truncf %58 : vector<288x16xf32> to vector<288x16xbf16>
    %c7 = arith.constant 7 : index
    %c0_47 = arith.constant 0 : index
    %c0_48 = arith.constant 0 : index
    %60 = vector.load %arg4[%c7, %c0_47, %c0_48] : memref<9x16x32xbf16, #tpu.memory_space<vmem>>, vector<1x16x32xbf16>
    %61 = vector.shape_cast %60 : vector<1x16x32xbf16> to vector<16x32xbf16>
    %cst_49 = arith.constant dense<0.000000e+00> : vector<288x32xf32>
    %62 = tpu.matmul %59, %61, %cst_49 {dimension_numbers = #tpu.dot_dimension_numbers<[1], [0], [0], [1], [0, 0, 1, 1], [], []>} : vector<288x16xbf16>, vector<16x32xbf16>, vector<288x32xf32> -> vector<288x32xf32>
    %63 = arith.addf %57, %62 : vector<288x32xf32>
    %c38 = arith.constant 38 : index
    %c0_50 = arith.constant 0 : index
    %64 = vector.load %arg15[%c38, %c0_50] : memref<328x16xf32, #tpu.memory_space<vmem>>, vector<288x16xf32>
    %65 = arith.truncf %64 : vector<288x16xf32> to vector<288x16xbf16>
    %c8 = arith.constant 8 : index
    %c0_51 = arith.constant 0 : index
    %c0_52 = arith.constant 0 : index
    %66 = vector.load %arg4[%c8, %c0_51, %c0_52] : memref<9x16x32xbf16, #tpu.memory_space<vmem>>, vector<1x16x32xbf16>
    %67 = vector.shape_cast %66 : vector<1x16x32xbf16> to vector<16x32xbf16>
    %cst_53 = arith.constant dense<0.000000e+00> : vector<288x32xf32>
    %68 = tpu.matmul %65, %67, %cst_53 {dimension_numbers = #tpu.dot_dimension_numbers<[1], [0], [0], [1], [0, 0, 1, 1], [], []>} : vector<288x16xbf16>, vector<16x32xbf16>, vector<288x32xf32> -> vector<288x32xf32>
    %69 = arith.addf %63, %68 : vector<288x32xf32>
    %c0_54 = arith.constant 0 : index
    %c0_55 = arith.constant 0 : index
    %70 = vector.load %arg5[%c0_54, %c0_55] : memref<1x32xf32, #tpu.memory_space<vmem>>, vector<1x32xf32>
    %71 = vector.broadcast %70 : vector<1x32xf32> to vector<288x32xf32>
    %72 = arith.addf %69, %71 : vector<288x32xf32>
    %cst_56 = arith.constant 0.000000e+00 : f32
    %73 = vector.broadcast %cst_56 : f32 to vector<288x32xf32>
    %74 = arith.maximumf %72, %73 : vector<288x32xf32>
    %75 = arith.truncf %74 : vector<288x32xf32> to vector<288x32xbf16>
    %c0_57 = arith.constant 0 : index
    %c0_58 = arith.constant 0 : index
    %76 = vector.load %arg6[%c0_57, %c0_58] : memref<32x64xbf16, #tpu.memory_space<vmem>>, vector<32x64xbf16>
    %cst_59 = arith.constant dense<0.000000e+00> : vector<288x64xf32>
    %77 = tpu.matmul %75, %76, %cst_59 {dimension_numbers = #tpu.dot_dimension_numbers<[1], [0], [0], [1], [0, 0, 1, 1], [], []>} : vector<288x32xbf16>, vector<32x64xbf16>, vector<288x64xf32> -> vector<288x64xf32>
    %c0_60 = arith.constant 0 : index
    %c0_61 = arith.constant 0 : index
    %78 = vector.load %arg7[%c0_60, %c0_61] : memref<1x64xf32, #tpu.memory_space<vmem>>, vector<1x64xf32>
    %79 = vector.broadcast %78 : vector<1x64xf32> to vector<288x64xf32>
    %80 = arith.addf %77, %79 : vector<288x64xf32>
    %c0_62 = arith.constant 0 : index
    %c0_63 = arith.constant 0 : index
    %81 = vector.load %arg13[%c0_62, %c0_63] : memref<288x1xf32, #tpu.memory_space<vmem>>, vector<288x1xf32>
    %82 = vector.broadcast %81 : vector<288x1xf32> to vector<288x64xf32>
    %83 = arith.mulf %80, %82 : vector<288x64xf32>
    %cst_64 = arith.constant dense<0.000000e+00> : vector<64xf32>
    %84 = vector.multi_reduction <add>, %83, %cst_64 [0] : vector<288x64xf32> to vector<64xf32>
    %85 = vector.shape_cast %84 : vector<64xf32> to vector<1x64xf32>
    %cst_65 = arith.constant 3.906250e-03 : f32
    %86 = vector.broadcast %cst_65 : f32 to vector<1x64xf32>
    %87 = arith.mulf %85, %86 : vector<1x64xf32>
    %c0_66 = arith.constant 0 : index
    %c0_67 = arith.constant 0 : index
    %88 = vector.load %arg8[%c0_66, %c0_67] : memref<64x8xf32, #tpu.memory_space<vmem>>, vector<64x8xf32>
    %cst_68 = arith.constant dense<0.000000e+00> : vector<1x8xf32>
    %89 = tpu.matmul %87, %88, %cst_68 {dimension_numbers = #tpu.dot_dimension_numbers<[1], [0], [0], [1], [0, 0, 1, 1], [], []>} : vector<1x64xf32>, vector<64x8xf32>, vector<1x8xf32> -> vector<1x8xf32>
    %c0_69 = arith.constant 0 : index
    %c0_70 = arith.constant 0 : index
    %90 = vector.load %arg9[%c0_69, %c0_70] : memref<1x8xf32, #tpu.memory_space<vmem>>, vector<1x8xf32>
    %91 = arith.addf %89, %90 : vector<1x8xf32>
    %cst_71 = arith.constant 0.000000e+00 : f32
    %92 = vector.broadcast %cst_71 : f32 to vector<1x8xf32>
    %93 = arith.maximumf %91, %92 : vector<1x8xf32>
    %c0_72 = arith.constant 0 : index
    %c0_73 = arith.constant 0 : index
    %94 = vector.load %arg10[%c0_72, %c0_73] : memref<8x64xf32, #tpu.memory_space<vmem>>, vector<8x64xf32>
    %cst_74 = arith.constant dense<0.000000e+00> : vector<1x64xf32>
    %95 = tpu.matmul %93, %94, %cst_74 {dimension_numbers = #tpu.dot_dimension_numbers<[1], [0], [0], [1], [0, 0, 1, 1], [], []>} : vector<1x8xf32>, vector<8x64xf32>, vector<1x64xf32> -> vector<1x64xf32>
    %c0_75 = arith.constant 0 : index
    %c0_76 = arith.constant 0 : index
    %96 = vector.load %arg11[%c0_75, %c0_76] : memref<1x64xf32, #tpu.memory_space<vmem>>, vector<1x64xf32>
    %97 = arith.addf %95, %96 : vector<1x64xf32>
    %cst_77 = arith.constant 0.000000e+00 : f32
    %98 = vector.broadcast %cst_77 : f32 to vector<1x64xf32>
    %99 = arith.subf %98, %97 : vector<1x64xf32>
    %100 = math.exp %99 : vector<1x64xf32>
    %cst_78 = arith.constant 1.000000e+00 : f32
    %101 = vector.broadcast %cst_78 : f32 to vector<1x64xf32>
    %102 = arith.addf %101, %100 : vector<1x64xf32>
    %cst_79 = arith.constant 1.000000e+00 : f32
    %103 = vector.broadcast %cst_79 : f32 to vector<1x64xf32>
    %104 = arith.divf %103, %102 : vector<1x64xf32>
    %c19_80 = arith.constant 19 : index
    %c0_81 = arith.constant 0 : index
    %105 = vector.load %arg16[%c19_80, %c0_81] : memref<328x64xf32, #tpu.memory_space<vmem>>, vector<288x64xf32>
    %106 = vector.broadcast %104 : vector<1x64xf32> to vector<288x64xf32>
    %107 = arith.mulf %83, %106 : vector<288x64xf32>
    %108 = arith.addf %107, %105 : vector<288x64xf32>
    %cst_82 = arith.constant 0.000000e+00 : f32
    %109 = vector.broadcast %cst_82 : f32 to vector<288x64xf32>
    %110 = arith.maximumf %108, %109 : vector<288x64xf32>
    %111 = arith.truncf %110 : vector<288x64xf32> to vector<288x64xbf16>
    %c0_83 = arith.constant 0 : index
    %c0_84 = arith.constant 0 : index
    %c0_85 = arith.constant 0 : index
    %112 = vector.load %arg14[%c0_83, %c0_84, %c0_85] : memref<1x288x64xbf16, #tpu.memory_space<vmem>>, vector<1x288x64xbf16>
    %113 = vector.shape_cast %112 : vector<1x288x64xbf16> to vector<288x64xbf16>
    %114 = vector.shape_cast %111 : vector<288x64xbf16> to vector<1x288x64xbf16>
    tpu.vector_store %arg14[%c0_83, %c0_84, %c0_85], %114 {strides = array<i32>} : memref<1x288x64xbf16, #tpu.memory_space<vmem>>, vector<1x288x64xbf16>,
    return
  }
  func.func @transform_0(%arg0: i32) -> (i32, i32, i32) {
    %c0_i32 = arith.constant 0 : i32
    %c0_i32_0 = arith.constant 0 : i32
    %c0_i32_1 = arith.constant 0 : i32
    return %arg0, %c0_i32, %c0_i32_0 : i32, i32, i32
  }
  func.func @transform_1(%arg0: i32) -> (i32, i32) {
    %c0_i32 = arith.constant 0 : i32
    %c0_i32_0 = arith.constant 0 : i32
    %c0_i32_1 = arith.constant 0 : i32
    return %c0_i32, %c0_i32_0 : i32, i32
  }
  func.func @transform_2(%arg0: i32) -> (i32, i32) {
    %c0_i32 = arith.constant 0 : i32
    %c0_i32_0 = arith.constant 0 : i32
    %c0_i32_1 = arith.constant 0 : i32
    return %c0_i32, %c0_i32_0 : i32, i32
  }
  func.func @transform_3(%arg0: i32) -> (i32, i32, i32) {
    %c0_i32 = arith.constant 0 : i32
    %c0_i32_0 = arith.constant 0 : i32
    %c0_i32_1 = arith.constant 0 : i32
    %c0_i32_2 = arith.constant 0 : i32
    return %c0_i32, %c0_i32_0, %c0_i32_1 : i32, i32, i32
  }
  func.func @transform_4(%arg0: i32) -> (i32, i32) {
    %c0_i32 = arith.constant 0 : i32
    %c0_i32_0 = arith.constant 0 : i32
    %c0_i32_1 = arith.constant 0 : i32
    return %c0_i32, %c0_i32_0 : i32, i32
  }
  func.func @transform_5(%arg0: i32) -> (i32, i32) {
    %c0_i32 = arith.constant 0 : i32
    %c0_i32_0 = arith.constant 0 : i32
    %c0_i32_1 = arith.constant 0 : i32
    return %c0_i32, %c0_i32_0 : i32, i32
  }
  func.func @transform_6(%arg0: i32) -> (i32, i32) {
    %c0_i32 = arith.constant 0 : i32
    %c0_i32_0 = arith.constant 0 : i32
    %c0_i32_1 = arith.constant 0 : i32
    return %c0_i32, %c0_i32_0 : i32, i32
  }
  func.func @transform_7(%arg0: i32) -> (i32, i32) {
    %c0_i32 = arith.constant 0 : i32
    %c0_i32_0 = arith.constant 0 : i32
    %c0_i32_1 = arith.constant 0 : i32
    return %c0_i32, %c0_i32_0 : i32, i32
  }
  func.func @transform_8(%arg0: i32) -> (i32, i32) {
    %c0_i32 = arith.constant 0 : i32
    %c0_i32_0 = arith.constant 0 : i32
    %c0_i32_1 = arith.constant 0 : i32
    return %c0_i32, %c0_i32_0 : i32, i32
  }
  func.func @transform_9(%arg0: i32) -> (i32, i32) {
    %c0_i32 = arith.constant 0 : i32
    %c0_i32_0 = arith.constant 0 : i32
    %c0_i32_1 = arith.constant 0 : i32
    return %c0_i32, %c0_i32_0 : i32, i32
  }
  func.func @transform_10(%arg0: i32) -> (i32, i32) {
    %c0_i32 = arith.constant 0 : i32
    %c0_i32_0 = arith.constant 0 : i32
    %c0_i32_1 = arith.constant 0 : i32
    return %c0_i32, %c0_i32_0 : i32, i32
  }
  func.func @transform_11(%arg0: i32) -> (i32, i32) {
    %c0_i32 = arith.constant 0 : i32
    %c0_i32_0 = arith.constant 0 : i32
    %c0_i32_1 = arith.constant 0 : i32
    return %c0_i32, %c0_i32_0 : i32, i32
  }
  func.func @transform_12(%arg0: i32) -> (i32, i32) {
    %c0_i32 = arith.constant 0 : i32
    %c0_i32_0 = arith.constant 0 : i32
    %c0_i32_1 = arith.constant 0 : i32
    return %c0_i32, %c0_i32_0 : i32, i32
  }
  func.func @transform_13(%arg0: i32) -> (i32, i32, i32) {
    %c0_i32 = arith.constant 0 : i32
    %c0_i32_0 = arith.constant 0 : i32
    %c0_i32_1 = arith.constant 0 : i32
    return %arg0, %c0_i32, %c0_i32_0 : i32, i32, i32
  }
}

</mosaic_0001>

<bundles_post_ra>
// kernel: mul.22
= control target key start
LH: loop header
LB: loop body
LE: loop exit
PB: predicated region body
PF: predicated region fallthrough
CT: control target
= control target key end

     0   :  { %vm7_vm0 = vcmask 130048   ;;  %s39_s0 = inlined_call_operand.vmem [shape: f32[32], index: 0, kind: input, shape index: {}]   ;;  %s40_s1 = inlined_call_operand.vmem [shape: f32[2,16], index: 1, kind: output, shape index: {}]  }
   0x1   :  { %v4_v0 = vld [vmem:[%s39_s0] sm:$0x1]  ;;  %s22_s0 = smov 112  }
   0x2   :  { %5 = vst [vmem:[#allocation1] sm:$0x1] %v4_v0 }
   0x9   :  { %v9_v1 = vld [vmem:[#allocation1] sm:$0x1]  }
   0xa   :  { %v6_v2 = vld [vmem:[#allocation1] sm:$0x1]   ;;  %10 = vrot.lane.b32.xlu0 %v9_v1, %s22_s0 }
   0xb   :  { %8 = vst.msk [vmem:[#allocation0] sm:$0x1] %vm7_vm0, %v6_v2  }
  0x7c   :  { %v11_v3 = vpop.permute.xlu0 %10  }
  0x7d   :  { %14 = vst.msk [vmem:[#allocation0 + $0x1] sm:$0x1] %vm7_vm0, %v11_v3  }
  0x84   :  { %v18_v4 = vld [vmem:[#allocation0] sm:$0x3] }
  0x85   :  { %20 = vst [vmem:[%s40_s1] sm:$0x3] %v18_v4 }

// kernel: se_block_forward.1
= control target key start
LH: loop header
LB: loop body
LE: loop exit
PB: predicated region body
PF: predicated region fallthrough
CT: control target
= control target key end

     0   :  { %s6972_s25 = smov 0   ;;  %s8613_s0 = inlined_call_operand.vmem [shape: bf16[2,328,64], index: 0, kind: input, shape index: {}]   ;;  %s8614_s1 = inlined_call_operand.vmem [shape: bf16[64,16], index: 1, kind: input, shape index: {}]   ;;  %s8615_s2 = inlined_call_operand.vmem [shape: f32[1,16], index: 2, kind: input, shape index: {}]   ;;  %s8616_s3 = inlined_call_operand.vmem [shape: bf16[9,16,32], index: 3, kind: input, shape index: {}]   ;;  %s8617_s4 = inlined_call_operand.vmem [shape: f32[1,32], index: 4, kind: input, shape index: {}]   ;;  %s8618_s5 = inlined_call_operand.vmem [shape: bf16[32,64], index: 5, kind: input, shape index: {}]   ;;  %s8619_s6 = inlined_call_operand.vmem [shape: f32[1,64], index: 6, kind: input, shape index: {}]   ;;  %s8620_s7 = inlined_call_operand.vmem [shape: f32[64,8], index: 7, kind: input, shape index: {}]   ;;  %s8621_s8 = inlined_call_operand.vmem [shape: f32[1,8], index: 8, kind: input, shape index: {}]   ;;  %s8622_s9 = inlined_call_operand.vmem [shape: f32[8,64], index: 9, kind: input, shape index: {}]   ;;  %s8623_s10 = inlined_call_operand.vmem [shape: f32[1,64], index: 10, kind: input, shape index: {}]   ;;  %s8624_s11 = inlined_call_operand.vmem [shape: f32[328,1], index: 11, kind: input, shape index: {}]   ;;  %s8625_s12 = inlined_call_operand.vmem [shape: f32[288,1], index: 12, kind: input, shape index: {}]   ;;  %s8626_s13 = inlined_call_operand.vmem [shape: bf16[2,288,64], index: 13, kind: output, shape index: {}]  }
   0x1 LB: > { %s5469_s26 = sadd.s32 4294967295, %s6896_s25   ;;  %p5473_p0 = scmp.ge.s32.totalorder %s6896_s25, 1  ;;  %s6896_s25 = sphi %s6972_s25, %s23_s25  }
   0x2   : > { %p387_p1 = scmp.lt.s32.totalorder %s6896_s25, 3 }
   0x4   : > { %p388_p2 = pnand %p5473_p0, %p387_p1 }
   0x6   : > { %391 = sbr.rel (%p388_p2) target bundleno = 1807 (0x70f), region = 72 }
   0xd   : > { %v6851_v0 = vld [vmem:[%s8614_s1] sm:$0xff]   ;;  %v6898_v1 = vmov 0.0   ;;  %v6852_v2 = vld [vmem:[%s8614_s1 + $0x8] sm:$0xff]   ;;  %vm6899_vm0 = vmmov 0   ;;  %p431_p3 = scmp.lt.s32.totalorder %s5469_s26, 1  ;;  %v1038_v4 = vld [vmem:[%s8624_s11 + $0xd0] sm:$0xff] }
   0xe   : > { %6035 = vmatprep.subr.bf16.mxu0 %v6898_v1  ;;  %6043 = vmatprep.mubr.msk.bf16.mxu0 %vm6899_vm0, %v6898_v1  ;;  %v1036_v3 = vld [vmem:[%s8624_s11 + $0xc0] sm:$0xff]  ;;  %v6900_v5 = vmov 0   ;;  %v6853_v6 = vld [vmem:[%s8614_s1 + $0x10] sm:$0xff]   ;;  %v1037_v7 = vld [vmem:[%s8624_s11 + $0xc8] sm:$0xff]  ;;  %vm524_vm1 = vcmask 523264   ;;  %vm1299_vm2 = vcmask 130048  }
   0xf   : > { %6036 = vmatpush3.bf16.msra.mxu0 %v6851_v0  ;;  %s8638_s26 = smov (!%p431_p3, %s5469_s26), 1  ;;  %6849 = vset.pattern.permute.xlu0 %v6900_v5  ;;  %v1039_v8 = vld [vmem:[%s8624_s11 + $0xd8] sm:$0xff]  ;;  %v1040_v17 = vld [vmem:[%s8624_s11 + $0xe0] sm:$0xff]  ;;  %v1041_v19 = vld [vmem:[%s8624_s11 + $0xe8] sm:$0xff]  ;;  %vm4358_vm3 = vcmask 261120   ;;  %vm5005_vm4 = vcmask 64512  }
  0x10   : > { %6037 = vmatprep.subr.bf16.mxu0 %v6898_v1  ;;  %6850 = vset.pattern.permute.xlu1 %v6900_v5  ;;  %s6835_s20 = smul.u32 164, %s8638_s26  ;;  %v6854_v11 = vld [vmem:[%s8614_s1 + $0x18] sm:$0xff]   ;;  %v1042_v32 = vld [vmem:[%s8624_s11 + $0xf0] sm:$0xff]  ;;  %v1044_v43 = vld [vmem:[%s8624_s11 + $0x100] sm:$0xff]  ;;  %vm5377_vm5 = vcmask 519168  }
  0x11   : > { %1175 = vperm.xlu0 %6849, %v1036_v3   ;;  %1185 = vperm.xlu1 %6850, %v1038_v4   ;;  %v1043_v36 = vld [vmem:[%s8624_s11 + $0xf8] sm:$0xff]  ;;  %v1045_v46 = vld [vmem:[%s8624_s11 + $0x108] sm:$0xff]  ;;  %v1046_v47 = vld [vmem:[%s8624_s11 + $0x110] sm:$0xff]  ;;  %s6836_s18 = smul.u32 144, %s8638_s26 }
  0x12   : > { %s7009_s27 = scalar_lea.vmem %s8613_s0, %s6835_s20  ;;  %v1047_v48 = vld [vmem:[%s8624_s11 + $0x118] sm:$0xff]  ;;  %v1048_v54 = vld [vmem:[%s8624_s11 + $0x120] sm:$0xff]  ;;  %v1014_v59 = vld [vmem:[%s8624_s11 + $0x10] sm:$0xff] }
  0x13   : > { %6038 = vmatpush3.bf16.msra.mxu0 %v6852_v2  ;;  %v442_v9 = vld [vmem:[%s7009_s27] sm:$0xff]   ;;  %v7016_v10 = vld [vmem:[%s7009_s27 + $0x8] sm:$0xff]   ;;  %v7023_v13 = vld [vmem:[%s7009_s27 + $0x10] sm:$0xff]   ;;  %s8532_s20 = scalar_lea.vmem %s8626_s13, %s6836_s18 }
  0x14   : > { %6039 = vmatprep.subr.bf16.mxu0 %v6898_v1  ;;  %v485_v12 = vunpack.c.l.bf16 %v7016_v10  ;;  %v486_v14 = vunpack.c.h.bf16 %v7016_v10  ;;  %v487_v15 = vunpack.c.l.bf16 %v7023_v13  ;;  %v488_v16 = vunpack.c.h.bf16 %v7023_v13  ;;  %v7033_v18 = vld [vmem:[%s7009_s27 + $0x18] sm:$0xff]   ;;  %v7042_v22 = vld [vmem:[%s7009_s27 + $0x20] sm:$0xff]   ;;  %v7045_v23 = vld [vmem:[%s7009_s27 + $0x28] sm:$0xff]  }
  0x15   : > { %1180 = vperm.xlu0 %6849, %v1037_v7   ;;  %1190 = vperm.xlu1 %6850, %v1039_v8   ;;  %v489_v20 = vunpack.c.l.bf16 %v7033_v18  ;;  %v490_v21 = vunpack.c.h.bf16 %v7033_v18  ;;  %v491_v24 = vunpack.c.l.bf16 %v7042_v22  ;;  %v492_v25 = vunpack.c.h.bf16 %v7042_v22  ;;  %v7054_v27 = vld [vmem:[%s7009_s27 + $0x30] sm:$0xff]   ;;  %v7062_v31 = vld [vmem:[%s7009_s27 + $0x38] sm:$0xff]   ;;  %v7073_v35 = vld [vmem:[%s7009_s27 + $0x40] sm:$0xff]  }
  0x16   : > { %527 = vst.msk [vmem:[#allocation3 + $0x10] sm:$0xff] %vm524_vm1, %v485_v12  ;;  %528 = vst.msk [vmem:[#allocation3 + $0x18] sm:$0xff] %vm524_vm1, %v486_v14  ;;  %v493_v26 = vunpack.c.l.bf16 %v7045_v23  ;;  %v494_v28 = vunpack.c.h.bf16 %v7045_v23  ;;  %v495_v29 = vunpack.c.l.bf16 %v7054_v27  ;;  %v496_v30 = vunpack.c.h.bf16 %v7054_v27  ;;  %v7087_v39 = vld [vmem:[%s7009_s27 + $0x48] sm:$0xff]   ;;  %v7096_v42 = vld [vmem:[%s7009_s27 + $0x50] sm:$0xff]  }
  0x17   : > { %6040 = vmatpush3.bf16.msra.mxu0 %v6853_v6  ;;  %529 = vst.msk [vmem:[#allocation3 + $0x20] sm:$0xff] %vm524_vm1, %v487_v15  ;;  %530 = vst.msk [vmem:[#allocation3 + $0x28] sm:$0xff] %vm524_vm1, %v488_v16  ;;  %v497_v33 = vunpack.c.l.bf16 %v7062_v31  ;;  %v498_v34 = vunpack.c.h.bf16 %v7062_v31  ;;  %v499_v37 = vunpack.c.l.bf16 %v7073_v35  ;;  %v500_v38 = vunpack.c.h.bf16 %v7073_v35  ;;  %v7117_v49 = vld [vmem:[%s7009_s27 + $0x58] sm:$0xff]   ;;  %v7126_v52 = vld [vmem:[%s7009_s27 + $0x60] sm:$0xff]  }
  0x18   : > { %6041 = vmatprep.subr.bf16.mxu0 %v6898_v1  ;;  %531 = vst.msk [vmem:[#allocation3 + $0x30] sm:$0xff] %vm524_vm1, %v489_v20  ;;  %532 = vst.msk [vmem:[#allocation3 + $0x38] sm:$0xff] %vm524_vm1, %v490_v21  ;;  %v501_v40 = vunpack.c.l.bf16 %v7087_v39  ;;  %v502_v41 = vunpack.c.h.bf16 %v7087_v39  ;;  %v503_v44 = vunpack.c.l.bf16 %v7096_v42  ;;  %v504_v45 = vunpack.c.h.bf16 %v7096_v42  ;;  %v7129_v53 = vld [vmem:[%s7009_s27 + $0x68] sm:$0xff]   ;;  %v7140_v58 = vld [vmem:[%s7009_s27 + $0x70] sm:$0xff]  }
  0x19   : > { %1195 = vperm.xlu0 %6849, %v1040_v17   ;;  %1200 = vperm.xlu1 %6850, %v1041_v19   ;;  %533 = vst.msk [vmem:[#allocation3 + $0x40] sm:$0xff] %vm524_vm1, %v491_v24  ;;  %534 = vst.msk [vmem:[#allocation3 + $0x48] sm:$0xff] %vm524_vm1, %v492_v25  ;;  %v505_v50 = vunpack.c.l.bf16 %v7117_v49  ;;  %v506_v51 = vunpack.c.h.bf16 %v7117_v49  ;;  %v507_v55 = vunpack.c.l.bf16 %v7126_v52  ;;  %v508_v56 = vunpack.c.h.bf16 %v7126_v52  ;;  %v7149_v63 = vld [vmem:[%s7009_s27 + $0x78] sm:$0xff]   ;;  %v7157_v3 = vld [vmem:[%s7009_s27 + $0x80] sm:$0xff]  }
  0x1a   : > { %535 = vst.msk [vmem:[#allocation3 + $0x50] sm:$0xff] %vm524_vm1, %v493_v26  ;;  %536 = vst.msk [vmem:[#allocation3 + $0x58] sm:$0xff] %vm524_vm1, %v494_v28  ;;  %v509_v57 = vunpack.c.l.bf16 %v7129_v53  ;;  %v510_v60 = vunpack.c.h.bf16 %v7129_v53  ;;  %v511_v61 = vunpack.c.l.bf16 %v7140_v58  ;;  %v512_v62 = vunpack.c.h.bf16 %v7140_v58  ;;  %v7160_v4 = vld [vmem:[%s7009_s27 + $0x88] sm:$0xff]   ;;  %v1015_v5 = vld [vmem:[%s8624_s11 + $0x18] sm:$0xff] }
  0x1b   : > { %6042 = vmatpush3.bf16.msra.mxu0 %v6854_v11  ;;  %537 = vst.msk [vmem:[#allocation3 + $0x60] sm:$0xff] %vm524_vm1, %v495_v29  ;;  %538 = vst.msk [vmem:[#allocation3 + $0x68] sm:$0xff] %vm524_vm1, %v496_v30  ;;  %v513_v0 = vunpack.c.l.bf16 %v7149_v63  ;;  %v514_v2 = vunpack.c.h.bf16 %v7149_v63  ;;  %v515_v6 = vunpack.c.l.bf16 %v7157_v3  ;;  %v516_v7 = vunpack.c.h.bf16 %v7157_v3  ;;  %v7178_v11 = vld [vmem:[%s7009_s27 + $0x90] sm:$0xff]   ;;  %v1017_v15 = vld [vmem:[%s8624_s11 + $0x28] sm:$0xff] }
  0x1c   : > { %539 = vst.msk [vmem:[#allocation3 + $0x70] sm:$0xff] %vm524_vm1, %v497_v33  ;;  %540 = vst.msk [vmem:[#allocation3 + $0x78] sm:$0xff] %vm524_vm1, %v498_v34  ;;  %v517_v8 = vunpack.c.l.bf16 %v7160_v4  ;;  %v519_v12 = vunpack.c.l.bf16 %v7178_v11  ;;  %v520_v14 = vunpack.c.h.bf16 %v7178_v11  ;;  %v7196_v16 = vld [vmem:[%s7009_s27 + $0x98] sm:$0xff]   ;;  %v1020_v20 = vld [vmem:[%s8624_s11 + $0x40] sm:$0xff] }
  0x1d   : > { %1205 = vperm.xlu0 %6849, %v1042_v32   ;;  %541 = vst.msk [vmem:[#allocation3 + $0x80] sm:$0xff] %vm524_vm1, %v499_v37  ;;  %542 = vst.msk [vmem:[#allocation3 + $0x88] sm:$0xff] %vm524_vm1, %v500_v38  ;;  %1210 = vperm.xlu1 %6850, %v1043_v36   ;;  %v521_v17 = vunpack.c.l.bf16 %v7196_v16  ;;  %v1019_v19 = vld [vmem:[%s8624_s11 + $0x38] sm:$0xff]  ;;  %v1021_v21 = vld [vmem:[%s8624_s11 + $0x48] sm:$0xff] }
  0x1e   : > { %6044 = vmatmul.mubr.msk.bf16.vlgmr.msra.gmra.mrb[0].mxu0 %vm524_vm1, %v442_v9  ;;  %543 = vst.msk [vmem:[#allocation3 + $0x90] sm:$0xff] %vm524_vm1, %v501_v40  ;;  %544 = vst.msk [vmem:[#allocation3 + $0x98] sm:$0xff] %vm524_vm1, %v502_v41  ;;  %v1016_v9 = vld [vmem:[%s8624_s11 + $0x20] sm:$0xff]  ;;  %v1022_v24 = vld [vmem:[%s8624_s11 + $0x50] sm:$0xff] }
  0x1f   : > { %6047 = vmatprep.mubr.msk.bf16.mxu0 %vm6899_vm0, %v6898_v1  ;;  %545 = vst.msk [vmem:[#allocation3 + $0xa0] sm:$0xff] %vm524_vm1, %v503_v44  ;;  %546 = vst.msk [vmem:[#allocation3 + $0xa8] sm:$0xff] %vm524_vm1, %v504_v45  ;;  %v7220_v25 = vld [vmem:[%s7009_s27 + $0xa0] sm:$0xf]  ;;  %v1023_v26 = vld [vmem:[%s8624_s11 + $0x58] sm:$0xff] }
  0x20   : > { %547 = vst.msk [vmem:[#allocation3 + $0xb0] sm:$0xff] %vm524_vm1, %v505_v50  ;;  %548 = vst.msk [vmem:[#allocation3 + $0xb8] sm:$0xff] %vm524_vm1, %v506_v51  ;;  %v1025_v28 = vld [vmem:[%s8624_s11 + $0x68] sm:$0xff]  ;;  %v1026_v29 = vld [vmem:[%s8624_s11 + $0x70] sm:$0xff] }
  0x21   : > { %1215 = vperm.xlu0 %6849, %v1044_v43   ;;  %1220 = vperm.xlu1 %6850, %v1045_v46   ;;  %549 = vst.msk [vmem:[#allocation3 + $0xc0] sm:$0xff] %vm524_vm1, %v507_v55  ;;  %550 = vst.msk [vmem:[#allocation3 + $0xc8] sm:$0xff] %vm524_vm1, %v508_v56  ;;  %v1027_v30 = vld [vmem:[%s8624_s11 + $0x78] sm:$0xff]  ;;  %v1029_v32 = vld [vmem:[%s8624_s11 + $0x88] sm:$0xff] }
  0x22   : > { %551 = vst.msk [vmem:[#allocation3 + $0xd0] sm:$0xff] %vm524_vm1, %v509_v57  ;;  %552 = vst.msk [vmem:[#allocation3 + $0xd8] sm:$0xff] %vm524_vm1, %v510_v60  ;;  %v1030_v33 = vld [vmem:[%s8624_s11 + $0x90] sm:$0xff]  ;;  %v1031_v34 = vld [vmem:[%s8624_s11 + $0x98] sm:$0xff] }
  0x23   : > { %553 = vst.msk [vmem:[#allocation3 + $0xe0] sm:$0xff] %vm524_vm1, %v511_v61  ;;  %554 = vst.msk [vmem:[#allocation3 + $0xe8] sm:$0xff] %vm524_vm1, %v512_v62  ;;  %v1033_v36 = vld [vmem:[%s8624_s11 + $0xa8] sm:$0xff]  ;;  %v1034_v37 = vld [vmem:[%s8624_s11 + $0xb0] sm:$0xff] }
  0x24   : > { %555 = vst.msk [vmem:[#allocation3 + $0xf0] sm:$0xff] %vm524_vm1, %v513_v0  ;;  %556 = vst.msk [vmem:[#allocation3 + $0xf8] sm:$0xff] %vm524_vm1, %v514_v2  ;;  %v1035_v38 = vld [vmem:[%s8624_s11 + $0xb8] sm:$0xff]  ;;  %v1050_v40 = vld [vmem:[%s8624_s11 + $0x130] sm:$0xff] }
  0x25   : > { %1225 = vperm.xlu0 %6849, %v1046_v47   ;;  %1230 = vperm.xlu1 %6850, %v1047_v48   ;;  %557 = vst.msk [vmem:[#allocation3 + $0x100] sm:$0xff] %vm524_vm1, %v515_v6  ;;  %558 = vst.msk [vmem:[#allocation3 + $0x108] sm:$0xff] %vm524_vm1, %v516_v7  ;;  %v1012_v41 = vld [vmem:[%s8624_s11] sm:$0xff]  ;;  %v1013_v43 = vld [vmem:[%s8624_s11 + $0x8] sm:$0xff] }
  0x26   : > { %6048 = vmatmul.mubr.msk.bf16.gmra.mrb[4].mxu0 %vm524_vm1, %v7016_v10  ;;  %v518_v10 = vunpack.c.h.bf16 %v7160_v4  ;;  %559 = vst.msk [vmem:[#allocation3 + $0x110] sm:$0xff] %vm524_vm1, %v517_v8  ;;  %561 = vst.msk [vmem:[#allocation3 + $0x120] sm:$0xff] %vm524_vm1, %v519_v12  ;;  %v1052_v44 = vld [vmem:[%s8624_s11 + $0x140] sm:$0xff]  ;;  %v4591_v46 = vld [vmem:[%s8625_s12 + $0x8] sm:$0xff] }
  0x27   : > { %6051 = vmatprep.mubr.msk.bf16.mxu0 %vm6899_vm0, %v6898_v1  ;;  %562 = vst.msk [vmem:[#allocation3 + $0x128] sm:$0xff] %vm524_vm1, %v520_v14  ;;  %563 = vst.msk [vmem:[#allocation3 + $0x130] sm:$0xff] %vm524_vm1, %v521_v17  ;;  %v4590_v45 = vld [vmem:[%s8625_s12] sm:$0xff]  ;;  %v4593_v47 = vld [vmem:[%s8625_s12 + $0x18] sm:$0xff] }
  0x28   : > { %560 = vst.msk [vmem:[#allocation3 + $0x118] sm:$0xff] %vm524_vm1, %v518_v10  ;;  %v4594_v48 = vld [vmem:[%s8625_s12 + $0x20] sm:$0xff]  ;;  %v4595_v50 = vld [vmem:[%s8625_s12 + $0x28] sm:$0xff]  ;;  %v4597_v51 = vld [vmem:[%s8625_s12 + $0x38] sm:$0xff] }
  0x29   : > { %1235 = vperm.xlu0 %6849, %v1048_v54   ;;  %1065 = vperm.xlu1 %6850, %v1014_v59   ;;  %v4598_v54 = vld [vmem:[%s8625_s12 + $0x40] sm:$0xff]  ;;  %v4599_v55 = vld [vmem:[%s8625_s12 + $0x48] sm:$0xff]  ;;  %v4601_v56 = vld [vmem:[%s8625_s12 + $0x58] sm:$0xff] }
  0x2a   : > { %v4602_v57 = vld [vmem:[%s8625_s12 + $0x60] sm:$0xff]  ;;  %v4603_v59 = vld [vmem:[%s8625_s12 + $0x68] sm:$0xff]  ;;  %v4605_v60 = vld [vmem:[%s8625_s12 + $0x78] sm:$0xff] }
  0x2b   : > { %v4606_v61 = vld [vmem:[%s8625_s12 + $0x80] sm:$0xff]  ;;  %v4607_v62 = vld [vmem:[%s8625_s12 + $0x88] sm:$0xff]  ;;  %v4609_v0 = vld [vmem:[%s8625_s12 + $0x98] sm:$0xff] }
  0x2c   : > { %v4610_v2 = vld [vmem:[%s8625_s12 + $0xa0] sm:$0xff]  ;;  %v4612_v6 = vld [vmem:[%s8625_s12 + $0xb0] sm:$0xff]  ;;  %v4613_v7 = vld [vmem:[%s8625_s12 + $0xb8] sm:$0xff] }
  0x2d   : > { %1070 = vperm.xlu0 %6849, %v1015_v5   ;;  %1075 = vperm.xlu1 %6850, %v1016_v9   ;;  %v4611_v5 = vld [vmem:[%s8625_s12 + $0xa8] sm:$0xff]  ;;  %v4614_v8 = vld [vmem:[%s8625_s12 + $0xc0] sm:$0xff]  ;;  %v4616_v12 = vld [vmem:[%s8625_s12 + $0xd0] sm:$0xff] }
  0x2e   : > { %6052 = vmatmul.mubr.msk.bf16.gmra.mrb[8].mxu0 %vm524_vm1, %v7023_v13  ;;  %v1018_v13 = vld [vmem:[%s8624_s11 + $0x30] sm:$0xff]  ;;  %v4618_v17 = vld [vmem:[%s8625_s12 + $0xe0] sm:$0xff] }
  0x2f   : > { %6055 = vmatprep.mubr.msk.bf16.mxu0 %vm6899_vm0, %v6898_v1 }
  0x31   : > { %1080 = vperm.xlu0 %6849, %v1017_v15   ;;  %1085 = vperm.xlu1 %6850, %v1018_v13   ;;  %v4617_v13 = vld [vmem:[%s8625_s12 + $0xd8] sm:$0xff] }
  0x35   : > { %1090 = vperm.xlu0 %6849, %v1019_v19   ;;  %1095 = vperm.xlu1 %6850, %v1020_v20   ;;  %v4619_v20 = vld [vmem:[%s8625_s12 + $0xe8] sm:$0xff] }
  0x36   : > { %6056 = vmatmul.mubr.msk.bf16.gmra.mrb[12].mxu0 %vm524_vm1, %v7033_v18  ;;  %v1024_v18 = vld [vmem:[%s8624_s11 + $0x60] sm:$0xff] }
  0x37   : > { %6059 = vmatprep.mubr.msk.bf16.mxu0 %vm6899_vm0, %v6898_v1 }
  0x39   : > { %1100 = vperm.xlu0 %6849, %v1021_v21   ;;  %1105 = vperm.xlu1 %6850, %v1022_v24   ;;  %v4620_v21 = vld [vmem:[%s8625_s12 + $0xf0] sm:$0xff] }
  0x3d   : > { %1110 = vperm.xlu0 %6849, %v1023_v26   ;;  %1115 = vperm.xlu1 %6850, %v1024_v18   ;;  %v4621_v18 = vld [vmem:[%s8625_s12 + $0xf8] sm:$0xff] }
  0x3e   : > { %6060 = vmatmul.mubr.msk.bf16.gmra.mrb[16].mxu0 %vm524_vm1, %v7042_v22  ;;  %v1028_v22 = vld [vmem:[%s8624_s11 + $0x80] sm:$0xff] }
  0x3f   : > { %6063 = vmatprep.mubr.msk.bf16.mxu0 %vm6899_vm0, %v6898_v1 }
  0x41   : > { %1120 = vperm.xlu0 %6849, %v1025_v28   ;;  %1125 = vperm.xlu1 %6850, %v1026_v29   ;;  %v4622_v28 = vld [vmem:[%s8625_s12 + $0x100] sm:$0xff] }
  0x45   : > { %1130 = vperm.xlu0 %6849, %v1027_v30   ;;  %1135 = vperm.xlu1 %6850, %v1028_v22   ;;  %v4623_v30 = vld [vmem:[%s8625_s12 + $0x108] sm:$0xff]  ;;  %v4624_v22 = vld [vmem:[%s8625_s12 + $0x110] sm:$0xff] }
  0x46   : > { %6064 = vmatmul.mubr.msk.bf16.gmra.mrb[20].mxu0 %vm524_vm1, %v7045_v23  ;;  %v1032_v23 = vld [vmem:[%s8624_s11 + $0xa0] sm:$0xff] }
  0x47   : > { %6067 = vmatprep.mubr.msk.bf16.mxu0 %vm6899_vm0, %v6898_v1 }
  0x49   : > { %1140 = vperm.xlu0 %6849, %v1029_v32   ;;  %1145 = vperm.xlu1 %6850, %v1030_v33  }
  0x4d   : > { %1150 = vperm.xlu0 %6849, %v1031_v34   ;;  %1155 = vperm.xlu1 %6850, %v1032_v23   ;;  %v4625_v34 = vld [vmem:[%s8625_s12 + $0x118] sm:$0xff] }
  0x4e   : > { %6068 = vmatmul.mubr.msk.bf16.gmra.mrb[24].mxu0 %vm524_vm1, %v7054_v27  ;;  %v1049_v27 = vld [vmem:[%s8624_s11 + $0x128] sm:$0xff] }
  0x4f   : > { %6071 = vmatprep.mubr.msk.bf16.mxu0 %vm6899_vm0, %v6898_v1 }
  0x51   : > { %1160 = vperm.xlu0 %6849, %v1033_v36   ;;  %1165 = vperm.xlu1 %6850, %v1034_v37  }
  0x55   : > { %1170 = vperm.xlu0 %6849, %v1035_v38   ;;  %1240 = vperm.xlu1 %6850, %v1049_v27  }
  0x56   : > { %6072 = vmatmul.mubr.msk.bf16.gmra.mrb[28].mxu0 %vm524_vm1, %v7062_v31  ;;  %v1051_v31 = vld [vmem:[%s8624_s11 + $0x138] sm:$0xff] }
  0x57   : > { %6075 = vmatprep.mubr.msk.bf16.mxu0 %vm6899_vm0, %v6898_v1 }
  0x59   : > { %1245 = vperm.xlu0 %6849, %v1050_v40   ;;  %1055 = vperm.xlu1 %6850, %v1012_v41  }
  0x5d   : > { %1060 = vperm.xlu0 %6849, %v1013_v43   ;;  %1250 = vperm.xlu1 %6850, %v1051_v31  }
  0x5e   : > { %6076 = vmatmul.mubr.msk.bf16.gmra.mrb[32].mxu0 %vm524_vm1, %v7073_v35  ;;  %v4592_v35 = vld [vmem:[%s8625_s12 + $0x10] sm:$0xff] }
  0x5f   : > { %6079 = vmatprep.mubr.msk.bf16.mxu0 %vm6899_vm0, %v6898_v1 }
  0x61   : > { %1255 = vperm.xlu0 %6849, %v1052_v44   ;;  %4628 = vperm.xlu1 %6850, %v4590_v45  }
  0x65   : > { %4633 = vperm.xlu0 %6849, %v4591_v46   ;;  %4638 = vperm.xlu1 %6850, %v4592_v35  }
  0x66   : > { %6080 = vmatmul.mubr.msk.bf16.gmra.mrb[36].mxu0 %vm524_vm1, %v7087_v39  ;;  %v4596_v39 = vld [vmem:[%s8625_s12 + $0x30] sm:$0xff] }
  0x67   : > { %6083 = vmatprep.mubr.msk.bf16.mxu0 %vm6899_vm0, %v6898_v1 }
  0x69   : > { %4643 = vperm.xlu0 %6849, %v4593_v47   ;;  %4648 = vperm.xlu1 %6850, %v4594_v48  }
  0x6d   : > { %4653 = vperm.xlu0 %6849, %v4595_v50   ;;  %4658 = vperm.xlu1 %6850, %v4596_v39  }
  0x6e   : > { %6084 = vmatmul.mubr.msk.bf16.gmra.mrb[40].mxu0 %vm524_vm1, %v7096_v42  ;;  %v4600_v42 = vld [vmem:[%s8625_s12 + $0x50] sm:$0xff] }
  0x6f   : > { %6087 = vmatprep.mubr.msk.bf16.mxu0 %vm6899_vm0, %v6898_v1 }
  0x71   : > { %4663 = vperm.xlu0 %6849, %v4597_v51   ;;  %4668 = vperm.xlu1 %6850, %v4598_v54  }
  0x75   : > { %4673 = vperm.xlu0 %6849, %v4599_v55   ;;  %4678 = vperm.xlu1 %6850, %v4600_v42   ;;  %v7526_v42 = vld [vmem:[%s8616_s3 + $0x10] sm:$0xff]  }
  0x76   : > { %6088 = vmatmul.mubr.msk.bf16.gmra.mrb[44].mxu0 %vm524_vm1, %v7117_v49  ;;  %v4604_v49 = vld [vmem:[%s8625_s12 + $0x70] sm:$0xff]  ;;  %6545 = vmatprep.subr.bf16.mxu1 %v7526_v42 }
  0x77   : > { %6091 = vmatprep.mubr.msk.bf16.mxu0 %vm6899_vm0, %v6898_v1  ;;  %6546 = vmatpush3.bf16.msra.mxu1 %v7526_v42 }
  0x79   : > { %4683 = vperm.xlu0 %6849, %v4601_v56   ;;  %4688 = vperm.xlu1 %6850, %v4602_v57   ;;  %v7534_v57 = vld [vmem:[%s8615_s2] ss:$0 sm:$0xff] }
  0x7d   : > { %4693 = vperm.xlu0 %6849, %v4603_v59   ;;  %4698 = vperm.xlu1 %6850, %v4604_v49  }
  0x7e   : > { %6092 = vmatmul.mubr.msk.bf16.gmra.mrb[48].mxu0 %vm524_vm1, %v7126_v52  ;;  %v4608_v52 = vld [vmem:[%s8625_s12 + $0x90] sm:$0xff] }
  0x7f   : > { %6095 = vmatprep.mubr.msk.bf16.mxu0 %vm6899_vm0, %v6898_v1 }
  0x81   : > { %4703 = vperm.xlu0 %6849, %v4605_v60   ;;  %4708 = vperm.xlu1 %6850, %v4606_v61  }
  0x85   : > { %4713 = vperm.xlu0 %6849, %v4607_v62   ;;  %4718 = vperm.xlu1 %6850, %v4608_v52  }
  0x86   : > { %6096 = vmatmul.mubr.msk.bf16.gmra.mrb[52].mxu0 %vm524_vm1, %v7129_v53  ;;  %v6855_v53 = vld [vmem:[%s8616_s3 + $0x8] sm:$0xff]  }
  0x87   : > { %6099 = vmatprep.mubr.msk.bf16.mxu0 %vm6899_vm0, %v6898_v1  ;;  %6127 = vmatprep.subr.bf16.mxu0 %v6855_v53 }
  0x88   : > { %6128 = vmatpush3.bf16.msra.mxu0 %v6855_v53 }
  0x89   : > { %4723 = vperm.xlu0 %6849, %v4609_v0   ;;  %4728 = vperm.xlu1 %6850, %v4610_v2  }
  0x8d   : > { %4733 = vperm.xlu0 %6849, %v4611_v5   ;;  %4738 = vperm.xlu1 %6850, %v4612_v6  }
  0x8e   : > { %6100 = vmatmul.mubr.msk.bf16.gmra.mrb[56].mxu0 %vm524_vm1, %v7140_v58  ;;  %v4615_v58 = vld [vmem:[%s8625_s12 + $0xc8] sm:$0xff] }
  0x8f   : > { %6103 = vmatprep.mubr.msk.bf16.mxu0 %vm6899_vm0, %v6898_v1 }
  0x90   : > { %v7401_v9 = vpop.permute.xlu0 %1175  ;;  %v7403_v10 = vpop.permute.xlu1 %1185 }
  0x91   : > { %4743 = vperm.xlu0 %6849, %v4613_v7   ;;  %4748 = vperm.xlu1 %6850, %v4614_v8  }
  0x94   : > { %v7413_v14 = vpop.permute.xlu0 %1180  ;;  %v7417_v15 = vpop.permute.xlu1 %1190 }
  0x95   : > { %4753 = vperm.xlu0 %6849, %v4615_v58   ;;  %4758 = vperm.xlu1 %6850, %v4616_v12  }
  0x96   : > { %6104 = vmatmul.mubr.msk.bf16.gmra.mrb[60].mxu0 %vm524_vm1, %v7149_v63 }
  0x97   : > { %6107 = vmatprep.mubr.msk.bf16.mxu0 %vm6899_vm0, %v6898_v1 }
  0x98   : > { %v7425_v19 = vpop.permute.xlu0 %1195  ;;  %v7427_v63 = vpop.permute.xlu1 %1200 }
  0x99   : > { %4763 = vperm.xlu0 %6849, %v4617_v13   ;;  %4768 = vperm.xlu1 %6850, %v4618_v17  }
  0x9c   : > { %v7437_v24 = vpop.permute.xlu0 %1205  ;;  %v7441_v26 = vpop.permute.xlu1 %1210 }
  0x9d   : > { %4773 = vperm.xlu0 %6849, %v4619_v20   ;;  %4778 = vperm.xlu1 %6850, %v4620_v21  }
  0x9e   : > { %6108 = vmatmul.mubr.msk.bf16.gmra.mrb[64].mxu0 %vm524_vm1, %v7157_v3 }
  0x9f   : > { %6111 = vmatprep.mubr.msk.bf16.mxu0 %vm6899_vm0, %v6898_v1 }
  0xa0   : > { %v7449_v29 = vpop.permute.xlu0 %1215  ;;  %v7451_v3 = vpop.permute.xlu1 %1220 }
  0xa1   : > { %4783 = vperm.xlu0 %6849, %v4621_v18   ;;  %4788 = vperm.xlu1 %6850, %v4622_v28  }
  0xa4   : > { %v7461_v32 = vpop.permute.xlu0 %1225  ;;  %v7465_v33 = vpop.permute.xlu1 %1230 }
  0xa5   : > { %4793 = vperm.xlu0 %6849, %v4623_v30   ;;  %4798 = vperm.xlu1 %6850, %v4624_v22  }
  0xa6   : > { %6112 = vmatmul.mubr.msk.bf16.gmra.mrb[68].mxu0 %vm524_vm1, %v7160_v4 }
  0xa7   : > { %6115 = vmatprep.mubr.msk.bf16.mxu0 %vm6899_vm0, %v6898_v1 }
  0xa8   : > { %v7470_v23 = vpop.permute.xlu0 %1235  ;;  %v1066_v36 = vpop.permute.xlu1 %1065 }
  0xa9   : > { %4803 = vperm.xlu0 %6849, %v4625_v34  }
  0xac   : > { %v1071_v4 = vpop.permute.xlu0 %1070  ;;  %v7476_v37 = vpop.permute.xlu1 %1075 }
  0xae   : > { %6116 = vmatmul.mubr.msk.bf16.gmra.mrb[72].mxu0 %vm524_vm1, %v7178_v11  ;;  %v5497_v11 = vcombine.low %v7220_v25, %v7220_v25 }
  0xaf   : > { %6119 = vmatprep.mubr.msk.bf16.mxu0 %vm6899_vm0, %v6898_v1 }
  0xb0   : > { %v7478_v38 = vpop.permute.xlu0 %1080  ;;  %v7484_v27 = vpop.permute.xlu1 %1085 }
  0xb4   : > { %v7486_v40 = vpop.permute.xlu0 %1090  ;;  %v7490_v41 = vpop.permute.xlu1 %1095 }
  0xb6   : > { %6120 = vmatmul.mubr.msk.bf16.gmra.mrb[76].mxu0 %vm524_vm1, %v7196_v16 }
  0xb7   : > { %6123 = vmatprep.mubr.msk.bf16.mxu0 %vm6899_vm0, %v6898_v1 }
  0xb8   : > { %v7493_v43 = vpop.permute.xlu0 %1100  ;;  %v7495_v31 = vpop.permute.xlu1 %1105 }
  0xbc   : > { %v7497_v44 = vpop.permute.xlu0 %1110  ;;  %v7499_v16 = vpop.permute.xlu1 %1115 }
  0xbe   : > { %6124 = vmatmul.mubr.msk.bf16.gmra.mrb[80].mxu0 %vm524_vm1, %v5497_v11 }
  0xc0   : > { %v7501_v45 = vpop.permute.xlu0 %1120  ;;  %v7503_v46 = vpop.permute.xlu1 %1125 }
  0xc4   : > { %v7505_v35 = vpop.permute.xlu0 %1130  ;;  %v7507_v47 = vpop.permute.xlu1 %1135 }
  0xc8   : > { %v7509_v25 = vpop.permute.xlu0 %1140  ;;  %v7511_v48 = vpop.permute.xlu1 %1145 }
  0xcc   : > { %v7513_v50 = vpop.permute.xlu0 %1150  ;;  %v7515_v39 = vpop.permute.xlu1 %1155 }
  0xd0   : > { %v7517_v51 = vpop.permute.xlu0 %1160  ;;  %v7519_v54 = vpop.permute.xlu1 %1165 }
  0xd4   : > { %v7521_v55 = vpop.permute.xlu0 %1170  ;;  %v7528_v56 = vpop.permute.xlu1 %1240 }
  0xd8   : > { %v7536_v59 = vpop.permute.xlu0 %1245  ;;  %v1056_v52 = vpop.permute.xlu1 %1055 }
  0xdc   : > { %v1061_v53 = vpop.permute.xlu0 %1060 }
  0xf1   : > { %v805_v49 = vpop.f32.mrb[0].mxu0 }
  0xf2   : > { %v806_v60 = vadd.f32 %v7534_v57, %v805_v49  ;;  %v6045_v61 = vpop.f32.mrb[1].mxu0 }
  0xf3   : > { %v808_v62 = vpop.f32.mrb[2].mxu0 }
  0xf4   : > { %v971_v0 = vmax.f32 %v806_v60, 0.0  ;;  %v809_v2 = vadd.f32 %v7534_v57, %v808_v62  ;;  %v6046_v5 = vpop.f32.mrb[3].mxu0 }
  0xf6   : > { %v972_v6 = vmax.f32 %v809_v2, 0.0  ;;  %v1258_v7 = vmul.f32 %v1056_v52, %v971_v0 }
  0xf8   : > { %1300 = vst.msk [vmem:[#allocation2] sm:$0xff] %vm1299_vm2, %v1258_v7  ;;  %v1259_v8 = vmul.f32 %v1061_v53, %v972_v6  ;;  %v7555_v6 = vld [vmem:[%s8616_s3 + $0x18] sm:$0xff]  }
  0xf9   : > { %v813_v58 = vpop.f32.mrb[4].mxu0  ;;  %6241 = vmatprep.subr.bf16.mxu1 %v7555_v6 }
  0xfa   : > { %1301 = vst.msk [vmem:[#allocation2 + $0x8] sm:$0xff] %vm1299_vm2, %v1259_v8  ;;  %v814_v12 = vadd.f32 %v7534_v57, %v813_v58  ;;  %v6049_v13 = vpop.f32.mrb[5].mxu0 }
  0xfb   : > { %v816_v17 = vpop.f32.mrb[6].mxu0 }
  0xfc   : > { %v973_v20 = vmax.f32 %v814_v12, 0.0  ;;  %v817_v21 = vadd.f32 %v7534_v57, %v816_v17  ;;  %v6050_v18 = vpop.f32.mrb[7].mxu0 }
  0xfe   : > { %v1260_v28 = vmul.f32 %v1066_v36, %v973_v20  ;;  %v974_v30 = vmax.f32 %v817_v21, 0.0 }
 0x100   : > { %1302 = vst.msk [vmem:[#allocation2 + $0x10] sm:$0xff] %vm1299_vm2, %v1260_v28  ;;  %v1261_v22 = vmul.f32 %v1071_v4, %v974_v30 }
 0x101   : > { %v821_v34 = vpop.f32.mrb[8].mxu0  ;;  %v1397_v5 = vld [vmem:[#allocation2 + $0x1] sm:$0xff] }
 0x102   : > { %1303 = vst.msk [vmem:[#allocation2 + $0x18] sm:$0xff] %vm1299_vm2, %v1261_v22  ;;  %v822_v11 = vadd.f32 %v7534_v57, %v821_v34  ;;  %v6053_v49 = vpop.f32.mrb[9].mxu0 }
 0x103   : > { %v824_v60 = vpop.f32.mrb[10].mxu0 }
 0x104   : > { %v975_v61 = vmax.f32 %v822_v11, 0.0  ;;  %v825_v62 = vadd.f32 %v7534_v57, %v824_v60  ;;  %v6054_v52 = vpop.f32.mrb[11].mxu0 }
 0x106   : > { %v1262_v0 = vmul.f32 %v7476_v37, %v975_v61  ;;  %v976_v2 = vmax.f32 %v825_v62, 0.0  ;;  %v6858_v62 = vld [vmem:[%s8616_s3] sm:$0xff]  }
 0x107   : > { %v1398_v36 = vld [vmem:[#allocation2 + $0x9] sm:$0xff]  ;;  %6165 = vmatprep.subr.bf16.mxu0 %v6858_v62 }
 0x108   : > { %1304 = vst.msk [vmem:[#allocation2 + $0x20] sm:$0xff] %vm1299_vm2, %v1262_v0  ;;  %v1263_v4 = vmul.f32 %v7478_v38, %v976_v2  ;;  %v1433_v53 = vpack.c.bf16 %v1398_v36, %v1397_v5 }
 0x109   : > { %v829_v7 = vpop.f32.mrb[12].mxu0  ;;  %v1399_v21 = vld [vmem:[#allocation2 + $0x11] sm:$0xff] }
 0x10a   : > { %1305 = vst.msk [vmem:[#allocation2 + $0x28] sm:$0xff] %vm1299_vm2, %v1263_v4  ;;  %v830_v8 = vadd.f32 %v7534_v57, %v829_v7  ;;  %v6057_v58 = vpop.f32.mrb[13].mxu0  ;;  %6129 = vmatprep.mubr.msk.bf16.mxu0 %vm1299_vm2, %v1433_v53 }
 0x10b   : > { %v832_v37 = vpop.f32.mrb[14].mxu0 }
 0x10c   : > { %v977_v12 = vmax.f32 %v830_v8, 0.0  ;;  %v833_v38 = vadd.f32 %v7534_v57, %v832_v37  ;;  %v6058_v13 = vpop.f32.mrb[15].mxu0 }
 0x10e   : > { %v1264_v17 = vmul.f32 %v7484_v27, %v977_v12  ;;  %v978_v20 = vmax.f32 %v833_v38, 0.0 }
 0x10f   : > { %v1400_v18 = vld [vmem:[#allocation2 + $0x19] sm:$0xff] }
 0x110   : > { %1306 = vst.msk [vmem:[#allocation2 + $0x30] sm:$0xff] %vm1299_vm2, %v1264_v17  ;;  %v1265_v28 = vmul.f32 %v7486_v40, %v978_v20  ;;  %v1434_v30 = vpack.c.bf16 %v1400_v18, %v1399_v21 }
 0x111   : > { %v837_v22 = vpop.f32.mrb[16].mxu0  ;;  %v1401_v0 = vld [vmem:[#allocation2 + $0x21] sm:$0xff] }
 0x112   : > { %1307 = vst.msk [vmem:[#allocation2 + $0x38] sm:$0xff] %vm1299_vm2, %v1265_v28  ;;  %v838_v34 = vadd.f32 %v7534_v57, %v837_v22  ;;  %v6061_v11 = vpop.f32.mrb[17].mxu0  ;;  %6130 = vmatmul.mubr.msk.bf16.vlgmr.msra.gmra.mrb[84].mxu0 %vm1299_vm2, %v1434_v30 }
 0x113   : > { %v840_v49 = vpop.f32.mrb[18].mxu0  ;;  %6166 = vmatpush3.bf16.msra.mxu0 %v6858_v62 }
 0x114   : > { %v979_v60 = vmax.f32 %v838_v34, 0.0  ;;  %v841_v27 = vadd.f32 %v7534_v57, %v840_v49  ;;  %v6062_v61 = vpop.f32.mrb[19].mxu0  ;;  %6203 = vmatprep.subr.bf16.mxu0 %v7526_v42 }
 0x116   : > { %v1266_v40 = vmul.f32 %v7490_v41, %v979_v60  ;;  %v980_v52 = vmax.f32 %v841_v27, 0.0 }
 0x117   : > { %v1402_v2 = vld [vmem:[#allocation2 + $0x29] sm:$0xff] }
 0x118   : > { %1308 = vst.msk [vmem:[#allocation2 + $0x40] sm:$0xff] %vm1299_vm2, %v1266_v40  ;;  %v1267_v5 = vmul.f32 %v7493_v43, %v980_v52  ;;  %v1435_v36 = vpack.c.bf16 %v1402_v2, %v1401_v0 }
 0x119   : > { %v845_v4 = vpop.f32.mrb[20].mxu0  ;;  %v1403_v43 = vld [vmem:[#allocation2 + $0x31] sm:$0xff] }
 0x11a   : > { %1309 = vst.msk [vmem:[#allocation2 + $0x48] sm:$0xff] %vm1299_vm2, %v1267_v5  ;;  %v846_v53 = vadd.f32 %v7534_v57, %v845_v4  ;;  %v6065_v7 = vpop.f32.mrb[21].mxu0  ;;  %6133 = vmatprep.mubr.msk.bf16.mxu0 %vm1299_vm2, %v1435_v36 }
 0x11b   : > { %v848_v41 = vpop.f32.mrb[22].mxu0 }
 0x11c   : > { %v981_v8 = vmax.f32 %v846_v53, 0.0  ;;  %v849_v58 = vadd.f32 %v7534_v57, %v848_v41  ;;  %v6066_v37 = vpop.f32.mrb[23].mxu0 }
 0x11e   : > { %v1268_v12 = vmul.f32 %v7495_v31, %v981_v8  ;;  %v982_v38 = vmax.f32 %v849_v58, 0.0 }
 0x11f   : > { %v1404_v13 = vld [vmem:[#allocation2 + $0x39] sm:$0xff] }
 0x120   : > { %1310 = vst.msk [vmem:[#allocation2 + $0x50] sm:$0xff] %vm1299_vm2, %v1268_v12  ;;  %v1269_v17 = vmul.f32 %v7497_v44, %v982_v38  ;;  %v1436_v20 = vpack.c.bf16 %v1404_v13, %v1403_v43 }
 0x121   : > { %v853_v21 = vpop.f32.mrb[24].mxu0  ;;  %v1405_v60 = vld [vmem:[#allocation2 + $0x41] sm:$0xff] }
 0x122   : > { %1311 = vst.msk [vmem:[#allocation2 + $0x58] sm:$0xff] %vm1299_vm2, %v1269_v17  ;;  %v854_v18 = vadd.f32 %v7534_v57, %v853_v21  ;;  %v6069_v28 = vpop.f32.mrb[25].mxu0  ;;  %6134 = vmatmul.mubr.msk.bf16.gmra.mrb[88].mxu0 %vm1299_vm2, %v1436_v20 }
 0x123   : > { %v856_v30 = vpop.f32.mrb[26].mxu0 }
 0x124   : > { %v983_v22 = vmax.f32 %v854_v18, 0.0  ;;  %v857_v31 = vadd.f32 %v7534_v57, %v856_v30  ;;  %v6070_v34 = vpop.f32.mrb[27].mxu0 }
 0x126   : > { %v1270_v11 = vmul.f32 %v7499_v16, %v983_v22  ;;  %v984_v49 = vmax.f32 %v857_v31, 0.0 }
 0x127   : > { %v1406_v27 = vld [vmem:[#allocation2 + $0x49] sm:$0xff] }
 0x128   : > { %1312 = vst.msk [vmem:[#allocation2 + $0x60] sm:$0xff] %vm1299_vm2, %v1270_v11  ;;  %v1271_v44 = vmul.f32 %v7501_v45, %v984_v49  ;;  %v1437_v61 = vpack.c.bf16 %v1406_v27, %v1405_v60 }
 0x129   : > { %v861_v62 = vpop.f32.mrb[28].mxu0  ;;  %v1407_v53 = vld [vmem:[#allocation2 + $0x51] sm:$0xff] }
 0x12a   : > { %1313 = vst.msk [vmem:[#allocation2 + $0x68] sm:$0xff] %vm1299_vm2, %v1271_v44  ;;  %v862_v40 = vadd.f32 %v7534_v57, %v861_v62  ;;  %v6073_v52 = vpop.f32.mrb[29].mxu0  ;;  %6137 = vmatprep.mubr.msk.bf16.mxu0 %vm1299_vm2, %v1437_v61 }
 0x12b   : > { %v864_v0 = vpop.f32.mrb[30].mxu0 }
 0x12c   : > { %v985_v2 = vmax.f32 %v862_v40, 0.0  ;;  %v865_v16 = vadd.f32 %v7534_v57, %v864_v0  ;;  %v6074_v5 = vpop.f32.mrb[31].mxu0 }
 0x12e   : > { %v1272_v36 = vmul.f32 %v7503_v46, %v985_v2  ;;  %v986_v4 = vmax.f32 %v865_v16, 0.0 }
 0x12f   : > { %v1408_v7 = vld [vmem:[#allocation2 + $0x59] sm:$0xff] }
 0x130   : > { %1314 = vst.msk [vmem:[#allocation2 + $0x70] sm:$0xff] %vm1299_vm2, %v1272_v36  ;;  %v1273_v45 = vmul.f32 %v7505_v35, %v986_v4  ;;  %v1438_v41 = vpack.c.bf16 %v1408_v7, %v1407_v53 }
 0x131   : > { %v869_v8 = vpop.f32.mrb[32].mxu0  ;;  %v1409_v20 = vld [vmem:[#allocation2 + $0x61] sm:$0xff] }
 0x132   : > { %1315 = vst.msk [vmem:[#allocation2 + $0x78] sm:$0xff] %vm1299_vm2, %v1273_v45  ;;  %v870_v58 = vadd.f32 %v7534_v57, %v869_v8  ;;  %v6077_v37 = vpop.f32.mrb[33].mxu0  ;;  %6138 = vmatmul.mubr.msk.bf16.gmra.mrb[92].mxu0 %vm1299_vm2, %v1438_v41 }
 0x133   : > { %v872_v12 = vpop.f32.mrb[34].mxu0 }
 0x134   : > { %v987_v38 = vmax.f32 %v870_v58, 0.0  ;;  %v873_v46 = vadd.f32 %v7534_v57, %v872_v12  ;;  %v6078_v43 = vpop.f32.mrb[35].mxu0 }
 0x136   : > { %v1274_v13 = vmul.f32 %v7507_v47, %v987_v38  ;;  %v988_v17 = vmax.f32 %v873_v46, 0.0 }
 0x137   : > { %v1410_v21 = vld [vmem:[#allocation2 + $0x69] sm:$0xff] }
 0x138   : > { %1316 = vst.msk [vmem:[#allocation2 + $0x80] sm:$0xff] %vm1299_vm2, %v1274_v13  ;;  %v1275_v35 = vmul.f32 %v7509_v25, %v988_v17  ;;  %v1439_v18 = vpack.c.bf16 %v1410_v21, %v1409_v20 }
 0x139   : > { %v877_v28 = vpop.f32.mrb[36].mxu0  ;;  %v1411_v27 = vld [vmem:[#allocation2 + $0x71] sm:$0xff] }
 0x13a   : > { %1317 = vst.msk [vmem:[#allocation2 + $0x88] sm:$0xff] %vm1299_vm2, %v1275_v35  ;;  %v878_v30 = vadd.f32 %v7534_v57, %v877_v28  ;;  %v6081_v22 = vpop.f32.mrb[37].mxu0  ;;  %6141 = vmatprep.mubr.msk.bf16.mxu0 %vm1299_vm2, %v1439_v18 }
 0x13b   : > { %v880_v31 = vpop.f32.mrb[38].mxu0 }
 0x13c   : > { %v989_v34 = vmax.f32 %v878_v30, 0.0  ;;  %v881_v47 = vadd.f32 %v7534_v57, %v880_v31  ;;  %v6082_v11 = vpop.f32.mrb[39].mxu0 }
 0x13e   : > { %v1276_v49 = vmul.f32 %v7511_v48, %v989_v34  ;;  %v990_v60 = vmax.f32 %v881_v47, 0.0 }
 0x13f   : > { %v1412_v44 = vld [vmem:[#allocation2 + $0x79] sm:$0xff] }
 0x140   : > { %1318 = vst.msk [vmem:[#allocation2 + $0x90] sm:$0xff] %vm1299_vm2, %v1276_v49  ;;  %v1277_v25 = vmul.f32 %v7513_v50, %v990_v60  ;;  %v1440_v61 = vpack.c.bf16 %v1412_v44, %v1411_v27 }
 0x141   : > { %v885_v62 = vpop.f32.mrb[40].mxu0  ;;  %v1413_v4 = vld [vmem:[#allocation2 + $0x81] sm:$0xff] }
 0x142   : > { %1319 = vst.msk [vmem:[#allocation2 + $0x98] sm:$0xff] %vm1299_vm2, %v1277_v25  ;;  %v886_v40 = vadd.f32 %v7534_v57, %v885_v62  ;;  %v6085_v52 = vpop.f32.mrb[41].mxu0  ;;  %6142 = vmatmul.mubr.msk.bf16.gmra.mrb[96].mxu0 %vm1299_vm2, %v1440_v61 }
 0x143   : > { %v888_v0 = vpop.f32.mrb[42].mxu0 }
 0x144   : > { %v991_v2 = vmax.f32 %v886_v40, 0.0  ;;  %v889_v48 = vadd.f32 %v7534_v57, %v888_v0  ;;  %v6086_v16 = vpop.f32.mrb[43].mxu0 }
 0x146   : > { %v1278_v5 = vmul.f32 %v7515_v39, %v991_v2  ;;  %v992_v36 = vmax.f32 %v889_v48, 0.0 }
 0x147   : > { %v1414_v53 = vld [vmem:[#allocation2 + $0x89] sm:$0xff] }
 0x148   : > { %1320 = vst.msk [vmem:[#allocation2 + $0xa0] sm:$0xff] %vm1299_vm2, %v1278_v5  ;;  %v1279_v50 = vmul.f32 %v7517_v51, %v992_v36  ;;  %v1441_v7 = vpack.c.bf16 %v1414_v53, %v1413_v4 }
 0x149   : > { %v893_v45 = vpop.f32.mrb[44].mxu0  ;;  %v1415_v43 = vld [vmem:[#allocation2 + $0x91] sm:$0xff] }
 0x14a   : > { %1321 = vst.msk [vmem:[#allocation2 + $0xa8] sm:$0xff] %vm1299_vm2, %v1279_v50  ;;  %v894_v41 = vadd.f32 %v7534_v57, %v893_v45  ;;  %v6089_v8 = vpop.f32.mrb[45].mxu0  ;;  %6145 = vmatprep.mubr.msk.bf16.mxu0 %vm1299_vm2, %v1441_v7 }
 0x14b   : > { %v896_v58 = vpop.f32.mrb[46].mxu0 }
 0x14c   : > { %v993_v37 = vmax.f32 %v894_v41, 0.0  ;;  %v897_v39 = vadd.f32 %v7534_v57, %v896_v58  ;;  %v6090_v12 = vpop.f32.mrb[47].mxu0 }
 0x14e   : > { %v1280_v38 = vmul.f32 %v7519_v54, %v993_v37  ;;  %v994_v46 = vmax.f32 %v897_v39, 0.0 }
 0x14f   : > { %v1416_v13 = vld [vmem:[#allocation2 + $0x99] sm:$0xff] }
 0x150   : > { %1322 = vst.msk [vmem:[#allocation2 + $0xb0] sm:$0xff] %vm1299_vm2, %v1280_v38  ;;  %v1281_v51 = vmul.f32 %v7521_v55, %v994_v46  ;;  %v1442_v17 = vpack.c.bf16 %v1416_v13, %v1415_v43 }
 0x151   : > { %v901_v20 = vpop.f32.mrb[48].mxu0  ;;  %v1417_v34 = vld [vmem:[#allocation2 + $0xa1] sm:$0xff] }
 0x152   : > { %1323 = vst.msk [vmem:[#allocation2 + $0xb8] sm:$0xff] %vm1299_vm2, %v1281_v51  ;;  %v902_v21 = vadd.f32 %v7534_v57, %v901_v20  ;;  %v6093_v35 = vpop.f32.mrb[49].mxu0  ;;  %6146 = vmatmul.mubr.msk.bf16.gmra.mrb[100].mxu0 %vm1299_vm2, %v1442_v17 }
 0x153   : > { %v904_v18 = vpop.f32.mrb[50].mxu0 }
 0x154   : > { %v995_v28 = vmax.f32 %v902_v21, 0.0  ;;  %v905_v54 = vadd.f32 %v7534_v57, %v904_v18  ;;  %v6094_v30 = vpop.f32.mrb[51].mxu0 }
 0x156   : > { %v1282_v22 = vmul.f32 %v7401_v9, %v995_v28  ;;  %v996_v31 = vmax.f32 %v905_v54, 0.0 }
 0x157   : > { %v1418_v47 = vld [vmem:[#allocation2 + $0xa9] sm:$0xff] }
 0x158   : > { %1324 = vst.msk [vmem:[#allocation2 + $0xc0] sm:$0xff] %vm1299_vm2, %v1282_v22  ;;  %v1283_v55 = vmul.f32 %v7413_v14, %v996_v31  ;;  %v1443_v11 = vpack.c.bf16 %v1418_v47, %v1417_v34  ;;  %v7662_v22 = vld [vmem:[%s8616_s3 + $0x20] sm:$0xff]  }
 0x159   : > { %v909_v49 = vpop.f32.mrb[52].mxu0  ;;  %v1419_v52 = vld [vmem:[#allocation2 + $0xb1] sm:$0xff] }
 0x15a   : > { %1325 = vst.msk [vmem:[#allocation2 + $0xc8] sm:$0xff] %vm1299_vm2, %v1283_v55  ;;  %v910_v60 = vadd.f32 %v7534_v57, %v909_v49  ;;  %v6097_v27 = vpop.f32.mrb[53].mxu0  ;;  %6149 = vmatprep.mubr.msk.bf16.mxu0 %vm1299_vm2, %v1443_v11 }
 0x15b   : > { %v912_v44 = vpop.f32.mrb[54].mxu0 }
 0x15c   : > { %v997_v25 = vmax.f32 %v910_v60, 0.0  ;;  %v913_v9 = vadd.f32 %v7534_v57, %v912_v44  ;;  %v6098_v61 = vpop.f32.mrb[55].mxu0 }
 0x15e   : > { %v1284_v62 = vmul.f32 %v7403_v10, %v997_v25  ;;  %v998_v40 = vmax.f32 %v913_v9, 0.0 }
 0x15f   : > { %v1420_v0 = vld [vmem:[#allocation2 + $0xb9] sm:$0xff] }
 0x160   : > { %1326 = vst.msk [vmem:[#allocation2 + $0xd0] sm:$0xff] %vm1299_vm2, %v1284_v62  ;;  %v1285_v14 = vmul.f32 %v7417_v15, %v998_v40  ;;  %v1444_v2 = vpack.c.bf16 %v1420_v0, %v1419_v52 }
 0x161   : > { %v917_v48 = vpop.f32.mrb[56].mxu0  ;;  %v1421_v45 = vld [vmem:[#allocation2 + $0xc1] sm:$0xff] }
 0x162   : > { %1327 = vst.msk [vmem:[#allocation2 + $0xd8] sm:$0xff] %vm1299_vm2, %v1285_v14  ;;  %v918_v16 = vadd.f32 %v7534_v57, %v917_v48  ;;  %v6101_v5 = vpop.f32.mrb[57].mxu0  ;;  %6150 = vmatmul.mubr.msk.bf16.gmra.mrb[104].mxu0 %vm1299_vm2, %v1444_v2  ;;  %v1952_v15 = vld [vmem:[#allocation2 + $0xc2] sm:$0xff] }
 0x163   : > { %v920_v36 = vpop.f32.mrb[58].mxu0 }
 0x164   : > { %v999_v4 = vmax.f32 %v918_v16, 0.0  ;;  %v921_v10 = vadd.f32 %v7534_v57, %v920_v36  ;;  %v6102_v53 = vpop.f32.mrb[59].mxu0 }
 0x166   : > { %v1286_v50 = vmul.f32 %v7425_v19, %v999_v4  ;;  %v1000_v7 = vmax.f32 %v921_v10, 0.0 }
 0x167   : > { %v1422_v41 = vld [vmem:[#allocation2 + $0xc9] sm:$0xff] }
 0x168   : > { %v1953_v8 = vld [vmem:[#allocation2 + $0xca] sm:$0xff]  ;;  %1328 = vst.msk [vmem:[#allocation2 + $0xe0] sm:$0xff] %vm1299_vm2, %v1286_v50  ;;  %v1287_v58 = vmul.f32 %v7427_v63, %v1000_v7  ;;  %v1445_v37 = vpack.c.bf16 %v1422_v41, %v1421_v45 }
 0x169   : > { %v7646_v39 = vpack.c.bf16 %v1953_v8, %v1952_v15  ;;  %v925_v12 = vpop.f32.mrb[60].mxu0  ;;  %v1423_v20 = vld [vmem:[#allocation2 + $0xd1] sm:$0xff] }
 0x16a   : > { %1329 = vst.msk [vmem:[#allocation2 + $0xe8] sm:$0xff] %vm1299_vm2, %v1287_v58  ;;  %v926_v38 = vadd.f32 %v7534_v57, %v925_v12  ;;  %v6105_v46 = vpop.f32.mrb[61].mxu0  ;;  %6153 = vmatprep.mubr.msk.bf16.mxu0 %vm1299_vm2, %v1445_v37  ;;  %v1954_v35 = vld [vmem:[#allocation2 + $0xd2] sm:$0xff] }
 0x16b   : > { %6229 = vmatprep.mubr.msk.bf16.mxu1 %vm1299_vm2, %v7646_v39  ;;  %v928_v19 = vpop.f32.mrb[62].mxu0 }
 0x16c   : > { %v1001_v43 = vmax.f32 %v926_v38, 0.0  ;;  %v929_v13 = vadd.f32 %v7534_v57, %v928_v19  ;;  %v6106_v51 = vpop.f32.mrb[63].mxu0 }
 0x16e   : > { %v1288_v63 = vmul.f32 %v7437_v24, %v1001_v43  ;;  %v1002_v17 = vmax.f32 %v929_v13, 0.0 }
 0x16f   : > { %v1424_v21 = vld [vmem:[#allocation2 + $0xd9] sm:$0xff] }
 0x170   : > { %v1955_v18 = vld [vmem:[#allocation2 + $0xda] sm:$0xff]  ;;  %1330 = vst.msk [vmem:[#allocation2 + $0xf0] sm:$0xff] %vm1299_vm2, %v1288_v63  ;;  %v1289_v28 = vmul.f32 %v7441_v26, %v1002_v17  ;;  %v1446_v54 = vpack.c.bf16 %v1424_v21, %v1423_v20 }
 0x171   : > { %v7657_v30 = vpack.c.bf16 %v1955_v18, %v1954_v35  ;;  %v933_v31 = vpop.f32.mrb[64].mxu0  ;;  %v1425_v27 = vld [vmem:[#allocation2 + $0xe1] sm:$0xff] }
 0x172   : > { %1331 = vst.msk [vmem:[#allocation2 + $0xf8] sm:$0xff] %vm1299_vm2, %v1289_v28  ;;  %v934_v24 = vadd.f32 %v7534_v57, %v933_v31  ;;  %v6109_v34 = vpop.f32.mrb[65].mxu0  ;;  %6154 = vmatmul.mubr.msk.bf16.gmra.mrb[108].mxu0 %vm1299_vm2, %v1446_v54  ;;  %v1956_v25 = vld [vmem:[#allocation2 + $0xe2] sm:$0xff] }
 0x173   : > { %6230 = vmatmul.mubr.msk.bf16.vlgmr.msra.gmra.mrb[0].mxu1 %vm1299_vm2, %v7657_v30  ;;  %v936_v26 = vpop.f32.mrb[66].mxu0  ;;  %v2259_v34 = vld [vmem:[#allocation2 + $0x1a] sm:$0xff] }
 0x174   : > { %6242 = vmatpush3.bf16.msra.mxu1 %v7555_v6  ;;  %v1003_v47 = vmax.f32 %v934_v24, 0.0  ;;  %v937_v55 = vadd.f32 %v7534_v57, %v936_v26  ;;  %v6110_v11 = vpop.f32.mrb[67].mxu0  ;;  %v1342_v24 = vld [vmem:[#allocation2 + $0x8] sm:$0xff]  ;;  %v1251_v26 = vpop.permute.xlu1 %1250 }
 0x175   : > { %6279 = vmatprep.subr.bf16.mxu1 %v7662_v22 }
 0x176   : > { %v1290_v49 = vmul.f32 %v7449_v29, %v1003_v47  ;;  %v1004_v60 = vmax.f32 %v937_v55, 0.0 }
 0x177   : > { %v1426_v44 = vld [vmem:[#allocation2 + $0xe9] sm:$0xff] }
 0x178   : > { %v1957_v9 = vld [vmem:[#allocation2 + $0xea] sm:$0xff]  ;;  %1332 = vst.msk [vmem:[#allocation2 + $0x100] sm:$0xff] %vm1299_vm2, %v1290_v49  ;;  %v1291_v61 = vmul.f32 %v7451_v3, %v1004_v60  ;;  %v1447_v62 = vpack.c.bf16 %v1426_v44, %v1425_v27  ;;  %v1341_v44 = vld [vmem:[#allocation2] sm:$0xff] }
 0x179   : > { %v7675_v40 = vpack.c.bf16 %v1957_v9, %v1956_v25  ;;  %v941_v6 = vpop.f32.mrb[68].mxu0  ;;  %v1427_v5 = vld [vmem:[#allocation2 + $0xf1] sm:$0xff] }
 0x17a   : > { %1333 = vst.msk [vmem:[#allocation2 + $0x108] sm:$0xff] %vm1299_vm2, %v1291_v61  ;;  %v942_v52 = vadd.f32 %v7534_v57, %v941_v6  ;;  %v6113_v0 = vpop.f32.mrb[69].mxu0  ;;  %6157 = vmatprep.mubr.msk.bf16.mxu0 %vm1299_vm2, %v1447_v62  ;;  %v1958_v4 = vld [vmem:[#allocation2 + $0xf2] sm:$0xff]  ;;  %v1377_v61 = vpack.c.bf16 %v1342_v24, %v1341_v44  ;;  %v1357_v44 = vld [vmem:[#allocation2 + $0x80] sm:$0xff] }
 0x17b   : > { %6233 = vmatprep.mubr.msk.bf16.mxu1 %vm1299_vm2, %v7675_v40  ;;  %v944_v29 = vpop.f32.mrb[70].mxu0  ;;  %v2258_v25 = vld [vmem:[#allocation2 + $0x12] sm:$0xff] }
 0x17c   : > { %v1005_v14 = vmax.f32 %v942_v52, 0.0  ;;  %v945_v2 = vadd.f32 %v7534_v57, %v944_v29  ;;  %v6114_v48 = vpop.f32.mrb[71].mxu0  ;;  %v7709_v62 = vpack.c.bf16 %v2259_v34, %v2258_v25  ;;  %v1356_v24 = vld [vmem:[#allocation2 + $0x78] sm:$0xff]  ;;  %v2273_v34 = vld [vmem:[#allocation2 + $0x8a] sm:$0xff] }
 0x17d   : > { %v2261_v48 = vld [vmem:[#allocation2 + $0x2a] sm:$0xff]  ;;  %v2274_v25 = vld [vmem:[#allocation2 + $0x92] sm:$0xff] }
 0x17e   : > { %v1292_v3 = vmul.f32 %v7461_v32, %v1005_v14  ;;  %v1006_v16 = vmax.f32 %v945_v2, 0.0  ;;  %v1256_v14 = vpop.permute.xlu0 %1255  ;;  %v1344_v2 = vld [vmem:[#allocation2 + $0x18] sm:$0xff] }
 0x17f   : > { %v1428_v36 = vld [vmem:[#allocation2 + $0xf9] sm:$0xff] }
 0x180   : > { %v1959_v10 = vld [vmem:[#allocation2 + $0xfa] sm:$0xff]  ;;  %1334 = vst.msk [vmem:[#allocation2 + $0x110] sm:$0xff] %vm1299_vm2, %v1292_v3  ;;  %v1293_v53 = vmul.f32 %v7465_v33, %v1006_v16  ;;  %v1448_v50 = vpack.c.bf16 %v1428_v36, %v1427_v5  ;;  %v1346_v16 = vld [vmem:[#allocation2 + $0x28] sm:$0xff] }
 0x181   : > { %v7686_v7 = vpack.c.bf16 %v1959_v10, %v1958_v4  ;;  %v949_v45 = vpop.f32.mrb[72].mxu0  ;;  %v1429_v38 = vld [vmem:[#allocation2 + $0x101] sm:$0xff] }
 0x182   : > { %1335 = vst.msk [vmem:[#allocation2 + $0x118] sm:$0xff] %vm1299_vm2, %v1293_v53  ;;  %v950_v41 = vadd.f32 %v7534_v57, %v949_v45  ;;  %v6117_v15 = vpop.f32.mrb[73].mxu0  ;;  %6158 = vmatmul.mubr.msk.bf16.gmra.mrb[112].mxu0 %vm1299_vm2, %v1448_v50  ;;  %v1960_v19 = vld [vmem:[#allocation2 + $0x102] sm:$0xff]  ;;  %v2263_v36 = vld [vmem:[#allocation2 + $0x3a] sm:$0xff]  ;;  %v2262_v45 = vld [vmem:[#allocation2 + $0x32] sm:$0xff] }
 0x183   : > { %6234 = vmatmul.mubr.msk.bf16.gmra.mrb[4].mxu1 %vm1299_vm2, %v7686_v7  ;;  %v952_v32 = vpop.f32.mrb[74].mxu0  ;;  %v2260_v5 = vld [vmem:[#allocation2 + $0x22] sm:$0xff]  ;;  %v7730_v15 = vpack.c.bf16 %v2263_v36, %v2262_v45  ;;  %v1364_v36 = vld [vmem:[#allocation2 + $0xb8] sm:$0xff] }
 0x184   : > { %v1007_v8 = vmax.f32 %v950_v41, 0.0  ;;  %v953_v58 = vadd.f32 %v7534_v57, %v952_v32  ;;  %v6118_v37 = vpop.f32.mrb[75].mxu0  ;;  %v7720_v10 = vpack.c.bf16 %v2261_v48, %v2260_v5  ;;  %v1345_v53 = vld [vmem:[#allocation2 + $0x20] sm:$0xff]  ;;  %v7725_v41 = vld [vmem:[%s8616_s3 + $0x28] sm:$0xff]   ;;  %v1348_v32 = vld [vmem:[#allocation2 + $0x38] sm:$0xff] }
 0x185   : > { %v1379_v50 = vpack.c.bf16 %v1346_v16, %v1345_v53  ;;  %v2267_v37 = vld [vmem:[#allocation2 + $0x5a] sm:$0xff]  ;;  %v2278_v16 = vld [vmem:[#allocation2 + $0xb2] sm:$0xff] }
 0x186   : > { %v1294_v33 = vmul.f32 %v7470_v23, %v1007_v8  ;;  %v1008_v12 = vmax.f32 %v953_v58, 0.0  ;;  %v2265_v8 = vld [vmem:[#allocation2 + $0x4a] sm:$0xff]  ;;  %v1365_v45 = vld [vmem:[#allocation2 + $0xc0] sm:$0xff] }
 0x187   : > { %v1430_v46 = vld [vmem:[#allocation2 + $0x109] sm:$0xff] }
 0x188   : > { %v1961_v43 = vld [vmem:[#allocation2 + $0x10a] sm:$0xff]  ;;  %1336 = vst.msk [vmem:[#allocation2 + $0x120] sm:$0xff] %vm1299_vm2, %v1294_v33  ;;  %v1295_v13 = vmul.f32 %v7528_v56, %v1008_v12  ;;  %v1449_v51 = vpack.c.bf16 %v1430_v46, %v1429_v38  ;;  %v2264_v12 = vld [vmem:[#allocation2 + $0x42] sm:$0xff] }
 0x189   : > { %v7697_v63 = vpack.c.bf16 %v1961_v43, %v1960_v19  ;;  %v957_v17 = vpop.f32.mrb[76].mxu0  ;;  %v1431_v31 = vld [vmem:[#allocation2 + $0x111] sm:$0xff]  ;;  %v1350_v58 = vld [vmem:[#allocation2 + $0x48] sm:$0xff]  ;;  %v7738_v46 = vpack.c.bf16 %v2265_v8, %v2264_v12  ;;  %v1349_v19 = vld [vmem:[#allocation2 + $0x40] sm:$0xff] }
 0x18a   : > { %1337 = vst.msk [vmem:[#allocation2 + $0x128] sm:$0xff] %vm1299_vm2, %v1295_v13  ;;  %v958_v20 = vadd.f32 %v7534_v57, %v957_v17  ;;  %v6121_v21 = vpop.f32.mrb[77].mxu0  ;;  %6161 = vmatprep.mubr.msk.bf16.mxu0 %vm1299_vm2, %v1449_v51  ;;  %v1962_v55 = vld [vmem:[#allocation2 + $0x112] sm:$0xff]  ;;  %v1381_v43 = vpack.c.bf16 %v1350_v58, %v1349_v19  ;;  %v2269_v51 = vld [vmem:[#allocation2 + $0x6a] sm:$0xff]  ;;  %v1369_v12 = vld [vmem:[#allocation2 + $0xe0] sm:$0xff] }
 0x18b   : > { %6237 = vmatprep.mubr.msk.bf16.mxu1 %vm1299_vm2, %v7697_v63  ;;  %v960_v23 = vpop.f32.mrb[78].mxu0  ;;  %v1347_v33 = vld [vmem:[#allocation2 + $0x30] sm:$0xff]  ;;  %v1354_v17 = vld [vmem:[#allocation2 + $0x68] sm:$0xff]  ;;  %v1368_v8 = vld [vmem:[#allocation2 + $0xd8] sm:$0xff] }
 0x18c   : > { %v1009_v35 = vmax.f32 %v958_v20, 0.0  ;;  %v961_v18 = vadd.f32 %v7534_v57, %v960_v23  ;;  %v6122_v28 = vpop.f32.mrb[79].mxu0  ;;  %v1380_v38 = vpack.c.bf16 %v1348_v32, %v1347_v33  ;;  %v2271_v20 = vld [vmem:[#allocation2 + $0x7a] sm:$0xff]  ;;  %v1351_v21 = vld [vmem:[#allocation2 + $0x50] sm:$0xff]  ;;  %v2268_v23 = vld [vmem:[#allocation2 + $0x62] sm:$0xff] }
 0x18d   : > { %v1353_v28 = vld [vmem:[#allocation2 + $0x60] sm:$0xff]  ;;  %v1363_v53 = vld [vmem:[#allocation2 + $0xb0] sm:$0xff]  ;;  %v1370_v58 = vld [vmem:[#allocation2 + $0xe8] sm:$0xff] }
 0x18e   : > { %v1296_v56 = vmul.f32 %v7536_v59, %v1009_v35  ;;  %v1010_v54 = vmax.f32 %v961_v18, 0.0  ;;  %v7748_v18 = vpack.c.bf16 %v2269_v51, %v2268_v23  ;;  %v1374_v19 = vld [vmem:[#allocation2 + $0x108] sm:$0xff] }
 0x18f   : > { %v1432_v47 = vld [vmem:[#allocation2 + $0x119] sm:$0xff] }
 0x190   : > { %v1963_v11 = vld [vmem:[#allocation2 + $0x11a] sm:$0xff]  ;;  %1338 = vst.msk [vmem:[#allocation2 + $0x130] sm:$0xff] %vm1299_vm2, %v1296_v56  ;;  %v1297_v49 = vmul.f32 %v1251_v26, %v1010_v54  ;;  %v1450_v60 = vpack.c.bf16 %v1432_v47, %v1431_v31  ;;  %v2270_v56 = vld [vmem:[#allocation2 + $0x72] sm:$0xff]  ;;  %v1383_v54 = vpack.c.bf16 %v1354_v17, %v1353_v28  ;;  %v1358_v26 = vld [vmem:[#allocation2 + $0x88] sm:$0xff] }
 0x191   : > { %v7707_v27 = vpack.c.bf16 %v1963_v11, %v1962_v55  ;;  %v965_v9 = vpop.f32.mrb[80].mxu0  ;;  %v7750_v31 = vpack.c.bf16 %v2271_v20, %v2270_v56  ;;  %v2275_v47 = vld [vmem:[#allocation2 + $0x9a] sm:$0xff]  ;;  %v1355_v55 = vld [vmem:[#allocation2 + $0x70] sm:$0xff]  ;;  %v2272_v11 = vld [vmem:[#allocation2 + $0x82] sm:$0xff] }
 0x192   : > { %1339 = vst.msk [vmem:[#allocation2 + $0x138] sm:$0xff] %vm1299_vm2, %v1297_v49  ;;  %v966_v59 = vadd.f32 %v7534_v57, %v965_v9  ;;  %6162 = vmatmul.mubr.msk.bf16.gmra.mrb[116].mxu0 %vm1299_vm2, %v1450_v60  ;;  %v6125_v6 = vpop.f32.mrb[81].mxu0  ;;  %v1343_v57 = vld [vmem:[#allocation2 + $0x10] sm:$0xff]  ;;  %v1384_v49 = vpack.c.bf16 %v1356_v24, %v1355_v55  ;;  %v7758_v60 = vpack.c.bf16 %v2273_v34, %v2272_v11  ;;  %v1928_v28 = vld [vmem:[#allocation2 + $0x2] sm:$0xff] }
 0x193   : > { %6238 = vmatmul.mubr.msk.bf16.gmra.mrb[8].mxu1 %vm1299_vm2, %v7707_v27  ;;  %6167 = vmatprep.mubr.msk.bf16.mxu0 %vm1299_vm2, %v1377_v61  ;;  %v968_v52 = vpop.f32.mrb[82].mxu0  ;;  %v1378_v4 = vpack.c.bf16 %v1344_v2, %v1343_v57  ;;  %v1385_v9 = vpack.c.bf16 %v1358_v26, %v1357_v44  ;;  %v7760_v61 = vpack.c.bf16 %v2275_v47, %v2274_v25  ;;  %v2277_v6 = vld [vmem:[#allocation2 + $0xaa] sm:$0xff]  ;;  %v2588_v56 = vld [vmem:[#allocation2 + $0x13] sm:$0xff]  ;;  %v2593_v34 = vld [vmem:[#allocation2 + $0x3b] sm:$0xff] }
 0x194   : > { %6243 = vmatprep.mubr.msk.bf16.mxu1 %vm1299_vm2, %v7709_v62  ;;  %v1011_v0 = vmax.f32 %v966_v59, 0.0  ;;  %v6126_v29 = vpop.f32.mrb[83].mxu0  ;;  %v1360_v59 = vld [vmem:[#allocation2 + $0x98] sm:$0xff]  ;;  %v1362_v52 = vld [vmem:[#allocation2 + $0xa8] sm:$0xff]  ;;  %v1375_v20 = vld [vmem:[#allocation2 + $0x110] sm:$0xff] }
 0x195   : > { %v1359_v29 = vld [vmem:[#allocation2 + $0x90] sm:$0xff]  ;;  %v2597_v44 = vld [vmem:[#allocation2 + $0x5b] sm:$0xff]  ;;  %v2594_v25 = vld [vmem:[#allocation2 + $0x43] sm:$0xff] }
 0x196   : > { %v1298_v3 = vmul.f32 %v1256_v14, %v1011_v0  ;;  %v2279_v0 = vld [vmem:[#allocation2 + $0xba] sm:$0xff]  ;;  %v2276_v14 = vld [vmem:[#allocation2 + $0xa2] sm:$0xff]  ;;  %v1386_v2 = vpack.c.bf16 %v1360_v59, %v1359_v29  ;;  %v1929_v17 = vld [vmem:[#allocation2 + $0xa] sm:$0xff] }
 0x197   : > { %v7768_v48 = vpack.c.bf16 %v2277_v6, %v2276_v14  ;;  %v7770_v5 = vpack.c.bf16 %v2279_v0, %v2278_v16  ;;  %v2293_v51 = vld [vmem:[#allocation2 + $0x12a] sm:$0xff]  ;;  %v2592_v55 = vld [vmem:[#allocation2 + $0x33] sm:$0xff] }
 0x198   : > { %1340 = vst.msk [vmem:[#allocation2 + $0x140] sm:$0xff] %vm1299_vm2, %v1298_v3  ;;  %v1361_v3 = vld [vmem:[#allocation2 + $0xa0] sm:$0xff]  ;;  %v7803_v47 = vld [vmem:[%s8616_s3 + $0x30] sm:$0xff]   ;;  %v2626_v11 = vpack.c.bf16 %v2593_v34, %v2592_v55 }
 0x199   : > { %v1387_v57 = vpack.c.bf16 %v1362_v52, %v1361_v3  ;;  %v2596_v59 = vld [vmem:[#allocation2 + $0x53] sm:$0xff]  ;;  %v2602_v14 = vld [vmem:[#allocation2 + $0x83] sm:$0xff] }
 0x19a   : > { %6168 = vmatmul.mubr.msk.bf16.vlgmr.msra.gmra.mrb[84].mxu0 %vm1299_vm2, %v1378_v4  ;;  %v1366_v4 = vld [vmem:[#allocation2 + $0xc8] sm:$0xff]  ;;  %v2628_v6 = vpack.c.bf16 %v2597_v44, %v2596_v59  ;;  %v2600_v0 = vld [vmem:[#allocation2 + $0x73] sm:$0xff] }
 0x19b   : > { %6244 = vmatmul.mubr.msk.bf16.vlgmr.msra.gmra.mrb[12].mxu1 %vm1299_vm2, %v7720_v10  ;;  %6171 = vmatprep.mubr.msk.bf16.mxu0 %vm1299_vm2, %v1379_v50  ;;  %v1388_v50 = vpack.c.bf16 %v1364_v36, %v1363_v53  ;;  %v1389_v32 = vpack.c.bf16 %v1366_v4, %v1365_v45  ;;  %v2604_v3 = vld [vmem:[#allocation2 + $0x93] sm:$0xff]  ;;  %v2928_v44 = vld [vmem:[#allocation2 + $0x64] sm:$0xff] }
 0x19c   : > { %6280 = vmatpush3.bf16.msra.mxu1 %v7662_v22  ;;  %6247 = vmatprep.mubr.msk.bf16.mxu1 %vm1299_vm2, %v7730_v15  ;;  %v2266_v22 = vld [vmem:[#allocation2 + $0x52] sm:$0xff] }
 0x19d   : > { %6204 = vmatpush3.bf16.msra.mxu0 %v7526_v42  ;;  %6317 = vmatprep.subr.bf16.mxu1 %v7725_v41  ;;  %v7740_v13 = vpack.c.bf16 %v2267_v37, %v2266_v22  ;;  %v1352_v42 = vld [vmem:[#allocation2 + $0x58] sm:$0xff]  ;;  %v1367_v37 = vld [vmem:[#allocation2 + $0xd0] sm:$0xff] }
 0x19e   : > { %v1382_v35 = vpack.c.bf16 %v1352_v42, %v1351_v21  ;;  %v1390_v33 = vpack.c.bf16 %v1368_v8, %v1367_v37  ;;  %v1371_v22 = vld [vmem:[#allocation2 + $0xf0] sm:$0xff]  ;;  %v2292_v21 = vld [vmem:[#allocation2 + $0x122] sm:$0xff] }
 0x19f   : > { %v2608_v4 = vld [vmem:[#allocation2 + $0xb3] sm:$0xff]  ;;  %v2614_v37 = vld [vmem:[#allocation2 + $0xe3] sm:$0xff] }
 0x1a0   : > { %v2933_v59 = vld [vmem:[#allocation2 + $0x8c] sm:$0xff] }
 0x1a2   : > { %6172 = vmatmul.mubr.msk.bf16.gmra.mrb[88].mxu0 %vm1299_vm2, %v1380_v38  ;;  %v1391_v38 = vpack.c.bf16 %v1370_v58, %v1369_v12  ;;  %v2617_v58 = vld [vmem:[#allocation2 + $0xfb] sm:$0xff] }
 0x1a3   : > { %6248 = vmatmul.mubr.msk.bf16.gmra.mrb[16].mxu1 %vm1299_vm2, %v7738_v46  ;;  %6175 = vmatprep.mubr.msk.bf16.mxu0 %vm1299_vm2, %v1381_v43  ;;  %v1373_v43 = vld [vmem:[#allocation2 + $0x100] sm:$0xff] }
 0x1a4   : > { %6251 = vmatprep.mubr.msk.bf16.mxu1 %vm1299_vm2, %v7740_v13  ;;  %v1393_v42 = vpack.c.bf16 %v1374_v19, %v1373_v43  ;;  %v2618_v19 = vld [vmem:[#allocation2 + $0x103] sm:$0xff]  ;;  %v2623_v43 = vld [vmem:[#allocation2 + $0x12b] sm:$0xff] }
 0x1aa   : > { %6176 = vmatmul.mubr.msk.bf16.gmra.mrb[92].mxu0 %vm1299_vm2, %v1382_v35  ;;  %v2311_v35 = vpack.c.bf16 %v2293_v51, %v2292_v21  ;;  %v2923_v21 = vld [vmem:[#allocation2 + $0x3c] sm:$0xff] }
 0x1ab   : > { %6252 = vmatmul.mubr.msk.bf16.gmra.mrb[20].mxu1 %vm1299_vm2, %v7748_v18  ;;  %6179 = vmatprep.mubr.msk.bf16.mxu0 %vm1299_vm2, %v1383_v54  ;;  %v1964_v54 = vpack.c.bf16 %v1929_v17, %v1928_v28  ;;  %v2918_v17 = vld [vmem:[#allocation2 + $0x14] sm:$0xff] }
 0x1ac   : > { %6255 = vmatprep.mubr.msk.bf16.mxu1 %vm1299_vm2, %v7750_v31  ;;  %v2922_v28 = vld [vmem:[#allocation2 + $0x34] sm:$0xff] }
 0x1b2   : > { %6180 = vmatmul.mubr.msk.bf16.gmra.mrb[96].mxu0 %vm1299_vm2, %v1384_v49  ;;  %v2595_v49 = vld [vmem:[#allocation2 + $0x4b] sm:$0xff] }
 0x1b3   : > { %6256 = vmatmul.mubr.msk.bf16.gmra.mrb[24].mxu1 %vm1299_vm2, %v7758_v60  ;;  %6183 = vmatprep.mubr.msk.bf16.mxu0 %vm1299_vm2, %v1385_v9  ;;  %v2627_v9 = vpack.c.bf16 %v2595_v49, %v2594_v25  ;;  %v2931_v49 = vld [vmem:[#allocation2 + $0x7c] sm:$0xff] }
 0x1b4   : > { %6259 = vmatprep.mubr.msk.bf16.mxu1 %vm1299_vm2, %v7760_v61 }
 0x1ba   : > { %6184 = vmatmul.mubr.msk.bf16.gmra.mrb[100].mxu0 %vm1299_vm2, %v1386_v2 }
 0x1bb   : > { %6260 = vmatmul.mubr.msk.bf16.gmra.mrb[28].mxu1 %vm1299_vm2, %v7768_v48  ;;  %6187 = vmatprep.mubr.msk.bf16.mxu0 %vm1299_vm2, %v1387_v57  ;;  %v2606_v57 = vld [vmem:[#allocation2 + $0xa3] sm:$0xff] }
 0x1bc   : > { %6263 = vmatprep.mubr.msk.bf16.mxu1 %vm1299_vm2, %v7770_v5 }
 0x1c2   : > { %6188 = vmatmul.mubr.msk.bf16.gmra.mrb[104].mxu0 %vm1299_vm2, %v1388_v50  ;;  %v2610_v50 = vld [vmem:[#allocation2 + $0xc3] sm:$0xff] }
 0x1c3   : > { %6264 = vmatmul.mubr.msk.bf16.gmra.mrb[32].mxu1 %vm1299_vm2, %v7646_v39  ;;  %6191 = vmatprep.mubr.msk.bf16.mxu0 %vm1299_vm2, %v1389_v32  ;;  %v1372_v39 = vld [vmem:[#allocation2 + $0xf8] sm:$0xff] }
 0x1c4   : > { %6267 = vmatprep.mubr.msk.bf16.mxu1 %vm1299_vm2, %v7657_v30  ;;  %v1392_v30 = vpack.c.bf16 %v1372_v39, %v1371_v22  ;;  %v2612_v32 = vld [vmem:[#allocation2 + $0xd3] sm:$0xff]  ;;  %v2621_v39 = vld [vmem:[#allocation2 + $0x11b] sm:$0xff] }
 0x1ca   : > { %6192 = vmatmul.mubr.msk.bf16.gmra.mrb[108].mxu0 %vm1299_vm2, %v1390_v33 }
 0x1cb   : > { %6268 = vmatmul.mubr.msk.bf16.gmra.mrb[0].mxu1 %vm1299_vm2, %v7675_v40  ;;  %6195 = vmatprep.mubr.msk.bf16.mxu0 %vm1299_vm2, %v1391_v38  ;;  %v1376_v40 = vld [vmem:[#allocation2 + $0x118] sm:$0xff]  ;;  %v2619_v38 = vld [vmem:[#allocation2 + $0x10b] sm:$0xff] }
 0x1cc   : > { %6271 = vmatprep.mubr.msk.bf16.mxu1 %vm1299_vm2, %v7686_v7  ;;  %v2589_v7 = vld [vmem:[#allocation2 + $0x1b] sm:$0xff]  ;;  %v1394_v23 = vpack.c.bf16 %v1376_v40, %v1375_v20  ;;  %v2639_v22 = vpack.c.bf16 %v2619_v38, %v2618_v19  ;;  %v2622_v40 = vld [vmem:[#allocation2 + $0x123] sm:$0xff]  ;;  %v2921_v20 = vld [vmem:[#allocation2 + $0x2c] sm:$0xff] }
 0x1cd   : > { %v2624_v24 = vpack.c.bf16 %v2589_v7, %v2588_v56  ;;  %v2641_v51 = vpack.c.bf16 %v2623_v43, %v2622_v40  ;;  %v7852_v56 = vld [vmem:[%s8616_s3 + $0x38] sm:$0xff]  }
 0x1d2   : > { %6196 = vmatmul.mubr.msk.bf16.gmra.mrb[112].mxu0 %vm1299_vm2, %v1392_v30  ;;  %v2620_v30 = vld [vmem:[#allocation2 + $0x113] sm:$0xff] }
 0x1d3   : > { %6272 = vmatmul.mubr.msk.bf16.gmra.mrb[4].mxu1 %vm1299_vm2, %v7697_v63  ;;  %6199 = vmatprep.mubr.msk.bf16.mxu0 %vm1299_vm2, %v1393_v42  ;;  %v2591_v63 = vld [vmem:[#allocation2 + $0x2b] sm:$0xff]  ;;  %v2919_v42 = vld [vmem:[#allocation2 + $0x1c] sm:$0xff] }
 0x1d4   : > { %6275 = vmatprep.mubr.msk.bf16.mxu1 %vm1299_vm2, %v7707_v27  ;;  %v2590_v27 = vld [vmem:[#allocation2 + $0x23] sm:$0xff]  ;;  %v2954_v7 = vpack.c.bf16 %v2919_v42, %v2918_v17 }
 0x1d5   : > { %v2625_v26 = vpack.c.bf16 %v2591_v63, %v2590_v27  ;;  %v2927_v63 = vld [vmem:[#allocation2 + $0x5c] sm:$0xff]  ;;  %v2924_v27 = vld [vmem:[#allocation2 + $0x44] sm:$0xff] }
 0x1da   : > { %6200 = vmatmul.mubr.msk.bf16.gmra.mrb[116].mxu0 %vm1299_vm2, %v1394_v23  ;;  %v2920_v23 = vld [vmem:[#allocation2 + $0x24] sm:$0xff] }
 0x1db   : > { %6276 = vmatmul.mubr.msk.bf16.gmra.mrb[8].mxu1 %vm1299_vm2, %v2311_v35  ;;  %6205 = vmatprep.mubr.msk.bf16.mxu0 %vm1299_vm2, %v1964_v54  ;;  %v7847_v35 = vpack.c.bf16 %v2921_v20, %v2920_v23  ;;  %v7854_v54 = vpack.c.bf16 %v2923_v21, %v2922_v28  ;;  %v3579_v21 = vld [vmem:[#allocation2 + $0x2d] sm:$0xff] }
 0x1dc   : > { %6281 = vmatprep.mubr.msk.bf16.mxu1 %vm1299_vm2, %v2624_v24  ;;  %v2925_v24 = vld [vmem:[#allocation2 + $0x4c] sm:$0xff] }
 0x1dd   : > { %v2957_v34 = vpack.c.bf16 %v2925_v24, %v2924_v27  ;;  %v3581_v27 = vld [vmem:[#allocation2 + $0x3d] sm:$0xff] }
 0x1e2   : > { %6206 = vmatmul.mubr.msk.bf16.vlgmr.msra.gmra.mrb[84].mxu0 %vm1299_vm2, %v7709_v62  ;;  %v2599_v62 = vld [vmem:[#allocation2 + $0x6b] sm:$0xff] }
 0x1e3   : > { %6282 = vmatmul.mubr.msk.bf16.vlgmr.msra.gmra.mrb[12].mxu1 %vm1299_vm2, %v2625_v26  ;;  %6209 = vmatprep.mubr.msk.bf16.mxu0 %vm1299_vm2, %v7720_v10  ;;  %v2601_v10 = vld [vmem:[#allocation2 + $0x7b] sm:$0xff] }
 0x1e4   : > { %6318 = vmatpush3.bf16.msra.mxu1 %v7725_v41  ;;  %6285 = vmatprep.mubr.msk.bf16.mxu1 %vm1299_vm2, %v2626_v11  ;;  %v2598_v41 = vld [vmem:[#allocation2 + $0x63] sm:$0xff]  ;;  %v2630_v29 = vpack.c.bf16 %v2601_v10, %v2600_v0  ;;  %v2926_v26 = vld [vmem:[#allocation2 + $0x54] sm:$0xff]  ;;  %v2929_v11 = vld [vmem:[#allocation2 + $0x6c] sm:$0xff] }
 0x1e5   : > { %6355 = vmatprep.subr.bf16.mxu1 %v7803_v47  ;;  %v2629_v52 = vpack.c.bf16 %v2599_v62, %v2598_v41  ;;  %v2958_v55 = vpack.c.bf16 %v2927_v63, %v2926_v26  ;;  %v2959_v25 = vpack.c.bf16 %v2929_v11, %v2928_v44  ;;  %v2932_v62 = vld [vmem:[#allocation2 + $0x84] sm:$0xff]  ;;  %v2934_v41 = vld [vmem:[#allocation2 + $0x94] sm:$0xff]  ;;  %v2937_v0 = vld [vmem:[#allocation2 + $0xac] sm:$0xff] }
 0x1e6   : > { %v2961_v10 = vpack.c.bf16 %v2933_v59, %v2932_v62  ;;  %v3583_v26 = vld [vmem:[#allocation2 + $0x4d] sm:$0xff]  ;;  %v3580_v11 = vld [vmem:[#allocation2 + $0x35] sm:$0xff]  ;;  %v3585_v59 = vld [vmem:[#allocation2 + $0x5d] sm:$0xff] }
 0x1e7   : > { %v3615_v44 = vpack.c.bf16 %v3581_v27, %v3580_v11  ;;  %v3587_v62 = vld [vmem:[#allocation2 + $0x6d] sm:$0xff]  ;;  %v3601_v11 = vld [vmem:[#allocation2 + $0xdd] sm:$0xff] }
 0x1ea   : > { %6210 = vmatmul.mubr.msk.bf16.gmra.mrb[88].mxu0 %vm1299_vm2, %v7730_v15  ;;  %v2603_v15 = vld [vmem:[#allocation2 + $0x8b] sm:$0xff] }
 0x1eb   : > { %6286 = vmatmul.mubr.msk.bf16.gmra.mrb[16].mxu1 %vm1299_vm2, %v2627_v9  ;;  %6213 = vmatprep.mubr.msk.bf16.mxu0 %vm1299_vm2, %v7738_v46  ;;  %v2605_v46 = vld [vmem:[#allocation2 + $0x9b] sm:$0xff]  ;;  %v2631_v2 = vpack.c.bf16 %v2603_v15, %v2602_v14  ;;  %v2936_v15 = vld [vmem:[#allocation2 + $0xa4] sm:$0xff] }
 0x1ec   : > { %6289 = vmatprep.mubr.msk.bf16.mxu1 %vm1299_vm2, %v2628_v6  ;;  %v2632_v16 = vpack.c.bf16 %v2605_v46, %v2604_v3  ;;  %v2935_v6 = vld [vmem:[#allocation2 + $0x9c] sm:$0xff]  ;;  %v2963_v46 = vpack.c.bf16 %v2937_v0, %v2936_v15  ;;  %v2938_v14 = vld [vmem:[#allocation2 + $0xb4] sm:$0xff]  ;;  %v2941_v3 = vld [vmem:[#allocation2 + $0xcc] sm:$0xff] }
 0x1f2   : > { %6214 = vmatmul.mubr.msk.bf16.gmra.mrb[92].mxu0 %vm1299_vm2, %v7740_v13  ;;  %v2607_v13 = vld [vmem:[#allocation2 + $0xab] sm:$0xff] }
 0x1f3   : > { %6290 = vmatmul.mubr.msk.bf16.gmra.mrb[20].mxu1 %vm1299_vm2, %v2629_v52  ;;  %6217 = vmatprep.mubr.msk.bf16.mxu0 %vm1299_vm2, %v7748_v18  ;;  %v2609_v18 = vld [vmem:[#allocation2 + $0xbb] sm:$0xff]  ;;  %v2633_v36 = vpack.c.bf16 %v2607_v13, %v2606_v57  ;;  %v2962_v52 = vpack.c.bf16 %v2935_v6, %v2934_v41  ;;  %v2940_v13 = vld [vmem:[#allocation2 + $0xc4] sm:$0xff] }
 0x1f4   : > { %6293 = vmatprep.mubr.msk.bf16.mxu1 %vm1299_vm2, %v2630_v29  ;;  %v2634_v53 = vpack.c.bf16 %v2609_v18, %v2608_v4  ;;  %v2939_v29 = vld [vmem:[#allocation2 + $0xbc] sm:$0xff]  ;;  %v2965_v18 = vpack.c.bf16 %v2941_v3, %v2940_v13  ;;  %v2942_v57 = vld [vmem:[#allocation2 + $0xd4] sm:$0xff]  ;;  %v2945_v4 = vld [vmem:[#allocation2 + $0xec] sm:$0xff] }
 0x1f5   : > { %v3584_v41 = vld [vmem:[#allocation2 + $0x55] sm:$0xff]  ;;  %v3589_v3 = vld [vmem:[#allocation2 + $0x7d] sm:$0xff]  ;;  %v3591_v13 = vld [vmem:[#allocation2 + $0x8d] sm:$0xff] }
 0x1f6   : > { %v3617_v0 = vpack.c.bf16 %v3585_v59, %v3584_v41  ;;  %v3600_v59 = vld [vmem:[#allocation2 + $0xd5] sm:$0xff] }
 0x1f7   : > { %v3625_v41 = vpack.c.bf16 %v3601_v11, %v3600_v59 }
 0x1fa   : > { %6218 = vmatmul.mubr.msk.bf16.gmra.mrb[96].mxu0 %vm1299_vm2, %v7750_v31  ;;  %v2611_v31 = vld [vmem:[#allocation2 + $0xcb] sm:$0xff] }
 0x1fb   : > { %6294 = vmatmul.mubr.msk.bf16.gmra.mrb[24].mxu1 %vm1299_vm2, %v2631_v2  ;;  %6221 = vmatprep.mubr.msk.bf16.mxu0 %vm1299_vm2, %v7758_v60  ;;  %v2613_v60 = vld [vmem:[#allocation2 + $0xdb] sm:$0xff]  ;;  %v2635_v45 = vpack.c.bf16 %v2611_v31, %v2610_v50  ;;  %v2964_v2 = vpack.c.bf16 %v2939_v29, %v2938_v14  ;;  %v2944_v31 = vld [vmem:[#allocation2 + $0xe4] sm:$0xff] }
 0x1fc   : > { %6297 = vmatprep.mubr.msk.bf16.mxu1 %vm1299_vm2, %v2632_v16  ;;  %v2636_v8 = vpack.c.bf16 %v2613_v60, %v2612_v32  ;;  %v2943_v16 = vld [vmem:[#allocation2 + $0xdc] sm:$0xff]  ;;  %v2967_v60 = vpack.c.bf16 %v2945_v4, %v2944_v31  ;;  %v2946_v50 = vld [vmem:[#allocation2 + $0xf4] sm:$0xff]  ;;  %v2949_v32 = vld [vmem:[#allocation2 + $0x10c] sm:$0xff] }
 0x1fd   : > { %v3586_v29 = vld [vmem:[#allocation2 + $0x65] sm:$0xff] }
 0x1fe   : > { %v3618_v15 = vpack.c.bf16 %v3587_v62, %v3586_v29  ;;  %v6865_v14 = vld [vmem:[%s8618_s5 + $0x8] sm:$0xff]  }
 0x202   : > { %6222 = vmatmul.mubr.msk.bf16.gmra.mrb[100].mxu0 %vm1299_vm2, %v7760_v61  ;;  %v2615_v61 = vld [vmem:[#allocation2 + $0xeb] sm:$0xff] }
 0x203   : > { %6298 = vmatmul.mubr.msk.bf16.gmra.mrb[28].mxu1 %vm1299_vm2, %v2633_v36  ;;  %6225 = vmatprep.mubr.msk.bf16.mxu0 %vm1299_vm2, %v7768_v48  ;;  %v2637_v33 = vpack.c.bf16 %v2615_v61, %v2614_v37  ;;  %v2616_v48 = vld [vmem:[#allocation2 + $0xf3] sm:$0xff]  ;;  %v2966_v36 = vpack.c.bf16 %v2943_v16, %v2942_v57  ;;  %v2948_v61 = vld [vmem:[#allocation2 + $0x104] sm:$0xff] }
 0x204   : > { %6301 = vmatprep.mubr.msk.bf16.mxu1 %vm1299_vm2, %v2634_v53  ;;  %v2638_v12 = vpack.c.bf16 %v2617_v58, %v2616_v48  ;;  %v2947_v53 = vld [vmem:[#allocation2 + $0xfc] sm:$0xff]  ;;  %v2969_v58 = vpack.c.bf16 %v2949_v32, %v2948_v61  ;;  %v2950_v37 = vld [vmem:[#allocation2 + $0x114] sm:$0xff]  ;;  %v2953_v48 = vld [vmem:[#allocation2 + $0x12c] sm:$0xff] }
 0x205   : > { %v3588_v57 = vld [vmem:[#allocation2 + $0x75] sm:$0xff]  ;;  %v3595_v32 = vld [vmem:[#allocation2 + $0xad] sm:$0xff] }
 0x206   : > { %v3619_v4 = vpack.c.bf16 %v3589_v3, %v3588_v57  ;;  %v3592_v61 = vld [vmem:[#allocation2 + $0x95] sm:$0xff] }
 0x20a   : > { %6226 = vmatmul.mubr.msk.bf16.gmra.mrb[104].mxu0 %vm1299_vm2, %v7770_v5  ;;  %v2640_v5 = vpack.c.bf16 %v2621_v39, %v2620_v30  ;;  %v6863_v39 = vld [vmem:[%s8616_s3 + $0x40] sm:$0xff]  }
 0x20b   : > { %6302 = vmatmul.mubr.msk.bf16.gmra.mrb[32].mxu1 %vm1299_vm2, %v2635_v45  ;;  %v2968_v45 = vpack.c.bf16 %v2947_v53, %v2946_v50  ;;  %v3590_v53 = vld [vmem:[#allocation2 + $0x85] sm:$0xff]  ;;  %v3593_v50 = vld [vmem:[#allocation2 + $0x9d] sm:$0xff] }
 0x20c   : > { %6305 = vmatprep.mubr.msk.bf16.mxu1 %vm1299_vm2, %v2636_v8  ;;  %v2951_v8 = vld [vmem:[#allocation2 + $0x11c] sm:$0xff]  ;;  %v3620_v31 = vpack.c.bf16 %v3591_v13, %v3590_v53  ;;  %v3606_v13 = vld [vmem:[#allocation2 + $0x105] sm:$0xff]  ;;  %v3611_v53 = vld [vmem:[#allocation2 + $0x12d] sm:$0xff] }
 0x213   : > { %6306 = vmatmul.mubr.msk.bf16.gmra.mrb[0].mxu1 %vm1299_vm2, %v2637_v33  ;;  %v2970_v33 = vpack.c.bf16 %v2951_v8, %v2950_v37  ;;  %v3621_v37 = vpack.c.bf16 %v3593_v50, %v3592_v61 }
 0x214   : > { %6309 = vmatprep.mubr.msk.bf16.mxu1 %vm1299_vm2, %v2638_v12  ;;  %v2952_v12 = vld [vmem:[#allocation2 + $0x124] sm:$0xff] }
 0x215   : > { %v2971_v38 = vpack.c.bf16 %v2953_v48, %v2952_v12 }
 0x21b   : > { %6310 = vmatmul.mubr.msk.bf16.gmra.mrb[4].mxu1 %vm1299_vm2, %v2639_v22 }
 0x21c   : > { %6313 = vmatprep.mubr.msk.bf16.mxu1 %vm1299_vm2, %v2640_v5 }
 0x223   : > { %6314 = vmatmul.mubr.msk.bf16.gmra.mrb[8].mxu1 %vm1299_vm2, %v2641_v51 }
 0x224   : > { %6319 = vmatprep.mubr.msk.bf16.mxu1 %vm1299_vm2, %v2954_v7  ;;  %v3283_v7 = vld [vmem:[#allocation2 + $0x13c] sm:$0xff] }
 0x22b   : > { %6320 = vmatmul.mubr.msk.bf16.vlgmr.msra.gmra.mrb[12].mxu1 %vm1299_vm2, %v7847_v35 }
 0x22c   : > { %6356 = vmatpush3.bf16.msra.mxu1 %v7803_v47  ;;  %6323 = vmatprep.mubr.msk.bf16.mxu1 %vm1299_vm2, %v7854_v54  ;;  %v2930_v47 = vld [vmem:[#allocation2 + $0x74] sm:$0xff] }
 0x22d   : > { %6393 = vmatprep.subr.bf16.mxu1 %v7852_v56  ;;  %v2960_v9 = vpack.c.bf16 %v2931_v49, %v2930_v47 }
 0x233   : > { %6324 = vmatmul.mubr.msk.bf16.gmra.mrb[16].mxu1 %vm1299_vm2, %v2957_v34 }
 0x234   : > { %6327 = vmatprep.mubr.msk.bf16.mxu1 %vm1299_vm2, %v2958_v55 }
 0x23b   : > { %6328 = vmatmul.mubr.msk.bf16.gmra.mrb[20].mxu1 %vm1299_vm2, %v2959_v25 }
 0x23c   : > { %6331 = vmatprep.mubr.msk.bf16.mxu1 %vm1299_vm2, %v2960_v9 }
 0x243   : > { %6332 = vmatmul.mubr.msk.bf16.gmra.mrb[24].mxu1 %vm1299_vm2, %v2961_v10 }
 0x244   : > { %6335 = vmatprep.mubr.msk.bf16.mxu1 %vm1299_vm2, %v2962_v52 }
 0x24b   : > { %6336 = vmatmul.mubr.msk.bf16.gmra.mrb[28].mxu1 %vm1299_vm2, %v2963_v46 }
 0x24c   : > { %6339 = vmatprep.mubr.msk.bf16.mxu1 %vm1299_vm2, %v2964_v2 }
 0x253   : > { %6340 = vmatmul.mubr.msk.bf16.gmra.mrb[32].mxu1 %vm1299_vm2, %v2965_v18 }
 0x254   : > { %6343 = vmatprep.mubr.msk.bf16.mxu1 %vm1299_vm2, %v2966_v36 }
 0x25b   : > { %6344 = vmatmul.mubr.msk.bf16.gmra.mrb[0].mxu1 %vm1299_vm2, %v2967_v60 }
 0x25c   : > { %6347 = vmatprep.mubr.msk.bf16.mxu1 %vm1299_vm2, %v2968_v45 }
 0x263   : > { %6348 = vmatmul.mubr.msk.bf16.gmra.mrb[4].mxu1 %vm1299_vm2, %v2969_v58 }
 0x264   : > { %6351 = vmatprep.mubr.msk.bf16.mxu1 %vm1299_vm2, %v2970_v33 }
 0x26b   : > { %6352 = vmatmul.mubr.msk.bf16.gmra.mrb[8].mxu1 %vm1299_vm2, %v2971_v38 }
 0x26c   : > { %6357 = vmatprep.mubr.msk.bf16.mxu1 %vm1299_vm2, %v7847_v35  ;;  %v3282_v35 = vld [vmem:[#allocation2 + $0x134] sm:$0xff] }
 0x273   : > { %6358 = vmatmul.mubr.msk.bf16.vlgmr.msra.gmra.mrb[12].mxu1 %vm1299_vm2, %v7854_v54  ;;  %v3578_v54 = vld [vmem:[#allocation2 + $0x25] sm:$0xff] }
 0x274   : > { %6394 = vmatpush3.bf16.msra.mxu1 %v7852_v56  ;;  %6361 = vmatprep.mubr.msk.bf16.mxu1 %vm1299_vm2, %v2957_v34  ;;  %v3301_v56 = vpack.c.bf16 %v3283_v7, %v3282_v35  ;;  %v3614_v24 = vpack.c.bf16 %v3579_v21, %v3578_v54  ;;  %v3599_v7 = vld [vmem:[#allocation2 + $0xcd] sm:$0xff]  ;;  %v3596_v35 = vld [vmem:[#allocation2 + $0xb5] sm:$0xff] }
 0x275   : > { %6431 = vmatprep.subr.bf16.mxu1 %v6863_v39 }
 0x27b   : > { %6362 = vmatmul.mubr.msk.bf16.gmra.mrb[16].mxu1 %vm1299_vm2, %v2958_v55 }
 0x27c   : > { %6365 = vmatprep.mubr.msk.bf16.mxu1 %vm1299_vm2, %v2959_v25  ;;  %v3582_v25 = vld [vmem:[#allocation2 + $0x45] sm:$0xff] }
 0x27d   : > { %v3616_v47 = vpack.c.bf16 %v3583_v26, %v3582_v25  ;;  %v3603_v25 = vld [vmem:[#allocation2 + $0xed] sm:$0xff] }
 0x283   : > { %6366 = vmatmul.mubr.msk.bf16.gmra.mrb[20].mxu1 %vm1299_vm2, %v2960_v9 }
 0x284   : > { %6369 = vmatprep.mubr.msk.bf16.mxu1 %vm1299_vm2, %v2961_v10 }
 0x28b   : > { %6370 = vmatmul.mubr.msk.bf16.gmra.mrb[24].mxu1 %vm1299_vm2, %v2962_v52 }
 0x28c   : > { %6373 = vmatprep.mubr.msk.bf16.mxu1 %vm1299_vm2, %v2963_v46  ;;  %v6864_v46 = vld [vmem:[%s8618_s5] sm:$0xff]  }
 0x28d   : > { %6469 = vmatprep.subr.bf16.mxu0 %v6864_v46 }
 0x28e   : > { %6470 = vmatpush3.bf16.msra.mxu0 %v6864_v46  ;;  %v3607_v46 = vld [vmem:[#allocation2 + $0x10d] sm:$0xff] }
 0x28f   : > { %6471 = vmatprep.subr.bf16.mxu0 %v6865_v14  ;;  %v3628_v57 = vpack.c.bf16 %v3607_v46, %v3606_v13  ;;  %v3916_v46 = vld [vmem:[#allocation2 + $0x66] sm:$0xff]  ;;  %v3921_v13 = vld [vmem:[#allocation2 + $0x8e] sm:$0xff] }
 0x292   : > { %6472 = vmatpush3.bf16.msra.mxu0 %v6865_v14  ;;  %v3604_v14 = vld [vmem:[#allocation2 + $0xf5] sm:$0xff] }
 0x293   : > { %6374 = vmatmul.mubr.msk.bf16.gmra.mrb[28].mxu1 %vm1299_vm2, %v2964_v2 }
 0x294   : > { %6377 = vmatprep.mubr.msk.bf16.mxu1 %vm1299_vm2, %v2965_v18 }
 0x29b   : > { %6378 = vmatmul.mubr.msk.bf16.gmra.mrb[32].mxu1 %vm1299_vm2, %v2966_v36 }
 0x29c   : > { %6381 = vmatprep.mubr.msk.bf16.mxu1 %vm1299_vm2, %v2967_v60 }
 0x29d   : > { %v7896_v19 = vpop.f32.mrb[108].mxu0 }
 0x29e   : > { %v7898_v22 = vpop.f32.mrb[109].mxu0 }
 0x29f   : > { %v7900_v30 = vpop.f32.mrb[110].mxu0 }
 0x2a0   : > { %v7902_v5 = vpop.f32.mrb[111].mxu0 }
 0x2a3   : > { %6382 = vmatmul.mubr.msk.bf16.gmra.mrb[0].mxu1 %vm1299_vm2, %v2968_v45 }
 0x2a4   : > { %6385 = vmatprep.mubr.msk.bf16.mxu1 %vm1299_vm2, %v2969_v58 }
 0x2a5   : > { %v7906_v43 = vpop.f32.mrb[112].mxu0 }
 0x2a6   : > { %v7908_v42 = vpop.f32.mrb[113].mxu0 }
 0x2a7   : > { %v7910_v40 = vpop.f32.mrb[114].mxu0 }
 0x2a8   : > { %v7912_v51 = vpop.f32.mrb[115].mxu0 }
 0x2ab   : > { %6386 = vmatmul.mubr.msk.bf16.gmra.mrb[4].mxu1 %vm1299_vm2, %v2970_v33  ;;  %v3594_v33 = vld [vmem:[#allocation2 + $0xa5] sm:$0xff] }
 0x2ac   : > { %6389 = vmatprep.mubr.msk.bf16.mxu1 %vm1299_vm2, %v2971_v38  ;;  %v3622_v48 = vpack.c.bf16 %v3595_v32, %v3594_v33  ;;  %v3597_v38 = vld [vmem:[#allocation2 + $0xbd] sm:$0xff]  ;;  %v3610_v32 = vld [vmem:[#allocation2 + $0x125] sm:$0xff]  ;;  %v3909_v33 = vld [vmem:[#allocation2 + $0x2e] sm:$0xff] }
 0x2ad   : > { %v7916_v17 = vpop.f32.mrb[116].mxu0  ;;  %v3623_v54 = vpack.c.bf16 %v3597_v38, %v3596_v35  ;;  %v3630_v61 = vpack.c.bf16 %v3611_v53, %v3610_v32  ;;  %v3920_v53 = vld [vmem:[#allocation2 + $0x86] sm:$0xff]  ;;  %v3925_v32 = vld [vmem:[#allocation2 + $0xae] sm:$0xff] }
 0x2ae   : > { %v7918_v20 = vpop.f32.mrb[117].mxu0 }
 0x2af   : > { %v7920_v23 = vpop.f32.mrb[118].mxu0 }
 0x2b0   : > { %v7922_v28 = vpop.f32.mrb[119].mxu0 }
 0x2b3   : > { %6390 = vmatmul.mubr.msk.bf16.gmra.mrb[8].mxu1 %vm1299_vm2, %v3301_v56 }
 0x2b4   : > { %6395 = vmatprep.mubr.msk.bf16.mxu1 %vm1299_vm2, %v3614_v24  ;;  %v3598_v24 = vld [vmem:[#allocation2 + $0xc5] sm:$0xff] }
 0x2b5   : > { %v7926_v63 = vpop.f32.mrb[84].mxu0  ;;  %v3624_v27 = vpack.c.bf16 %v3599_v7, %v3598_v24  ;;  %v3908_v7 = vld [vmem:[#allocation2 + $0x26] sm:$0xff]  ;;  %v3913_v24 = vld [vmem:[#allocation2 + $0x4e] sm:$0xff] }
 0x2b6   : > { %v7928_v34 = vpop.f32.mrb[85].mxu0  ;;  %v3944_v35 = vpack.c.bf16 %v3909_v33, %v3908_v7  ;;  %v3924_v33 = vld [vmem:[#allocation2 + $0xa6] sm:$0xff]  ;;  %v3929_v7 = vld [vmem:[#allocation2 + $0xce] sm:$0xff] }
 0x2b7   : > { %v7930_v55 = vpop.f32.mrb[86].mxu0 }
 0x2b8   : > { %v7932_v49 = vpop.f32.mrb[87].mxu0 }
 0x2bb   : > { %6396 = vmatmul.mubr.msk.bf16.vlgmr.msra.gmra.mrb[12].mxu1 %vm1299_vm2, %v3615_v44 }
 0x2bc   : > { %6432 = vmatpush3.bf16.msra.mxu1 %v6863_v39  ;;  %6399 = vmatprep.mubr.msk.bf16.mxu1 %vm1299_vm2, %v3616_v47 }
 0x2bd   : > { %v7936_v9 = vpop.f32.mrb[88].mxu0 }
 0x2be   : > { %v7938_v6 = vpop.f32.mrb[89].mxu0 }
 0x2bf   : > { %v7940_v10 = vpop.f32.mrb[90].mxu0 }
 0x2c0   : > { %v7942_v52 = vpop.f32.mrb[91].mxu0 }
 0x2c3   : > { %6400 = vmatmul.mubr.msk.bf16.gmra.mrb[16].mxu1 %vm1299_vm2, %v3617_v0  ;;  %v3602_v0 = vld [vmem:[#allocation2 + $0xe5] sm:$0xff] }
 0x2c4   : > { %6403 = vmatprep.mubr.msk.bf16.mxu1 %vm1299_vm2, %v3618_v15  ;;  %v3626_v29 = vpack.c.bf16 %v3603_v25, %v3602_v0  ;;  %v3605_v15 = vld [vmem:[#allocation2 + $0xfd] sm:$0xff]  ;;  %v3912_v25 = vld [vmem:[#allocation2 + $0x46] sm:$0xff]  ;;  %v3917_v0 = vld [vmem:[#allocation2 + $0x6e] sm:$0xff] }
 0x2c5   : > { %v7952_v2 = vpop.f32.mrb[92].mxu0  ;;  %v3627_v3 = vpack.c.bf16 %v3605_v15, %v3604_v14  ;;  %v3946_v59 = vpack.c.bf16 %v3913_v24, %v3912_v25  ;;  %v3948_v14 = vpack.c.bf16 %v3917_v0, %v3916_v46  ;;  %v3928_v24 = vld [vmem:[#allocation2 + $0xc6] sm:$0xff]  ;;  %v3933_v25 = vld [vmem:[#allocation2 + $0xee] sm:$0xff] }
 0x2c6   : > { %v7954_v16 = vpop.f32.mrb[93].mxu0  ;;  %v3932_v0 = vld [vmem:[#allocation2 + $0xe6] sm:$0xff]  ;;  %v3937_v46 = vld [vmem:[#allocation2 + $0x10e] sm:$0xff] }
 0x2c7   : > { %v7956_v18 = vpop.f32.mrb[94].mxu0 }
 0x2c8   : > { %v7958_v36 = vpop.f32.mrb[95].mxu0 }
 0x2cb   : > { %6404 = vmatmul.mubr.msk.bf16.gmra.mrb[20].mxu1 %vm1299_vm2, %v3619_v4  ;;  %v3609_v4 = vld [vmem:[#allocation2 + $0x11d] sm:$0xff] }
 0x2cc   : > { %6407 = vmatprep.mubr.msk.bf16.mxu1 %vm1299_vm2, %v3620_v31  ;;  %v3608_v31 = vld [vmem:[#allocation2 + $0x115] sm:$0xff] }
 0x2cd   : > { %v7962_v60 = vpop.f32.mrb[96].mxu0  ;;  %v3629_v50 = vpack.c.bf16 %v3609_v4, %v3608_v31  ;;  %v3950_v31 = vpack.c.bf16 %v3921_v13, %v3920_v53  ;;  %v3936_v13 = vld [vmem:[#allocation2 + $0x106] sm:$0xff]  ;;  %v3941_v53 = vld [vmem:[#allocation2 + $0x12e] sm:$0xff] }
 0x2ce   : > { %v7964_v45 = vpop.f32.mrb[97].mxu0 }
 0x2cf   : > { %v7966_v8 = vpop.f32.mrb[98].mxu0 }
 0x2d0   : > { %v7968_v58 = vpop.f32.mrb[99].mxu0 }
 0x2d3   : > { %6408 = vmatmul.mubr.msk.bf16.gmra.mrb[24].mxu1 %vm1299_vm2, %v3621_v37  ;;  %v3613_v37 = vld [vmem:[#allocation2 + $0x13d] sm:$0xff] }
 0x2d4   : > { %6411 = vmatprep.mubr.msk.bf16.mxu1 %vm1299_vm2, %v3622_v48  ;;  %v3612_v48 = vld [vmem:[#allocation2 + $0x135] sm:$0xff] }
 0x2d5   : > { %v7972_v12 = vpop.f32.mrb[100].mxu0  ;;  %v3631_v38 = vpack.c.bf16 %v3613_v37, %v3612_v48  ;;  %v3952_v48 = vpack.c.bf16 %v3925_v32, %v3924_v33  ;;  %v3940_v32 = vld [vmem:[#allocation2 + $0x126] sm:$0xff]  ;;  %v3942_v33 = vld [vmem:[#allocation2 + $0x136] sm:$0xff] }
 0x2d6   : > { %v7974_v39 = vpop.f32.mrb[101].mxu0 }
 0x2d7   : > { %v7976_v21 = vpop.f32.mrb[102].mxu0 }
 0x2d8   : > { %v7978_v56 = vpop.f32.mrb[103].mxu0 }
 0x2db   : > { %6412 = vmatmul.mubr.msk.bf16.gmra.mrb[28].mxu1 %vm1299_vm2, %v3623_v54  ;;  %v3911_v54 = vld [vmem:[#allocation2 + $0x3e] sm:$0xff] }
 0x2dc   : > { %6415 = vmatprep.mubr.msk.bf16.mxu1 %vm1299_vm2, %v3624_v27  ;;  %v3910_v27 = vld [vmem:[#allocation2 + $0x36] sm:$0xff] }
 0x2dd   : > { %v7982_v26 = vpop.f32.mrb[104].mxu0  ;;  %v3945_v11 = vpack.c.bf16 %v3911_v54, %v3910_v27  ;;  %v3954_v27 = vpack.c.bf16 %v3929_v7, %v3928_v24  ;;  %v8018_v7 = vld [vmem:[%s8617_s4] ss:$0 sm:$0xff] }
 0x2de   : > { %v7984_v44 = vpop.f32.mrb[105].mxu0 }
 0x2df   : > { %v7986_v47 = vpop.f32.mrb[106].mxu0 }
 0x2e0   : > { %v7988_v62 = vpop.f32.mrb[107].mxu0 }
 0x2e3   : > { %6416 = vmatmul.mubr.msk.bf16.gmra.mrb[32].mxu1 %vm1299_vm2, %v3625_v41  ;;  %v3915_v41 = vld [vmem:[#allocation2 + $0x5e] sm:$0xff] }
 0x2e4   : > { %6419 = vmatprep.mubr.msk.bf16.mxu1 %vm1299_vm2, %v3626_v29  ;;  %v3914_v29 = vld [vmem:[#allocation2 + $0x56] sm:$0xff] }
 0x2e5   : > { %v3947_v15 = vpack.c.bf16 %v3915_v41, %v3914_v29  ;;  %v3956_v29 = vpack.c.bf16 %v3933_v25, %v3932_v0 }
 0x2eb   : > { %6420 = vmatmul.mubr.msk.bf16.gmra.mrb[0].mxu1 %vm1299_vm2, %v3627_v3  ;;  %v3919_v3 = vld [vmem:[#allocation2 + $0x7e] sm:$0xff] }
 0x2ec   : > { %6423 = vmatprep.mubr.msk.bf16.mxu1 %vm1299_vm2, %v3628_v57  ;;  %v3918_v57 = vld [vmem:[#allocation2 + $0x76] sm:$0xff] }
 0x2ed   : > { %v3949_v4 = vpack.c.bf16 %v3919_v3, %v3918_v57  ;;  %v3958_v57 = vpack.c.bf16 %v3937_v46, %v3936_v13 }
 0x2f3   : > { %6424 = vmatmul.mubr.msk.bf16.gmra.mrb[4].mxu1 %vm1299_vm2, %v3629_v50  ;;  %v3923_v50 = vld [vmem:[#allocation2 + $0x9e] sm:$0xff] }
 0x2f4   : > { %6427 = vmatprep.mubr.msk.bf16.mxu1 %vm1299_vm2, %v3630_v61  ;;  %v3922_v61 = vld [vmem:[#allocation2 + $0x96] sm:$0xff] }
 0x2f5   : > { %v3951_v37 = vpack.c.bf16 %v3923_v50, %v3922_v61  ;;  %v3960_v61 = vpack.c.bf16 %v3941_v53, %v3940_v32 }
 0x2fb   : > { %6428 = vmatmul.mubr.msk.bf16.gmra.mrb[8].mxu1 %vm1299_vm2, %v3631_v38  ;;  %v3927_v38 = vld [vmem:[#allocation2 + $0xbe] sm:$0xff] }
 0x2fc   : > { %6433 = vmatprep.mubr.msk.bf16.mxu1 %vm1299_vm2, %v3944_v35  ;;  %v3926_v35 = vld [vmem:[#allocation2 + $0xb6] sm:$0xff] }
 0x2fd   : > { %v3953_v54 = vpack.c.bf16 %v3927_v38, %v3926_v35 }
 0x303   : > { %6434 = vmatmul.mubr.msk.bf16.vlgmr.msra.gmra.mrb[12].mxu1 %vm1299_vm2, %v3945_v11  ;;  %v3931_v11 = vld [vmem:[#allocation2 + $0xde] sm:$0xff] }
 0x304   : > { %6437 = vmatprep.mubr.msk.bf16.mxu1 %vm1299_vm2, %v3946_v59  ;;  %v3930_v59 = vld [vmem:[#allocation2 + $0xd6] sm:$0xff] }
 0x305   : > { %v3955_v41 = vpack.c.bf16 %v3931_v11, %v3930_v59 }
 0x30b   : > { %6438 = vmatmul.mubr.msk.bf16.gmra.mrb[16].mxu1 %vm1299_vm2, %v3947_v15  ;;  %v3935_v15 = vld [vmem:[#allocation2 + $0xfe] sm:$0xff] }
 0x30c   : > { %6441 = vmatprep.mubr.msk.bf16.mxu1 %vm1299_vm2, %v3948_v14  ;;  %v3934_v14 = vld [vmem:[#allocation2 + $0xf6] sm:$0xff] }
 0x30d   : > { %v3957_v3 = vpack.c.bf16 %v3935_v15, %v3934_v14 }
 0x313   : > { %6442 = vmatmul.mubr.msk.bf16.gmra.mrb[20].mxu1 %vm1299_vm2, %v3949_v4  ;;  %v3939_v4 = vld [vmem:[#allocation2 + $0x11e] sm:$0xff] }
 0x314   : > { %6445 = vmatprep.mubr.msk.bf16.mxu1 %vm1299_vm2, %v3950_v31  ;;  %v3938_v31 = vld [vmem:[#allocation2 + $0x116] sm:$0xff] }
 0x315   : > { %v3959_v50 = vpack.c.bf16 %v3939_v4, %v3938_v31 }
 0x31b   : > { %6446 = vmatmul.mubr.msk.bf16.gmra.mrb[24].mxu1 %vm1299_vm2, %v3951_v37  ;;  %v3943_v37 = vld [vmem:[#allocation2 + $0x13e] sm:$0xff] }
 0x31c   : > { %6449 = vmatprep.mubr.msk.bf16.mxu1 %vm1299_vm2, %v3952_v48  ;;  %v3961_v48 = vpack.c.bf16 %v3943_v37, %v3942_v33 }
 0x323   : > { %6450 = vmatmul.mubr.msk.bf16.gmra.mrb[28].mxu1 %vm1299_vm2, %v3953_v54 }
 0x324   : > { %6453 = vmatprep.mubr.msk.bf16.mxu1 %vm1299_vm2, %v3954_v27 }
 0x32b   : > { %6454 = vmatmul.mubr.msk.bf16.gmra.mrb[32].mxu1 %vm1299_vm2, %v3955_v41 }
 0x32c   : > { %6457 = vmatprep.mubr.msk.bf16.mxu1 %vm1299_vm2, %v3956_v29 }
 0x333   : > { %6458 = vmatmul.mubr.msk.bf16.gmra.mrb[0].mxu1 %vm1299_vm2, %v3957_v3 }
 0x334   : > { %6461 = vmatprep.mubr.msk.bf16.mxu1 %vm1299_vm2, %v3958_v57 }
 0x33b   : > { %6462 = vmatmul.mubr.msk.bf16.gmra.mrb[4].mxu1 %vm1299_vm2, %v3959_v50 }
 0x33c   : > { %6465 = vmatprep.mubr.msk.bf16.mxu1 %vm1299_vm2, %v3960_v61 }
 0x343   : > { %6466 = vmatmul.mubr.msk.bf16.gmra.mrb[8].mxu1 %vm1299_vm2, %v3961_v48 }
 0x3d6   : > { %v6435_v38 = vpop.f32.mrb[12].mxu1 }
 0x3d7   : > { %v6547_v35 = vadd.f32 %v6435_v38, %v7926_v63  ;;  %v4059_v54 = vpop.f32.mrb[13].mxu1 }
 0x3d8   : > { %v6548_v24 = vadd.f32 %v4059_v54, %v7928_v34  ;;  %v6436_v27 = vpop.f32.mrb[14].mxu1 }
 0x3d9   : > { %v4247_v11 = vadd.f32 %v6547_v35, %v8018_v7  ;;  %v6549_v25 = vadd.f32 %v6436_v27, %v7930_v55  ;;  %v4062_v59 = vpop.f32.mrb[15].mxu1 }
 0x3da   : > { %v4245_v41 = vadd.f32 %v6548_v24, %v8018_v7  ;;  %v6550_v0 = vadd.f32 %v4062_v59, %v7932_v49 }
 0x3db   : > { %v4248_v29 = vadd.f32 %v6549_v25, %v8018_v7  ;;  %v4283_v46 = vmax.f32 %v4247_v11, 0.0 }
 0x3dc   : > { %v4246_v15 = vadd.f32 %v6550_v0, %v8018_v7  ;;  %v4281_v63 = vmax.f32 %v4245_v41, 0.0 }
 0x3dd   : > { %v4284_v14 = vmax.f32 %v4248_v29, 0.0 }
 0x3de   : > { %v4282_v3 = vmax.f32 %v4246_v15, 0.0  ;;  %v6439_v13 = vpop.f32.mrb[16].mxu1 }
 0x3df   : > { %v4318_v34 = vpack.c.bf16 %v4284_v14, %v4283_v46  ;;  %v6551_v57 = vadd.f32 %v6439_v13, %v7936_v9  ;;  %v4075_v4 = vpop.f32.mrb[17].mxu1 }
 0x3e0   : > { %v4317_v55 = vpack.c.bf16 %v4282_v3, %v4281_v63  ;;  %v6552_v53 = vadd.f32 %v4075_v4, %v7938_v6  ;;  %v6440_v31 = vpop.f32.mrb[18].mxu1 }
 0x3e1   : > { %v4251_v49 = vadd.f32 %v6551_v57, %v8018_v7  ;;  %v6553_v50 = vadd.f32 %v6440_v31, %v7940_v10  ;;  %v4078_v32 = vpop.f32.mrb[19].mxu1 }
 0x3e2   : > { %v4249_v61 = vadd.f32 %v6552_v53, %v8018_v7  ;;  %v6554_v37 = vadd.f32 %v4078_v32, %v7942_v52  ;;  %6473 = vmatprep.mubr.msk.bf16.mxu0 %vm4358_vm3, %v4317_v55 }
 0x3e3   : > { %v4252_v33 = vadd.f32 %v6553_v50, %v8018_v7  ;;  %6474 = vmatmul.mubr.msk.bf16.vlgmr.msra.gmra.mrb[120].mxu0 %vm4358_vm3, %v4318_v34  ;;  %v4287_v48 = vmax.f32 %v4251_v49, 0.0 }
 0x3e4   : > { %v4250_v9 = vadd.f32 %v6554_v37, %v8018_v7  ;;  %v4285_v38 = vmax.f32 %v4249_v61, 0.0 }
 0x3e5   : > { %v4288_v6 = vmax.f32 %v4252_v33, 0.0 }
 0x3e6   : > { %v4286_v35 = vmax.f32 %v4250_v9, 0.0  ;;  %v6443_v54 = vpop.f32.mrb[20].mxu1 }
 0x3e7   : > { %v4320_v24 = vpack.c.bf16 %v4288_v6, %v4287_v48  ;;  %v6555_v10 = vadd.f32 %v6443_v54, %v7952_v2  ;;  %v4091_v27 = vpop.f32.mrb[21].mxu1 }
 0x3e8   : > { %v4319_v11 = vpack.c.bf16 %v4286_v35, %v4285_v38  ;;  %v6556_v52 = vadd.f32 %v4091_v27, %v7954_v16  ;;  %v6444_v25 = vpop.f32.mrb[22].mxu1 }
 0x3e9   : > { %v4255_v59 = vadd.f32 %v6555_v10, %v8018_v7  ;;  %v6557_v41 = vadd.f32 %v6444_v25, %v7956_v18  ;;  %v4094_v0 = vpop.f32.mrb[23].mxu1 }
 0x3ea   : > { %v4253_v29 = vadd.f32 %v6556_v52, %v8018_v7  ;;  %v6558_v15 = vadd.f32 %v4094_v0, %v7958_v36  ;;  %6477 = vmatprep.mubr.msk.bf16.mxu0 %vm4358_vm3, %v4319_v11 }
 0x3eb   : > { %v4256_v46 = vadd.f32 %v6557_v41, %v8018_v7  ;;  %6478 = vmatmul.mubr.msk.bf16.gmra.mrb[124].mxu0 %vm4358_vm3, %v4320_v24  ;;  %v4291_v14 = vmax.f32 %v4255_v59, 0.0 }
 0x3ec   : > { %v4254_v2 = vadd.f32 %v6558_v15, %v8018_v7  ;;  %v4289_v63 = vmax.f32 %v4253_v29, 0.0 }
 0x3ed   : > { %v4292_v16 = vmax.f32 %v4256_v46, 0.0 }
 0x3ee   : > { %v4290_v3 = vmax.f32 %v4254_v2, 0.0  ;;  %v6447_v13 = vpop.f32.mrb[24].mxu1 }
 0x3ef   : > { %v4322_v34 = vpack.c.bf16 %v4292_v16, %v4291_v14  ;;  %v6559_v18 = vadd.f32 %v6447_v13, %v7962_v60  ;;  %v4107_v57 = vpop.f32.mrb[25].mxu1 }
 0x3f0   : > { %v4321_v4 = vpack.c.bf16 %v4290_v3, %v4289_v63  ;;  %v6560_v36 = vadd.f32 %v4107_v57, %v7964_v45  ;;  %v6448_v55 = vpop.f32.mrb[26].mxu1 }
 0x3f1   : > { %v4259_v53 = vadd.f32 %v6559_v18, %v8018_v7  ;;  %v6561_v31 = vadd.f32 %v6448_v55, %v7966_v8  ;;  %v4110_v49 = vpop.f32.mrb[27].mxu1 }
 0x3f2   : > { %v4257_v50 = vadd.f32 %v6560_v36, %v8018_v7  ;;  %v6562_v32 = vadd.f32 %v4110_v49, %v7968_v58  ;;  %6481 = vmatprep.mubr.msk.bf16.mxu0 %vm4358_vm3, %v4321_v4 }
 0x3f3   : > { %v4260_v61 = vadd.f32 %v6561_v31, %v8018_v7  ;;  %6482 = vmatmul.mubr.msk.bf16.gmra.mrb[128].mxu0 %vm4358_vm3, %v4322_v34  ;;  %v4295_v37 = vmax.f32 %v4259_v53, 0.0 }
 0x3f4   : > { %v4258_v60 = vadd.f32 %v6562_v32, %v8018_v7  ;;  %v4293_v33 = vmax.f32 %v4257_v50, 0.0 }
 0x3f5   : > { %v4296_v45 = vmax.f32 %v4260_v61, 0.0 }
 0x3f6   : > { %v4294_v9 = vmax.f32 %v4258_v60, 0.0  ;;  %v6451_v48 = vpop.f32.mrb[28].mxu1 }
 0x3f7   : > { %v4324_v6 = vpack.c.bf16 %v4296_v45, %v4295_v37  ;;  %v6563_v8 = vadd.f32 %v6451_v48, %v7972_v12  ;;  %v4123_v38 = vpop.f32.mrb[29].mxu1 }
 0x3f8   : > { %v4323_v35 = vpack.c.bf16 %v4294_v9, %v4293_v33  ;;  %v6564_v58 = vadd.f32 %v4123_v38, %v7974_v39  ;;  %v6452_v54 = vpop.f32.mrb[30].mxu1 }
 0x3f9   : > { %v4263_v24 = vadd.f32 %v6563_v8, %v8018_v7  ;;  %v6565_v10 = vadd.f32 %v6452_v54, %v7976_v21  ;;  %v4126_v27 = vpop.f32.mrb[31].mxu1 }
 0x3fa   : > { %v4261_v11 = vadd.f32 %v6564_v58, %v8018_v7  ;;  %v6566_v52 = vadd.f32 %v4126_v27, %v7978_v56  ;;  %6485 = vmatprep.mubr.msk.bf16.mxu0 %vm4358_vm3, %v4323_v35 }
 0x3fb   : > { %v4264_v25 = vadd.f32 %v6565_v10, %v8018_v7  ;;  %6486 = vmatmul.mubr.msk.bf16.gmra.mrb[132].mxu0 %vm4358_vm3, %v4324_v6  ;;  %v4299_v59 = vmax.f32 %v4263_v24, 0.0 }
 0x3fc   : > { %v4262_v12 = vadd.f32 %v6566_v52, %v8018_v7  ;;  %v4297_v41 = vmax.f32 %v4261_v11, 0.0 }
 0x3fd   : > { %v4300_v39 = vmax.f32 %v4264_v25, 0.0 }
 0x3fe   : > { %v4298_v0 = vmax.f32 %v4262_v12, 0.0  ;;  %v6455_v29 = vpop.f32.mrb[32].mxu1 }
 0x3ff   : > { %v4326_v15 = vpack.c.bf16 %v4300_v39, %v4299_v59  ;;  %v6567_v21 = vadd.f32 %v6455_v29, %v7982_v26  ;;  %v4139_v46 = vpop.f32.mrb[33].mxu1 }
 0x400   : > { %v4325_v2 = vpack.c.bf16 %v4298_v0, %v4297_v41  ;;  %v6568_v56 = vadd.f32 %v4139_v46, %v7984_v44  ;;  %v6456_v14 = vpop.f32.mrb[34].mxu1 }
 0x401   : > { %v4267_v16 = vadd.f32 %v6567_v21, %v8018_v7  ;;  %v6569_v63 = vadd.f32 %v6456_v14, %v7986_v47  ;;  %v4142_v3 = vpop.f32.mrb[35].mxu1 }
 0x402   : > { %v4265_v13 = vadd.f32 %v6568_v56, %v8018_v7  ;;  %v6570_v34 = vadd.f32 %v4142_v3, %v7988_v62  ;;  %6489 = vmatprep.mubr.msk.bf16.mxu0 %vm4358_vm3, %v4325_v2 }
 0x403   : > { %v4268_v18 = vadd.f32 %v6569_v63, %v8018_v7  ;;  %6490 = vmatmul.mubr.msk.bf16.gmra.mrb[136].mxu0 %vm4358_vm3, %v4326_v15  ;;  %v4303_v57 = vmax.f32 %v4267_v16, 0.0 }
 0x404   : > { %v4266_v26 = vadd.f32 %v6570_v34, %v8018_v7  ;;  %v4301_v4 = vmax.f32 %v4265_v13, 0.0 }
 0x405   : > { %v4304_v44 = vmax.f32 %v4268_v18, 0.0 }
 0x406   : > { %v4302_v36 = vmax.f32 %v4266_v26, 0.0  ;;  %v6459_v55 = vpop.f32.mrb[0].mxu1 }
 0x407   : > { %v4328_v53 = vpack.c.bf16 %v4304_v44, %v4303_v57  ;;  %v6571_v47 = vadd.f32 %v6459_v55, %v7896_v19  ;;  %v4155_v31 = vpop.f32.mrb[1].mxu1  ;;  %v4922_v44 = vld [vmem:[%s8620_s7 + $0x10] sm:$0xff]  ;;  %v4924_v55 = vld [vmem:[%s8620_s7 + $0x20] sm:$0xff] }
 0x408   : > { %v4327_v49 = vpack.c.bf16 %v4302_v36, %v4301_v4  ;;  %v6572_v62 = vadd.f32 %v4155_v31, %v7898_v22  ;;  %v6460_v50 = vpop.f32.mrb[2].mxu1  ;;  %v4923_v4 = vld [vmem:[%s8620_s7 + $0x18] sm:$0xff]  ;;  %v4926_v31 = vld [vmem:[%s8620_s7 + $0x30] sm:$0xff] }
 0x409   : > { %v4271_v32 = vadd.f32 %v6571_v47, %v8018_v7  ;;  %v6573_v61 = vadd.f32 %v6460_v50, %v7900_v30  ;;  %v4158_v60 = vpop.f32.mrb[3].mxu1  ;;  %v6537_v36 = vpack.c.bf16 %v4923_v4, %v4922_v44  ;;  %v4629_v50 = vpop.permute.xlu1 %4628 }
 0x40a   : > { %v4269_v37 = vadd.f32 %v6572_v62, %v8018_v7  ;;  %v6574_v45 = vadd.f32 %v4158_v60, %v7902_v5  ;;  %6493 = vmatprep.mubr.msk.bf16.mxu0 %vm4358_vm3, %v4327_v49  ;;  %v4927_v49 = vld [vmem:[%s8620_s7 + $0x38] sm:$0xff] }
 0x40b   : > { %v4272_v33 = vadd.f32 %v6573_v61, %v8018_v7  ;;  %6494 = vmatmul.mubr.msk.bf16.gmra.mrb[140].mxu0 %vm4358_vm3, %v4328_v53  ;;  %v4307_v9 = vmax.f32 %v4271_v32, 0.0  ;;  %v4925_v53 = vld [vmem:[%s8620_s7 + $0x28] sm:$0xff]  ;;  %v6543_v62 = vpack.c.bf16 %v4927_v49, %v4926_v31  ;;  %v4634_v32 = vpop.permute.xlu0 %4633 }
 0x40c   : > { %v4270_v19 = vadd.f32 %v6574_v45, %v8018_v7  ;;  %v4305_v48 = vmax.f32 %v4269_v37, 0.0  ;;  %v6540_v47 = vpack.c.bf16 %v4925_v53, %v4924_v55 }
 0x40d   : > { %v4308_v22 = vmax.f32 %v4272_v33, 0.0  ;;  %v4639_v61 = vpop.permute.xlu1 %4638 }
 0x40e   : > { %v4306_v6 = vmax.f32 %v4270_v19, 0.0  ;;  %v6463_v8 = vpop.f32.mrb[4].mxu1 }
 0x40f   : > { %v4330_v38 = vpack.c.bf16 %v4308_v22, %v4307_v9  ;;  %v6575_v30 = vadd.f32 %v6463_v8, %v7906_v43  ;;  %v4171_v35 = vpop.f32.mrb[5].mxu1  ;;  %v4644_v60 = vpop.permute.xlu0 %4643  ;;  %v8140_v8 = vld [vmem:[%s8619_s6] ss:$0 sm:$0xff] }
 0x410   : > { %v4329_v58 = vpack.c.bf16 %v4306_v6, %v4305_v48  ;;  %v6576_v5 = vadd.f32 %v4171_v35, %v7908_v42  ;;  %v6464_v54 = vpop.f32.mrb[6].mxu1 }
 0x411   : > { %v4275_v24 = vadd.f32 %v6575_v30, %v8018_v7  ;;  %v6577_v10 = vadd.f32 %v6464_v54, %v7910_v40  ;;  %v4174_v27 = vpop.f32.mrb[7].mxu1  ;;  %v4649_v37 = vpop.permute.xlu1 %4648 }
 0x412   : > { %v4273_v11 = vadd.f32 %v6576_v5, %v8018_v7  ;;  %v6578_v52 = vadd.f32 %v4174_v27, %v7912_v51  ;;  %6497 = vmatprep.mubr.msk.bf16.mxu0 %vm4358_vm3, %v4329_v58 }
 0x413   : > { %v4276_v25 = vadd.f32 %v6577_v10, %v8018_v7  ;;  %6498 = vmatmul.mubr.msk.bf16.gmra.mrb[144].mxu0 %vm4358_vm3, %v4330_v38  ;;  %v4311_v12 = vmax.f32 %v4275_v24, 0.0  ;;  %v4654_v45 = vpop.permute.xlu0 %4653 }
 0x414   : > { %v4274_v43 = vadd.f32 %v6578_v52, %v8018_v7  ;;  %v4309_v59 = vmax.f32 %v4273_v11, 0.0 }
 0x415   : > { %v4312_v42 = vmax.f32 %v4276_v25, 0.0  ;;  %v4659_v33 = vpop.permute.xlu1 %4658 }
 0x416   : > { %v4310_v39 = vmax.f32 %v4274_v43, 0.0  ;;  %v6467_v41 = vpop.f32.mrb[8].mxu1 }
 0x417   : > { %v4332_v0 = vpack.c.bf16 %v4312_v42, %v4311_v12  ;;  %v6579_v40 = vadd.f32 %v6467_v41, %v7916_v17  ;;  %v4187_v29 = vpop.f32.mrb[9].mxu1  ;;  %v4664_v19 = vpop.permute.xlu0 %4663 }
 0x418   : > { %v4331_v15 = vpack.c.bf16 %v4310_v39, %v4309_v59  ;;  %v6580_v51 = vadd.f32 %v4187_v29, %v7918_v20  ;;  %v6468_v21 = vpop.f32.mrb[10].mxu1 }
 0x419   : > { %v4279_v46 = vadd.f32 %v6579_v40, %v8018_v7  ;;  %v6581_v2 = vadd.f32 %v6468_v21, %v7920_v23  ;;  %v4190_v56 = vpop.f32.mrb[11].mxu1  ;;  %v4920_v23 = vld [vmem:[%s8620_s7] sm:$0xff]  ;;  %v4669_v9 = vpop.permute.xlu1 %4668 }
 0x41a   : > { %v4277_v14 = vadd.f32 %v6580_v51, %v8018_v7  ;;  %v6582_v16 = vadd.f32 %v4190_v56, %v7922_v28  ;;  %6501 = vmatprep.mubr.msk.bf16.mxu0 %vm4358_vm3, %v4331_v15  ;;  %v4921_v28 = vld [vmem:[%s8620_s7 + $0x8] sm:$0xff] }
 0x41b   : > { %v4280_v63 = vadd.f32 %v6581_v2, %v8018_v7  ;;  %6502 = vmatmul.mubr.msk.bf16.gmra.mrb[148].mxu0 %vm4358_vm3, %v4332_v0  ;;  %v4315_v3 = vmax.f32 %v4279_v46, 0.0  ;;  %v6534_v57 = vpack.c.bf16 %v4921_v28, %v4920_v23  ;;  %v4674_v22 = vpop.permute.xlu0 %4673 }
 0x41c   : > { %v4278_v17 = vadd.f32 %v6582_v16, %v8018_v7  ;;  %v4313_v13 = vmax.f32 %v4277_v14, 0.0  ;;  %v6901_v7 = vmov 0.0|0.0  }
 0x41d   : > { %v4316_v20 = vmax.f32 %v4280_v63, 0.0  ;;  %6533 = vmatprep.subr.bf16.mxu0 %v6901_v7  ;;  %v4679_v48 = vpop.permute.xlu1 %4678 }
 0x41e   : > { %v4314_v34 = vmax.f32 %v4278_v17, 0.0  ;;  %6535 = vmatpush3.bf16.msra.mxu0 %v6534_v57 }
 0x41f   : > { %v4334_v18 = vpack.c.bf16 %v4316_v20, %v4315_v3  ;;  %6536 = vmatprep.subr.bf16.mxu0 %v6901_v7  ;;  %v4684_v6 = vpop.permute.xlu0 %4683 }
 0x420   : > { %v4333_v26 = vpack.c.bf16 %v4314_v34, %v4313_v13 }
 0x421   : > { %v8144_v54 = vpop.permute.xlu1 %4688 }
 0x422   : > { %6505 = vmatprep.mubr.msk.bf16.mxu0 %vm4358_vm3, %v4333_v26  ;;  %6538 = vmatpush3.bf16.msra.mxu0 %v6537_v36 }
 0x423   : > { %6506 = vmatmul.mubr.msk.bf16.gmra.mrb[152].mxu0 %vm4358_vm3, %v4334_v18  ;;  %6539 = vmatprep.subr.bf16.mxu0 %v6901_v7  ;;  %v8150_v52 = vpop.permute.xlu0 %4693 }
 0x424   : > { %6525 = vmatprep.mubr.msk.f32.mxu0 %vm6899_vm0, %v6898_v1 }
 0x425   : > { %v4699_v41 = vpop.permute.xlu1 %4698 }
 0x426   : > { %6541 = vmatpush3.bf16.msra.mxu0 %v6540_v47 }
 0x427   : > { %6542 = vmatprep.subr.bf16.mxu0 %v6901_v7  ;;  %v4704_v46 = vpop.permute.xlu0 %4703 }
 0x429   : > { %v4709_v18 = vpop.permute.xlu1 %4708 }
 0x42a   : > { %6544 = vmatpush3.bf16.msra.mxu0 %v6543_v62 }
 0x42b   : > { %6528 = vmatprep.subr.mxu0 %v6898_v1  ;;  %v4714_v57 = vpop.permute.xlu0 %4713 }
 0x4b6   : > { %v6475_v38 = vpop.f32.mrb[120].mxu0 }
 0x4b7   : > { %v4447_v30 = vpop.f32.mrb[121].mxu0  ;;  %v4456_v35 = vadd.f32 %v6475_v38, %v8140_v8  ;;  %v4724_v38 = vpop.permute.xlu0 %4723 }
 0x4b8   : > { %v4448_v58 = vadd.f32 %v8140_v8, %v4447_v30  ;;  %v6476_v5 = vpop.f32.mrb[122].mxu0 }
 0x4b9   : > { %v4450_v24 = vpop.f32.mrb[123].mxu0  ;;  %v4459_v27 = vadd.f32 %v6476_v5, %v8140_v8  ;;  %v8152_v25 = vmul.f32 %v4639_v61, %v4456_v35 }
 0x4ba   : > { %v8146_v10 = vmul.f32 %v4629_v50, %v4448_v58  ;;  %v4451_v11 = vadd.f32 %v8140_v8, %v4450_v24 }
 0x4bb   : > { %v8158_v42 = vmul.f32 %v4644_v60, %v4459_v27  ;;  %v4845_v29 = vsel %vm524_vm1, %v8152_v25, 0.0  ;;  %v4719_v60 = vpop.permute.xlu1 %4718 }
 0x4bc   : > { %v8154_v43 = vmul.f32 %v4634_v32, %v4451_v11  ;;  %v4842_v12 = vsel %vm524_vm1, %v8146_v10, 0.0 }
 0x4bd   : > { %v4847_v14 = vsel %vm524_vm1, %v8158_v42, 0.0 }
 0x4be   : > { %v4843_v59 = vsel %vm524_vm1, %v8154_v43, 0.0  ;;  %v6479_v39 = vpop.f32.mrb[124].mxu0 }
 0x4bf   : > { %v4844_v0 = vadd.f32 %v4843_v59, %v4842_v12  ;;  %v4463_v40 = vpop.f32.mrb[125].mxu0  ;;  %v4472_v15 = vadd.f32 %v6479_v39, %v8140_v8 }
 0x4c0   : > { %v4464_v51 = vadd.f32 %v8140_v8, %v4463_v40  ;;  %v6480_v21 = vpop.f32.mrb[126].mxu0 }
 0x4c1   : > { %v4846_v2 = vadd.f32 %v4845_v29, %v4844_v0  ;;  %v4466_v56 = vpop.f32.mrb[127].mxu0  ;;  %v4475_v63 = vadd.f32 %v6480_v21, %v8140_v8  ;;  %v8172_v20 = vmul.f32 %v4659_v33, %v4472_v15  ;;  %v4734_v15 = vpop.permute.xlu0 %4733 }
 0x4c2   : > { %v8168_v16 = vmul.f32 %v4649_v37, %v4464_v51  ;;  %v4467_v17 = vadd.f32 %v8140_v8, %v4466_v56 }
 0x4c3   : > { %v4848_v3 = vadd.f32 %v4847_v14, %v4846_v2  ;;  %v8178_v23 = vmul.f32 %v4664_v19, %v4475_v63  ;;  %v4853_v36 = vsel %vm524_vm1, %v8172_v20, 0.0 }
 0x4c4   : > { %v4849_v13 = vsel %vm524_vm1, %v8168_v16, 0.0  ;;  %v8176_v34 = vmul.f32 %v4654_v45, %v4467_v17 }
 0x4c5   : > { %v4850_v26 = vadd.f32 %v4849_v13, %v4848_v3  ;;  %v4855_v62 = vsel %vm524_vm1, %v8178_v23, 0.0 }
 0x4c6   : > { %v4851_v28 = vsel %vm524_vm1, %v8176_v34, 0.0  ;;  %v6483_v7 = vpop.f32.mrb[128].mxu0 }
 0x4c7   : > { %v4852_v44 = vadd.f32 %v4851_v28, %v4850_v26  ;;  %v4479_v4 = vpop.f32.mrb[129].mxu0  ;;  %v4488_v55 = vadd.f32 %v6483_v7, %v8140_v8 }
 0x4c8   : > { %v4480_v53 = vadd.f32 %v8140_v8, %v4479_v4  ;;  %v6484_v47 = vpop.f32.mrb[130].mxu0 }
 0x4c9   : > { %v4854_v31 = vadd.f32 %v4853_v36, %v4852_v44  ;;  %v4482_v49 = vpop.f32.mrb[131].mxu0  ;;  %v4491_v32 = vadd.f32 %v6484_v47, %v8140_v8  ;;  %v8192_v45 = vmul.f32 %v4679_v48, %v4488_v55 }
 0x4ca   : > { %v8188_v50 = vmul.f32 %v4669_v9, %v4480_v53  ;;  %v4483_v61 = vadd.f32 %v8140_v8, %v4482_v49 }
 0x4cb   : > { %v4856_v37 = vadd.f32 %v4855_v62, %v4854_v31  ;;  %v8198_v35 = vmul.f32 %v4684_v6, %v4491_v32  ;;  %v4861_v27 = vsel %vm524_vm1, %v8192_v45, 0.0 }
 0x4cc   : > { %v4857_v33 = vsel %vm524_vm1, %v8188_v50, 0.0  ;;  %v8196_v19 = vmul.f32 %v4674_v22, %v4483_v61  ;;  %v4729_v22 = vpop.permute.xlu1 %4728 }
 0x4cd   : > { %v4858_v30 = vadd.f32 %v4857_v33, %v4856_v37  ;;  %v4863_v6 = vsel %vm524_vm1, %v8198_v35, 0.0 }
 0x4ce   : > { %v4859_v9 = vsel %vm524_vm1, %v8196_v19, 0.0  ;;  %v6487_v58 = vpop.f32.mrb[132].mxu0 }
 0x4cf   : > { %v4860_v5 = vadd.f32 %v4859_v9, %v4858_v30  ;;  %v4495_v24 = vpop.f32.mrb[133].mxu0  ;;  %v4504_v48 = vadd.f32 %v6487_v58, %v8140_v8 }
 0x4d0   : > { %v4496_v11 = vadd.f32 %v8140_v8, %v4495_v24  ;;  %v6488_v12 = vpop.f32.mrb[134].mxu0  ;;  %v4739_v3 = vpop.permute.xlu1 %4738 }
 0x4d1   : > { %v4862_v59 = vadd.f32 %v4861_v27, %v4860_v5  ;;  %v4498_v39 = vpop.f32.mrb[135].mxu0  ;;  %v4507_v40 = vadd.f32 %v6488_v12, %v8140_v8  ;;  %v8213_v21 = vmul.f32 %v4699_v41, %v4504_v48 }
 0x4d2   : > { %v8209_v0 = vmul.f32 %v8144_v54, %v4496_v11  ;;  %v4499_v29 = vadd.f32 %v8140_v8, %v4498_v39 }
 0x4d3   : > { %v4864_v51 = vadd.f32 %v4863_v6, %v4862_v59  ;;  %v8220_v63 = vmul.f32 %v4704_v46, %v4507_v40  ;;  %v4869_v41 = vsel %vm524_vm1, %v8213_v21, 0.0 }
 0x4d4   : > { %v4865_v2 = vsel %vm524_vm1, %v8209_v0, 0.0  ;;  %v8218_v56 = vmul.f32 %v8150_v52, %v4499_v29  ;;  %v4744_v52 = vpop.permute.xlu0 %4743  ;;  %v4749_v61 = vpop.permute.xlu1 %4748 }
 0x4d5   : > { %v4866_v14 = vadd.f32 %v4865_v2, %v4864_v51  ;;  %v4871_v46 = vsel %vm524_vm1, %v8220_v63, 0.0 }
 0x4d6   : > { %v4867_v54 = vsel %vm524_vm1, %v8218_v56, 0.0  ;;  %v6491_v17 = vpop.f32.mrb[136].mxu0 }
 0x4d7   : > { %v4868_v13 = vadd.f32 %v4867_v54, %v4866_v14  ;;  %v4511_v26 = vpop.f32.mrb[137].mxu0  ;;  %v4520_v28 = vadd.f32 %v6491_v17, %v8140_v8 }
 0x4d8   : > { %v4512_v7 = vadd.f32 %v8140_v8, %v4511_v26  ;;  %v6492_v44 = vpop.f32.mrb[138].mxu0  ;;  %v4754_v9 = vpop.permute.xlu0 %4753 }
 0x4d9   : > { %v4870_v4 = vadd.f32 %v4869_v41, %v4868_v13  ;;  %v4514_v36 = vpop.f32.mrb[139].mxu0  ;;  %v4523_v53 = vadd.f32 %v6492_v44, %v8140_v8  ;;  %v8234_v49 = vmul.f32 %v4719_v60, %v4520_v28  ;;  %v4759_v6 = vpop.permute.xlu1 %4758 }
 0x4da   : > { %v8230_v55 = vmul.f32 %v4709_v18, %v4512_v7  ;;  %v4515_v47 = vadd.f32 %v8140_v8, %v4514_v36 }
 0x4db   : > { %v4872_v31 = vadd.f32 %v4871_v46, %v4870_v4  ;;  %v8240_v33 = vmul.f32 %v4724_v38, %v4523_v53  ;;  %v4877_v60 = vsel %vm524_vm1, %v8234_v49, 0.0 }
 0x4dc   : > { %v4873_v62 = vsel %vm524_vm1, %v8230_v55, 0.0  ;;  %v8238_v32 = vmul.f32 %v4714_v57, %v4515_v47  ;;  %v4764_v14 = vpop.permute.xlu0 %4763 }
 0x4dd   : > { %v4874_v37 = vadd.f32 %v4873_v62, %v4872_v31  ;;  %v4879_v38 = vsel %vm524_vm1, %v8240_v33, 0.0 }
 0x4de   : > { %v4875_v18 = vsel %vm524_vm1, %v8238_v32, 0.0  ;;  %v6495_v30 = vpop.f32.mrb[140].mxu0 }
 0x4df   : > { %v4876_v58 = vadd.f32 %v4875_v18, %v4874_v37  ;;  %v4527_v5 = vpop.f32.mrb[141].mxu0  ;;  %v4536_v24 = vadd.f32 %v6495_v30, %v8140_v8 }
 0x4e0   : > { %v4528_v27 = vadd.f32 %v8140_v8, %v4527_v5  ;;  %v6496_v57 = vpop.f32.mrb[142].mxu0  ;;  %v4774_v31 = vpop.permute.xlu0 %4773 }
 0x4e1   : > { %v4878_v48 = vadd.f32 %v4877_v60, %v4876_v58  ;;  %v4530_v11 = vpop.f32.mrb[143].mxu0  ;;  %v4539_v59 = vadd.f32 %v6496_v57, %v8140_v8  ;;  %v8254_v29 = vmul.f32 %v4739_v3, %v4536_v24 }
 0x4e2   : > { %v8250_v12 = vmul.f32 %v4729_v22, %v4528_v27  ;;  %v4531_v39 = vadd.f32 %v8140_v8, %v4530_v11 }
 0x4e3   : > { %v4880_v40 = vadd.f32 %v4879_v38, %v4878_v48  ;;  %v8260_v17 = vmul.f32 %v4744_v52, %v4539_v59  ;;  %v4885_v28 = vsel %vm524_vm1, %v8254_v29, 0.0 }
 0x4e4   : > { %v4881_v51 = vsel %vm524_vm1, %v8250_v12, 0.0  ;;  %v8258_v2 = vmul.f32 %v4734_v15, %v4531_v39  ;;  %v4769_v15 = vpop.permute.xlu1 %4768 }
 0x4e5   : > { %v4882_v54 = vadd.f32 %v4881_v51, %v4880_v40  ;;  %v4887_v52 = vsel %vm524_vm1, %v8260_v17, 0.0 }
 0x4e6   : > { %v4883_v22 = vsel %vm524_vm1, %v8258_v2, 0.0  ;;  %v6499_v13 = vpop.f32.mrb[144].mxu0 }
 0x4e7   : > { %v4884_v26 = vadd.f32 %v4883_v22, %v4882_v54  ;;  %v4543_v41 = vpop.f32.mrb[145].mxu0  ;;  %v4552_v3 = vadd.f32 %v6499_v13, %v8140_v8 }
 0x4e8   : > { %v4544_v7 = vadd.f32 %v8140_v8, %v4543_v41  ;;  %v6500_v44 = vpop.f32.mrb[146].mxu0  ;;  %v4779_v24 = vpop.permute.xlu1 %4778 }
 0x4e9   : > { %v4886_v4 = vadd.f32 %v4885_v28, %v4884_v26  ;;  %v4546_v36 = vpop.f32.mrb[147].mxu0  ;;  %v4555_v53 = vadd.f32 %v6500_v44, %v8140_v8  ;;  %v8274_v37 = vmul.f32 %v4759_v6, %v4552_v3 }
 0x4ea   : > { %v8270_v46 = vmul.f32 %v4749_v61, %v4544_v7  ;;  %v4547_v47 = vadd.f32 %v8140_v8, %v4546_v36 }
 0x4eb   : > { %v4888_v62 = vadd.f32 %v4887_v52, %v4886_v4  ;;  %v8280_v5 = vmul.f32 %v4764_v14, %v4555_v53  ;;  %v4893_v48 = vsel %vm524_vm1, %v8274_v37, 0.0 }
 0x4ec   : > { %v4889_v18 = vsel %vm524_vm1, %v8270_v46, 0.0  ;;  %v8278_v30 = vmul.f32 %v4754_v9, %v4547_v47  ;;  %v4784_v9 = vpop.permute.xlu0 %4783  ;;  %v4789_v28 = vpop.permute.xlu1 %4788 }
 0x4ed   : > { %v4890_v58 = vadd.f32 %v4889_v18, %v4888_v62  ;;  %v4895_v40 = vsel %vm524_vm1, %v8280_v5, 0.0 }
 0x4ee   : > { %v4891_v61 = vsel %vm524_vm1, %v8278_v30, 0.0  ;;  %v6503_v60 = vpop.f32.mrb[148].mxu0 }
 0x4ef   : > { %v4892_v27 = vadd.f32 %v4891_v61, %v4890_v58  ;;  %v4559_v57 = vpop.f32.mrb[149].mxu0  ;;  %v4568_v11 = vadd.f32 %v6503_v60, %v8140_v8 }
 0x4f0   : > { %v4560_v38 = vadd.f32 %v8140_v8, %v4559_v57  ;;  %v6504_v59 = vpop.f32.mrb[150].mxu0  ;;  %v4794_v4 = vpop.permute.xlu0 %4793 }
 0x4f1   : > { %v4894_v39 = vadd.f32 %v4893_v48, %v4892_v27  ;;  %v4562_v6 = vpop.f32.mrb[151].mxu0  ;;  %v4571_v14 = vadd.f32 %v6504_v59, %v8140_v8  ;;  %v8294_v13 = vmul.f32 %v4779_v24, %v4568_v11  ;;  %v4799_v57 = vpop.permute.xlu1 %4798 }
 0x4f2   : > { %v8290_v51 = vmul.f32 %v4769_v15, %v4560_v38  ;;  %v4563_v54 = vadd.f32 %v8140_v8, %v4562_v6 }
 0x4f3   : > { %v4896_v22 = vadd.f32 %v4895_v40, %v4894_v39  ;;  %v8300_v7 = vmul.f32 %v4784_v9, %v4571_v14  ;;  %v4901_v53 = vsel %vm524_vm1, %v8294_v13, 0.0 }
 0x4f4   : > { %v4897_v26 = vsel %vm524_vm1, %v8290_v51, 0.0  ;;  %v8298_v41 = vmul.f32 %v4774_v31, %v4563_v54  ;;  %v4804_v9 = vpop.permute.xlu0 %4803 }
 0x4f5   : > { %v4898_v3 = vadd.f32 %v4897_v26, %v4896_v22  ;;  %v4903_v61 = vsel %vm524_vm1, %v8300_v7, 0.0 }
 0x4f6   : > { %v4899_v44 = vsel %vm524_vm1, %v8298_v41, 0.0  ;;  %v6507_v15 = vpop.f32.mrb[152].mxu0 }
 0x4f7   : > { %v4900_v36 = vadd.f32 %v4899_v44, %v4898_v3  ;;  %v4575_v52 = vpop.f32.mrb[153].mxu0  ;;  %v4584_v47 = vadd.f32 %v6507_v15, %v8140_v8 }
 0x4f8   : > { %v4576_v62 = vadd.f32 %v8140_v8, %v4575_v52  ;;  %v6508_v31 = vpop.f32.mrb[154].mxu0 }
 0x4f9   : > { %v4902_v18 = vadd.f32 %v4901_v53, %v4900_v36  ;;  %v4578_v58 = vpop.f32.mrb[155].mxu0  ;;  %v4587_v24 = vadd.f32 %v6508_v31, %v8140_v8  ;;  %v8314_v11 = vmul.f32 %v4799_v57, %v4584_v47  ;;  %v5003_v53 = vld [vmem:[%s8622_s9] sm:$0xff] }
 0x4fa   : > { %v8310_v60 = vmul.f32 %v4789_v28, %v4576_v62  ;;  %v4579_v27 = vadd.f32 %v8140_v8, %v4578_v58  ;;  %v4928_v47 = vld [vmem:[%s8621_s8] sm:$0x1] }
 0x4fb   : > { %v4904_v48 = vadd.f32 %v4903_v61, %v4902_v18  ;;  %v8320_v6 = vmul.f32 %v4804_v9, %v4587_v24  ;;  %v4909_v8 = vsel %vm524_vm1, %v8314_v11, 0.0  ;;  %v5004_v61 = vld [vmem:[%s8623_s10] sm:$0x1] }
 0x4fc   : > { %v4905_v38 = vsel %vm524_vm1, %v8310_v60, 0.0  ;;  %v8318_v59 = vmul.f32 %v4794_v4, %v4579_v27 }
 0x4fd   : > { %v4906_v39 = vadd.f32 %v4905_v38, %v4904_v48  ;;  %v4911_v22 = vsel %vm524_vm1, %v8320_v6, 0.0 }
 0x4fe   : > { %v4907_v40 = vsel %vm524_vm1, %v8318_v59, 0.0 }
 0x4ff   : > { %v4908_v14 = vadd.f32 %v4907_v40, %v4906_v39  ;;  %v5121_v39 = vlaneseq }
 0x501   : > { %v4910_v54 = vadd.f32 %v4909_v8, %v4908_v14  ;;  %v5122_v40 = vshrl.u32 %v5121_v39, 7  ;;  %v5100_v39 = vld [vmem:[#allocation3 + $0x8b] sm:$0xff] }
 0x503   : > { %v4912_v26 = vadd.f32 %v4911_v22, %v4910_v54  ;;  %v5123_v14 = vsub.s32 0, %v5122_v40  ;;  %v5101_v40 = vld [vmem:[#allocation3 + $0x93] sm:$0xff] }
 0x505   : > { %v4913_v28 = vrot.slane %v4912_v26, 4 }
 0x507   : > { %v4914_v3 = vadd.f32 %v4913_v28, %v4912_v26 }
 0x509   : > { %v4915_v44 = vrot.slane %v4914_v3, 2 }
 0x50b   : > { %v4916_v15 = vadd.f32 %v4915_v44, %v4914_v3 }
 0x50d   : > { %v4917_v4 = vrot.slane %v4916_v15, 1 }
 0x50f   : > { %v4918_v36 = vadd.f32 %v4917_v4, %v4916_v15 }
 0x511   : > { %v4919_v52 = vmul.f32 0.00390625, %v4918_v36 }
 0x513   : > { %6526 = vmatmul.mubr.msk.f32.vlgmr.msra.gmra.mrb[156].mxu0 %vm524_vm1, %v4919_v52 }
 0x514   : > { %6530 = vmatprep.mubr.msk.f32.mxu0 %vm6899_vm0, %v6898_v1  ;;  %6529 = vmatpush3.msra.mxu0 %v5003_v53 }
 0x5e6   : > { %v4998_v62 = vpop.f32.mrb[156].mxu0 }
 0x5e7   : > { %v4999_v31 = vadd.f32 %v4998_v62, %v4928_v47  ;;  %v6527_v18 = vpop.f32.mrb[157].mxu0  ;;  %v5090_v47 = vld [vmem:[#allocation3 + $0x3b] sm:$0xff]  ;;  %v5092_v62 = vld [vmem:[#allocation3 + $0x4b] sm:$0xff] }
 0x5e9   : > { %v5002_v58 = vmax.f32 %v4999_v31, 0.0 }
 0x5eb   : > { %6531 = vmatmul.mubr.msk.f32.vlgmr.msra.gmra.mrb[158].mxu0 %vm5005_vm4, %v5002_v58  ;;  %v5094_v58 = vld [vmem:[#allocation3 + $0x5b] sm:$0xff] }
 0x6be   : > { %v5075_v1 = vpop.f32.mrb[158].mxu0 }
 0x6bf   : > { %v5076_v24 = vadd.f32 %v5075_v1, %v5004_v61  ;;  %v6532_v27 = vpop.f32.mrb[159].mxu0  ;;  %v5096_v61 = vld [vmem:[#allocation3 + $0x6b] sm:$0xff] }
 0x6c1   : > { %v5079_v57 = vsub.f32 0.0, %v5076_v24 }
 0x6c3   : > { %v5080_v48 = vmul.f32 1.442695, %v5079_v57  ;;  %v5098_v57 = vld [vmem:[#allocation3 + $0x7b] sm:$0xff] }
 0x6c5   : > { %6886 = vpow2.f32 %v5080_v48  ;;  %v5099_v48 = vld [vmem:[#allocation3 + $0x83] sm:$0xff] }
 0x6cf   : > { %v6887_v38 = vpop.eup %6886 }
 0x6d0   : > { %v5082_v9 = vadd.f32 1.0, %v6887_v38 }
 0x6d2   : > { %6888 = vrcp.f32 %v5082_v9 }
 0x6dc   : > { %v6889_v8 = vpop.eup %6888 }
 0x6dd   : > { %v5124_v54 = vrot.slane %v6889_v8, %v5123_v14  ;;  %v5103_v8 = vld [vmem:[#allocation3 + $0xa3] sm:$0xff] }
 0x6df   : > { %v5125_v22 = vmul.f32 %v5124_v54, %v8146_v10  ;;  %v5126_v26 = vmul.f32 %v5124_v54, %v8154_v43  ;;  %v5127_v28 = vmul.f32 %v5124_v54, %v8152_v25  ;;  %v5128_v3 = vmul.f32 %v5124_v54, %v8158_v42 }
 0x6e0   : > { %v5129_v44 = vmul.f32 %v5124_v54, %v8168_v16  ;;  %v5130_v15 = vmul.f32 %v5124_v54, %v8176_v34  ;;  %v5131_v4 = vmul.f32 %v5124_v54, %v8172_v20  ;;  %v5132_v36 = vmul.f32 %v5124_v54, %v8178_v23  ;;  %v5085_v34 = vld [vmem:[#allocation3 + $0x13] sm:$0xff]  ;;  %v5086_v23 = vld [vmem:[#allocation3 + $0x1b] sm:$0xff] }
 0x6e1   : > { %v8349_v52 = vmul.f32 %v5124_v54, %v8188_v50  ;;  %v8352_v53 = vmul.f32 %v5124_v54, %v8196_v19  ;;  %v8355_v10 = vmul.f32 %v5124_v54, %v8192_v45  ;;  %v8358_v25 = vmul.f32 %v5124_v54, %v8198_v35  ;;  %v5087_v50 = vld [vmem:[#allocation3 + $0x23] sm:$0xff]  ;;  %v5088_v45 = vld [vmem:[#allocation3 + $0x2b] sm:$0xff] }
 0x6e2   : > { %v8361_v43 = vmul.f32 %v5124_v54, %v8209_v0  ;;  %v8364_v42 = vmul.f32 %v5124_v54, %v8218_v56  ;;  %v8367_v16 = vmul.f32 %v5124_v54, %v8213_v21  ;;  %v8370_v20 = vmul.f32 %v5124_v54, %v8220_v63  ;;  %v5089_v21 = vld [vmem:[#allocation3 + $0x33] sm:$0xff]  ;;  %v5091_v63 = vld [vmem:[#allocation3 + $0x43] sm:$0xff] }
 0x6e3   : > { %v8373_v19 = vmul.f32 %v5124_v54, %v8230_v55  ;;  %v8376_v35 = vmul.f32 %v5124_v54, %v8238_v32  ;;  %v8379_v0 = vmul.f32 %v5124_v54, %v8234_v49  ;;  %v8382_v56 = vmul.f32 %v5124_v54, %v8240_v33  ;;  %v5093_v49 = vld [vmem:[#allocation3 + $0x53] sm:$0xff]  ;;  %v5095_v33 = vld [vmem:[#allocation3 + $0x63] sm:$0xff] }
 0x6e4   : > { %v8385_v31 = vmul.f32 %v5124_v54, %v8250_v12  ;;  %v8388_v18 = vmul.f32 %v5124_v54, %v8258_v2  ;;  %v8391_v55 = vmul.f32 %v5124_v54, %v8254_v29  ;;  %v8394_v32 = vmul.f32 %v5124_v54, %v8260_v17  ;;  %v5097_v2 = vld [vmem:[#allocation3 + $0x73] sm:$0xff] }
 0x6e5   : > { %8627 = vst [vmem:[#allocation4_spill] sm:$0xff] %v8382_v56  ;;  %v5149_v1 = vmul.f32 %v5124_v54, %v8270_v46  ;;  %v5150_v24 = vmul.f32 %v5124_v54, %v8278_v30  ;;  %v5151_v12 = vmul.f32 %v5124_v54, %v8274_v37  ;;  %v5152_v27 = vmul.f32 %v5124_v54, %v8280_v5  ;;  %v5102_v46 = vld [vmem:[#allocation3 + $0x9b] sm:$0xff] }
 0x6e6   : > { %8628 = vst [vmem:[#allocation5_spill] sm:$0xff] %v8385_v31  ;;  %8629 = vst [vmem:[#allocation6_spill] sm:$0xff] %v8388_v18  ;;  %v5153_v29 = vmul.f32 %v5124_v54, %v8290_v51  ;;  %v5154_v17 = vmul.f32 %v5124_v54, %v8298_v41  ;;  %v5155_v38 = vmul.f32 %v5124_v54, %v8294_v13  ;;  %v5105_v51 = vld [vmem:[#allocation3 + $0xb3] sm:$0xff]  ;;  %v5106_v18 = vld [vmem:[#allocation3 + $0xbb] sm:$0xff] }
 0x6e7   : > { %8630 = vst [vmem:[#allocation7_spill] sm:$0xff] %v8391_v55  ;;  %8631 = vst [vmem:[#allocation8_spill] sm:$0xff] %v8394_v32  ;;  %v5156_v9 = vmul.f32 %v5124_v54, %v8300_v7  ;;  %v5157_v30 = vmul.f32 %v5124_v54, %v8310_v60  ;;  %v5158_v37 = vmul.f32 %v5124_v54, %v8318_v59  ;;  %v5104_v32 = vld [vmem:[#allocation3 + $0xab] sm:$0xff]  ;;  %v5107_v31 = vld [vmem:[#allocation3 + $0xc3] sm:$0xff] }
 0x6e8   : > { %v5159_v5 = vmul.f32 %v5124_v54, %v8314_v11  ;;  %v5160_v14 = vmul.f32 %v5124_v54, %v8320_v6  ;;  %v8408_v55 = vadd.f32 %v5125_v22, %v5085_v34  ;;  %v8410_v41 = vadd.f32 %v5126_v26, %v5086_v23  ;;  %v5108_v60 = vld [vmem:[#allocation3 + $0xcb] sm:$0xff]  ;;  %v5109_v54 = vld [vmem:[#allocation3 + $0xd3] sm:$0xff]  ;;  %v5110_v22 = vld [vmem:[#allocation3 + $0xdb] sm:$0xff] }
 0x6e9   : > { %v8412_v13 = vadd.f32 %v5127_v28, %v5087_v50  ;;  %v8414_v7 = vadd.f32 %v5128_v3, %v5088_v45  ;;  %v8416_v56 = vadd.f32 %v5129_v44, %v5089_v21  ;;  %v8418_v59 = vadd.f32 %v5130_v15, %v5090_v47  ;;  %v5111_v34 = vld [vmem:[#allocation3 + $0xe3] sm:$0xff]  ;;  %v5112_v15 = vld [vmem:[#allocation3 + $0xeb] sm:$0xff]  ;;  %v5114_v23 = vld [vmem:[#allocation3 + $0xfb] sm:$0xff] }
 0x6ea   : > { %v8420_v11 = vadd.f32 %v5131_v4, %v5091_v63  ;;  %v8422_v6 = vadd.f32 %v5132_v36, %v5092_v62  ;;  %v8425_v26 = vadd.f32 %v8349_v52, %v5093_v49  ;;  %v8428_v28 = vadd.f32 %v8352_v53, %v5094_v58  ;;  %v5113_v4 = vld [vmem:[#allocation3 + $0xf3] sm:$0xff]  ;;  %v5116_v45 = vld [vmem:[#allocation3 + $0x10b] sm:$0xff]  ;;  %v5119_v62 = vld [vmem:[#allocation3 + $0x123] sm:$0xff] }
 0x6eb   : > { %v8431_v3 = vadd.f32 %v8355_v10, %v5095_v33  ;;  %v8434_v44 = vadd.f32 %v8358_v25, %v5096_v61  ;;  %v8437_v36 = vadd.f32 %v8361_v43, %v5097_v2  ;;  %v8440_v50 = vadd.f32 %v8364_v42, %v5098_v57  ;;  %v5115_v10 = vld [vmem:[#allocation3 + $0x103] sm:$0xff]  ;;  %v5117_v21 = vld [vmem:[#allocation3 + $0x113] sm:$0xff]  ;;  %v5120_v49 = vld [vmem:[#allocation3 + $0x12b] sm:$0xff] }
 0x6ec   : > { %v8443_v52 = vadd.f32 %v8367_v16, %v5099_v48  ;;  %v8446_v53 = vadd.f32 %v8370_v20, %v5100_v39  ;;  %v8449_v25 = vadd.f32 %v8373_v19, %v5101_v40  ;;  %v8452_v47 = vadd.f32 %v8376_v35, %v5102_v46  ;;  %v8632_v42 = vld [vmem:[#allocation4_spill] sm:$0xff]  ;;  %v5118_v16 = vld [vmem:[#allocation3 + $0x11b] sm:$0xff] }
 0x6ed   : > { %v8455_v43 = vadd.f32 %v8379_v0, %v5103_v8  ;;  %v8458_v63 = vadd.f32 %v8632_v42, %v5104_v32  ;;  %v8633_v20 = vld [vmem:[#allocation5_spill] sm:$0xff]  ;;  %v8634_v33 = vld [vmem:[#allocation6_spill] sm:$0xff]  ;;  %v8472_v0 = vadd.f32 %v5149_v1, %v5109_v54  ;;  %v8474_v48 = vadd.f32 %v5150_v24, %v5110_v22 }
 0x6ee   : > { %v8461_v58 = vadd.f32 %v8633_v20, %v5105_v51  ;;  %v8464_v61 = vadd.f32 %v8634_v33, %v5106_v18  ;;  %v8635_v19 = vld [vmem:[#allocation7_spill] sm:$0xff]  ;;  %v8636_v35 = vld [vmem:[#allocation8_spill] sm:$0xff]  ;;  %v8476_v32 = vadd.f32 %v5151_v12, %v5111_v34  ;;  %v8478_v39 = vadd.f32 %v5152_v27, %v5112_v15 }
 0x6ef   : > { %v8467_v2 = vadd.f32 %v8635_v19, %v5107_v31  ;;  %v8470_v57 = vadd.f32 %v8636_v35, %v5108_v60  ;;  %v8480_v40 = vadd.f32 %v5153_v29, %v5113_v4  ;;  %v8482_v46 = vadd.f32 %v5154_v17, %v5114_v23 }
 0x6f0   : > { %v8484_v18 = vadd.f32 %v5155_v38, %v5115_v10  ;;  %v8486_v8 = vadd.f32 %v5156_v9, %v5116_v45  ;;  %v8488_v31 = vadd.f32 %v5157_v30, %v5117_v21  ;;  %v8490_v51 = vadd.f32 %v5158_v37, %v5118_v16 }
 0x6f1   : > { %v8492_v1 = vadd.f32 %v5159_v5, %v5119_v62  ;;  %v8494_v24 = vadd.f32 %v5160_v14, %v5120_v49  ;;  %v5197_v12 = vmax.f32 %v8408_v55, 0.0  ;;  %v5198_v27 = vmax.f32 %v8410_v41, 0.0 }
 0x6f2   : > { %v5199_v29 = vmax.f32 %v8412_v13, 0.0  ;;  %v5200_v17 = vmax.f32 %v8414_v7, 0.0  ;;  %v5201_v38 = vmax.f32 %v8416_v56, 0.0  ;;  %v5202_v9 = vmax.f32 %v8418_v59, 0.0 }
 0x6f3   : > { %v5203_v30 = vmax.f32 %v8420_v11, 0.0  ;;  %v5204_v37 = vmax.f32 %v8422_v6, 0.0  ;;  %v5205_v5 = vmax.f32 %v8425_v26, 0.0  ;;  %v5206_v55 = vmax.f32 %v8428_v28, 0.0 }
 0x6f4   : > { %v5207_v14 = vmax.f32 %v8431_v3, 0.0  ;;  %v5208_v41 = vmax.f32 %v8434_v44, 0.0  ;;  %v5209_v13 = vmax.f32 %v8437_v36, 0.0  ;;  %v5210_v7 = vmax.f32 %v8440_v50, 0.0 }
 0x6f5   : > { %v5211_v56 = vmax.f32 %v8443_v52, 0.0  ;;  %v5212_v60 = vmax.f32 %v8446_v53, 0.0  ;;  %v5213_v59 = vmax.f32 %v8449_v25, 0.0  ;;  %v5214_v11 = vmax.f32 %v8452_v47, 0.0 }
 0x6f6   : > { %v5215_v6 = vmax.f32 %v8455_v43, 0.0  ;;  %v5216_v54 = vmax.f32 %v8458_v63, 0.0  ;;  %v5217_v22 = vmax.f32 %v8461_v58, 0.0  ;;  %v5218_v34 = vmax.f32 %v8464_v61, 0.0 }
 0x6f7   : > { %v5219_v26 = vmax.f32 %v8467_v2, 0.0  ;;  %v5220_v28 = vmax.f32 %v8470_v57, 0.0  ;;  %v5221_v3 = vmax.f32 %v8472_v0, 0.0  ;;  %v5222_v44 = vmax.f32 %v8474_v48, 0.0 }
 0x6f8   : > { %v5223_v15 = vmax.f32 %v8476_v32, 0.0  ;;  %v5224_v4 = vmax.f32 %v8478_v39, 0.0  ;;  %v5225_v23 = vmax.f32 %v8480_v40, 0.0  ;;  %v5226_v36 = vmax.f32 %v8482_v46, 0.0 }
 0x6f9   : > { %v5227_v50 = vmax.f32 %v8484_v18, 0.0  ;;  %v5228_v52 = vmax.f32 %v8486_v8, 0.0  ;;  %v5229_v53 = vmax.f32 %v8488_v31, 0.0  ;;  %v5230_v10 = vmax.f32 %v8490_v51, 0.0 }
 0x6fa   : > { %v5231_v45 = vmax.f32 %v8492_v1, 0.0  ;;  %v5232_v21 = vmax.f32 %v8494_v24, 0.0  ;;  %v5772_v25 = vpack.c.bf16 %v5197_v12, %v5197_v12  ;;  %v5773_v47 = vpack.c.bf16 %v5198_v27, %v5198_v27 }
 0x6fb   : > { %v5774_v43 = vpack.c.bf16 %v5199_v29, %v5199_v29  ;;  %v5775_v42 = vpack.c.bf16 %v5200_v17, %v5200_v17  ;;  %v5776_v63 = vpack.c.bf16 %v5201_v38, %v5201_v38  ;;  %v5777_v16 = vpack.c.bf16 %v5202_v9, %v5202_v9 }
 0x6fc   : > { %v5778_v62 = vpack.c.bf16 %v5203_v30, %v5203_v30  ;;  %v5779_v49 = vpack.c.bf16 %v5204_v37, %v5204_v37  ;;  %v5780_v20 = vpack.c.bf16 %v5205_v5, %v5205_v5  ;;  %v5781_v58 = vpack.c.bf16 %v5206_v55, %v5206_v55  ;;  %5378 = vst.msk [vmem:[%s8532_s20] sm:$0xf] %vm5377_vm5, %v5772_v25 }
 0x6fd   : > { %v5782_v33 = vpack.c.bf16 %v5207_v14, %v5207_v14  ;;  %v5783_v61 = vpack.c.bf16 %v5208_v41, %v5208_v41  ;;  %5379 = vst.msk [vmem:[%s8532_s20 + $0x4] sm:$0xf] %vm5377_vm5, %v5773_v47  ;;  %5380 = vst.msk [vmem:[%s8532_s20 + $0x8] sm:$0xf] %vm5377_vm5, %v5774_v43  ;;  %v5784_v19 = vpack.c.bf16 %v5209_v13, %v5209_v13 }
 0x6fe   : > { %5381 = vst.msk [vmem:[%s8532_s20 + $0xc] sm:$0xf] %vm5377_vm5, %v5775_v42  ;;  %v5785_v2 = vpack.c.bf16 %v5210_v7, %v5210_v7  ;;  %v5786_v35 = vpack.c.bf16 %v5211_v56, %v5211_v56  ;;  %v5787_v57 = vpack.c.bf16 %v5212_v60, %v5212_v60  ;;  %5382 = vst.msk [vmem:[%s8532_s20 + $0x10] sm:$0xf] %vm5377_vm5, %v5776_v63 }
 0x6ff   : > { %5383 = vst.msk [vmem:[%s8532_s20 + $0x14] sm:$0xf] %vm5377_vm5, %v5777_v16  ;;  %5384 = vst.msk [vmem:[%s8532_s20 + $0x18] sm:$0xf] %vm5377_vm5, %v5778_v62  ;;  %v5788_v0 = vpack.c.bf16 %v5213_v59, %v5213_v59  ;;  %v5789_v48 = vpack.c.bf16 %v5214_v11, %v5214_v11  ;;  %v5790_v32 = vpack.c.bf16 %v5215_v6, %v5215_v6 }
 0x700   : > { %5385 = vst.msk [vmem:[%s8532_s20 + $0x1c] sm:$0xf] %vm5377_vm5, %v5779_v49  ;;  %v5791_v39 = vpack.c.bf16 %v5216_v54, %v5216_v54  ;;  %5386 = vst.msk [vmem:[%s8532_s20 + $0x20] sm:$0xf] %vm5377_vm5, %v5780_v20  ;;  %v5792_v40 = vpack.c.bf16 %v5217_v22, %v5217_v22  ;;  %v5793_v46 = vpack.c.bf16 %v5218_v34, %v5218_v34 }
 0x701   : > { %5387 = vst.msk [vmem:[%s8532_s20 + $0x24] sm:$0xf] %vm5377_vm5, %v5781_v58  ;;  %5388 = vst.msk [vmem:[%s8532_s20 + $0x28] sm:$0xf] %vm5377_vm5, %v5782_v33  ;;  %v5794_v18 = vpack.c.bf16 %v5219_v26, %v5219_v26  ;;  %v5795_v8 = vpack.c.bf16 %v5220_v28, %v5220_v28  ;;  %v5796_v31 = vpack.c.bf16 %v5221_v3, %v5221_v3 }
 0x702   : > { %5389 = vst.msk [vmem:[%s8532_s20 + $0x2c] sm:$0xf] %vm5377_vm5, %v5783_v61  ;;  %5390 = vst.msk [vmem:[%s8532_s20 + $0x30] sm:$0xf] %vm5377_vm5, %v5784_v19  ;;  %v5797_v51 = vpack.c.bf16 %v5222_v44, %v5222_v44  ;;  %v5798_v1 = vpack.c.bf16 %v5223_v15, %v5223_v15  ;;  %v5799_v24 = vpack.c.bf16 %v5224_v4, %v5224_v4 }
 0x703   : > { %5391 = vst.msk [vmem:[%s8532_s20 + $0x34] sm:$0xf] %vm5377_vm5, %v5785_v2  ;;  %5392 = vst.msk [vmem:[%s8532_s20 + $0x38] sm:$0xf] %vm5377_vm5, %v5786_v35  ;;  %v5800_v12 = vpack.c.bf16 %v5225_v23, %v5225_v23  ;;  %v5801_v27 = vpack.c.bf16 %v5226_v36, %v5226_v36  ;;  %v5802_v29 = vpack.c.bf16 %v5227_v50, %v5227_v50 }
 0x704   : > { %5393 = vst.msk [vmem:[%s8532_s20 + $0x3c] sm:$0xf] %vm5377_vm5, %v5787_v57  ;;  %5394 = vst.msk [vmem:[%s8532_s20 + $0x40] sm:$0xf] %vm5377_vm5, %v5788_v0  ;;  %v5803_v17 = vpack.c.bf16 %v5228_v52, %v5228_v52  ;;  %v5804_v38 = vpack.c.bf16 %v5229_v53, %v5229_v53  ;;  %v5805_v9 = vpack.c.bf16 %v5230_v10, %v5230_v10 }
 0x705   : > { %5395 = vst.msk [vmem:[%s8532_s20 + $0x44] sm:$0xf] %vm5377_vm5, %v5789_v48  ;;  %5396 = vst.msk [vmem:[%s8532_s20 + $0x48] sm:$0xf] %vm5377_vm5, %v5790_v32  ;;  %v5806_v30 = vpack.c.bf16 %v5231_v45, %v5231_v45  ;;  %v5807_v37 = vpack.c.bf16 %v5232_v21, %v5232_v21 }
 0x706   : > { %5397 = vst.msk [vmem:[%s8532_s20 + $0x4c] sm:$0xf] %vm5377_vm5, %v5791_v39  ;;  %5398 = vst.msk [vmem:[%s8532_s20 + $0x50] sm:$0xf] %vm5377_vm5, %v5792_v40 }
 0x707   : > { %5399 = vst.msk [vmem:[%s8532_s20 + $0x54] sm:$0xf] %vm5377_vm5, %v5793_v46  ;;  %5400 = vst.msk [vmem:[%s8532_s20 + $0x58] sm:$0xf] %vm5377_vm5, %v5794_v18 }
 0x708   : > { %5401 = vst.msk [vmem:[%s8532_s20 + $0x5c] sm:$0xf] %vm5377_vm5, %v5795_v8  ;;  %5402 = vst.msk [vmem:[%s8532_s20 + $0x60] sm:$0xf] %vm5377_vm5, %v5796_v31 }
 0x709   : > { %5403 = vst.msk [vmem:[%s8532_s20 + $0x64] sm:$0xf] %vm5377_vm5, %v5797_v51  ;;  %5404 = vst.msk [vmem:[%s8532_s20 + $0x68] sm:$0xf] %vm5377_vm5, %v5798_v1 }
 0x70a   : > { %5405 = vst.msk [vmem:[%s8532_s20 + $0x6c] sm:$0xf] %vm5377_vm5, %v5799_v24  ;;  %5406 = vst.msk [vmem:[%s8532_s20 + $0x70] sm:$0xf] %vm5377_vm5, %v5800_v12 }
 0x70b   : > { %5407 = vst.msk [vmem:[%s8532_s20 + $0x74] sm:$0xf] %vm5377_vm5, %v5801_v27  ;;  %5408 = vst.msk [vmem:[%s8532_s20 + $0x78] sm:$0xf] %vm5377_vm5, %v5802_v29 }
 0x70c   : > { %5409 = vst.msk [vmem:[%s8532_s20 + $0x7c] sm:$0xf] %vm5377_vm5, %v5803_v17  ;;  %5410 = vst.msk [vmem:[%s8532_s20 + $0x80] sm:$0xf] %vm5377_vm5, %v5804_v38 }
 0x70d   : > { %5411 = vst.msk [vmem:[%s8532_s20 + $0x84] sm:$0xf] %vm5377_vm5, %v5805_v9  ;;  %5412 = vst.msk [vmem:[%s8532_s20 + $0x88] sm:$0xf] %vm5377_vm5, %v5806_v30 }
 0x70e   : > { %5413 = vst.msk [vmem:[%s8532_s20 + $0x8c] sm:$0xf] %vm5377_vm5, %v5807_v37 }
 0x70f PF: > { %s23_s25 = sadd.s32 1, %s6896_s25  }
 0x710   : > { %p20_p4 = scmp.ge.s32.totalorder %s23_s25, 4  }
 0x712   :  { %22 = sbr.rel (!%p20_p4) target bundleno = 1 (0x1), region = 110 }

</bundles_post_ra>
